<compile_context>
chip_gen: v7x
topology: tpu7x:2x2x1
jax: 0.10.0
libtpu: 0.0.40
codegen_flags: <defaults>
</compile_context>

<pallas_src>
import jax
import jax.numpy as jnp
import numpy as np
from jax.experimental import pallas as pl
from jax.experimental.pallas import tpu as pltpu

LANE = 128


def _round_up(n, m):
    return ((n + m - 1) // m) * m


def _pad_lanes(a, width):
    """Zero-pad the last (lane) dim of an in-kernel value up to `width`."""
    pad = width - a.shape[-1]
    if pad == 0:
        return a
    return jnp.concatenate(
        [a, jnp.zeros((a.shape[0], pad), dtype=a.dtype)], axis=-1)


def _vae_kernel(
    x_ref, eps_ref,
    w1_ref, b1_ref,
    wml_ref, bml_ref,
    w3_ref, b3_ref,
    w4_ref, b4_ref,
    recon_ref, mu_ref, logvar_ref,
):
    f32 = jnp.float32
    bf16 = jnp.bfloat16
    in_p = w1_ref.shape[0]          # lane-padded input width
    lat_p = w3_ref.shape[0]         # lane-padded latent width
    latent_dim = mu_ref.shape[1]
    input_dim = recon_ref.shape[1]

    # Pad/cast activations in-kernel so every matmul is lane-dense and K/N aligned.
    x = _pad_lanes(x_ref[...].astype(bf16), in_p)      # [tile, in_p]   bf16
    eps = _pad_lanes(eps_ref[...], lat_p)              # [tile, lat_p]  f32 (pads = 0)

    # --- encode: h = relu(x @ w1 + b1) ---
    h = jnp.dot(x, w1_ref[...], preferred_element_type=f32) + b1_ref[...]
    h = jnp.maximum(h, 0.0)

    # --- fused mu|logvar head: single matmul over [hidden, 2*lat_p] (shared LHS h) ---
    ml = jnp.dot(h.astype(bf16), wml_ref[...], preferred_element_type=f32) + bml_ref[...]
    mu = ml[:, :lat_p]
    logvar = ml[:, lat_p:]

    # --- reparameterize (f32): z = mu + eps * exp(0.5 * logvar) ---
    z = mu + eps * jnp.exp(0.5 * logvar)               # padded lanes stay exactly 0

    # --- decode ---
    h2 = jnp.dot(z.astype(bf16), w3_ref[...], preferred_element_type=f32) + b3_ref[...]
    h2 = jnp.maximum(h2, 0.0)
    logits = jnp.dot(h2.astype(bf16), w4_ref[...], preferred_element_type=f32) + b4_ref[...]

    # Only run sigmoid / store the real lanes (halves EUP + writeback vs padded slab).
    # TODO(synk): on bf16-EUP generations (v6e/v7x) compute & store sigmoid in bf16.
    recon_ref[...] = jax.nn.sigmoid(logits[:, :input_dim]).astype(recon_ref.dtype)
    mu_ref[...] = mu[:, :latent_dim].astype(mu_ref.dtype)
    logvar_ref[...] = logvar[:, :latent_dim].astype(logvar_ref.dtype)


def prepare_vae_params(params, input_dim, latent_dim):
    """One-time weight prep: pad to lane width, cast to bf16, fuse the mu/logvar head.

    Call once (outside the training/inference step); vae_forward then does no per-call
    weight padding/casting work.
    """
    hidden = params["w1"].shape[1]
    assert hidden % LANE == 0, "hidden width must be a multiple of 128"
    in_p = _round_up(input_dim, LANE)
    lat_p = _round_up(latent_dim, LANE)
    f32, bf16 = jnp.float32, jnp.bfloat16

    def pad2(a, rows, cols):
        return jnp.pad(a, ((0, rows - a.shape[0]), (0, cols - a.shape[1])))

    return {
        "input_dim": input_dim, "latent_dim": latent_dim,
        "hidden": hidden, "in_p": in_p, "lat_p": lat_p,
        "w1": pad2(params["w1"], in_p, hidden).astype(bf16),
        "b1": params["b1"].astype(f32),
        "w_ml": jnp.concatenate(
            [pad2(params["w_mu"], hidden, lat_p),
             pad2(params["w_logvar"], hidden, lat_p)], axis=1).astype(bf16),
        "b_ml": jnp.concatenate(
            [pad2(params["b_mu"], 1, lat_p),
             pad2(params["b_logvar"], 1, lat_p)], axis=1).astype(f32),
        "w3": pad2(params["w3"], lat_p, hidden).astype(bf16),
        "b3": params["b3"].astype(f32),
        "w4": pad2(params["w4"], hidden, in_p).astype(bf16),
        "b4": pad2(params["b4"], 1, in_p).astype(f32),
    }


def vae_forward(x, eps, p, *, batch_tile=None):
    """Fused VAE forward.

    x:   [B, input_dim]  float32
    eps: [B, latent_dim] float32 (standard-normal reparameterization noise)
    p:   output of prepare_vae_params().
    Returns (recon [B, input_dim], mu [B, latent_dim], logvar [B, latent_dim]).
    """
    B, input_dim = x.shape
    latent_dim = eps.shape[1]
    assert input_dim == p["input_dim"] and latent_dim == p["latent_dim"]
    hidden, in_p, lat_p = p["hidden"], p["in_p"], p["lat_p"]

    # Single grid step up to 512 rows (1 TC on v5e/v6e; weight-fetch bound on v7x, so
    # megacore-splitting would only duplicate the dominant HBM traffic).
    if batch_tile is None:
        batch_tile = min(_round_up(B, 8), 512)
    bp = _round_up(B, batch_tile)
    grid = (bp // batch_tile,)

    if bp != B:  # row-pad only (no lane padding / dtype casts in the wrapper)
        x = jnp.pad(x, ((0, bp - B), (0, 0)))
        eps = jnp.pad(eps, ((0, bp - B), (0, 0)))

    act = lambda feat: pl.BlockSpec((batch_tile, feat), lambda i: (i, 0))
    # Grid-invariant weights/biases: same block every step -> fetched once, VMEM-resident.
    # TODO(synk): single-buffer these (pipeline_mode=pl.Buffered(1)) and set an explicit
    # vmem_limit_bytes if hidden/input_dim are scaled up (v7x has only 64 MiB VMEM).
    full = lambda shape: pl.BlockSpec(shape, lambda i: (0, 0))

    in_specs = [
        act(input_dim),                    # x    (unpadded, full-dim block)
        act(latent_dim),                   # eps  (unpadded, full-dim block)
        full((in_p, hidden)),              # w1
        full((1, hidden)),                 # b1
        full((hidden, 2 * lat_p)),         # w_mu|w_logvar (fused)
        full((1, 2 * lat_p)),              # b_mu|b_logvar (fused)
        full((lat_p, hidden)),             # w3
        full((1, hidden)),                 # b3
        full((hidden, in_p)),              # w4
        full((1, in_p)),                   # b4
    ]
    out_specs = [act(input_dim), act(latent_dim), act(latent_dim)]
    out_shape = [
        jax.ShapeDtypeStruct((bp, input_dim), jnp.float32),
        jax.ShapeDtypeStruct((bp, latent_dim), jnp.float32),
        jax.ShapeDtypeStruct((bp, latent_dim), jnp.float32),
    ]

    # TODO(synk): if this runs every step, prefetch the weight DMA across pallas_call
    # boundaries (cross-call semaphore future) to hide the prologue weight fetch.
    recon, mu, logvar = pl.pallas_call(
        _vae_kernel,
        out_shape=out_shape,
        grid_spec=pltpu.PrefetchScalarGridSpec(
            num_scalar_prefetch=0,
            grid=grid,
            in_specs=in_specs,
            out_specs=out_specs,
        ),
        compiler_params=pltpu.CompilerParams(
            dimension_semantics=("arbitrary",),
        ),
    )(x, eps, p["w1"], p["b1"], p["w_ml"], p["b_ml"],
      p["w3"], p["b3"], p["w4"], p["b4"])

    if bp != B:
        recon, mu, logvar = recon[:B], mu[:B], logvar[:B]
    return recon, mu, logvar


def init_vae_params(key, input_dim, latent_dim, hidden=512):
    """Deterministic init mimicking nn.Linear default (uniform +/- 1/sqrt(fan_in)).

    Weights stored [in, out] (kernel layout), biases [1, out], all float32.
    """
    def linear(k, fan_in, fan_out):
        kw, kb = jax.random.split(k)
        bound = 1.0 / np.sqrt(fan_in)
        w = jax.random.uniform(kw, (fan_in, fan_out), jnp.float32, -bound, bound)
        b = jax.random.uniform(kb, (1, fan_out), jnp.float32, -bound, bound)
        return w, b

    k1, k2, k3, k4, k5 = jax.random.split(key, 5)
    w1, b1 = linear(k1, input_dim, hidden)
    w_mu, b_mu = linear(k2, hidden, latent_dim)
    w_lv, b_lv = linear(k3, hidden, latent_dim)
    w3, b3 = linear(k4, latent_dim, hidden)
    w4, b4 = linear(k5, hidden, input_dim)
    return {
        "w1": w1, "b1": b1,
        "w_mu": w_mu, "b_mu": b_mu,
        "w_logvar": w_lv, "b_logvar": b_lv,
        "w3": w3, "b3": b3,
        "w4": w4, "b4": b4,
    }


def vae_forward_ref(x, eps, p):
    """Pure-JAX reference mirroring the kernel's bf16-weight / f32-accumulate matmuls."""
    bf16, f32 = jnp.bfloat16, jnp.float32
    dot = lambda a, w: jnp.dot(a.astype(bf16), w.astype(bf16), preferred_element_type=f32)
    h = jax.nn.relu(dot(x.astype(f32), p["w1"]) + p["b1"])
    mu = dot(h, p["w_mu"]) + p["b_mu"]
    logvar = dot(h, p["w_logvar"]) + p["b_logvar"]
    z = mu + eps * jnp.exp(0.5 * logvar)
    h2 = jax.nn.relu(dot(z, p["w3"]) + p["b3"])
    recon = jax.nn.sigmoid(dot(h2, p["w4"]) + p["b4"])
    return recon, mu, logvar


if __name__ == "__main__":
    INPUT_DIM = 64
    LATENT_DIM = 16
    BATCH = 256   # -> single 256-row grid step (no megacore split; weight-fetch bound)

    key = jax.random.PRNGKey(0)
    k_params, k_x, k_eps = jax.random.split(key, 3)

    params = init_vae_params(k_params, INPUT_DIM, LATENT_DIM)
    prepped = prepare_vae_params(params, INPUT_DIM, LATENT_DIM)   # one-time weight prep
    jax.block_until_ready(prepped)

    x = jax.random.uniform(k_x, (BATCH, INPUT_DIM), jnp.float32)      # pixel-like data in [0,1]
    eps = jax.random.normal(k_eps, (BATCH, LATENT_DIM), jnp.float32)  # reparameterization noise

    recon, mu, logvar = vae_forward(x, eps, prepped)
    jax.block_until_ready((recon, mu, logvar))

    # correctness check against a pure-JAX reference using identical arithmetic
    r_ref, mu_ref, lv_ref = vae_forward_ref(x, eps, params)
    np.testing.assert_allclose(np.asarray(recon), np.asarray(r_ref), atol=1e-3, rtol=1e-3)
    np.testing.assert_allclose(np.asarray(mu), np.asarray(mu_ref), atol=1e-3, rtol=1e-3)
    np.testing.assert_allclose(np.asarray(logvar), np.asarray(lv_ref), atol=1e-3, rtol=1e-3)

    print("KERNEL_OK")
</pallas_src>

<mosaic_0001>
module attributes {stable_mosaic.version = 11 : i64} {
  func.func @_vae_kernel(%arg0: i32, %arg1: memref<256x64xf32, #tpu.memory_space<vmem>>, %arg2: memref<256x16xf32, #tpu.memory_space<vmem>>, %arg3: memref<128x512xbf16, #tpu.memory_space<vmem>>, %arg4: memref<1x512xf32, #tpu.memory_space<vmem>>, %arg5: memref<512x256xbf16, #tpu.memory_space<vmem>>, %arg6: memref<1x256xf32, #tpu.memory_space<vmem>>, %arg7: memref<128x512xbf16, #tpu.memory_space<vmem>>, %arg8: memref<1x512xf32, #tpu.memory_space<vmem>>, %arg9: memref<512x128xbf16, #tpu.memory_space<vmem>>, %arg10: memref<1x128xf32, #tpu.memory_space<vmem>>, %arg11: memref<256x64xf32, #tpu.memory_space<vmem>>, %arg12: memref<256x16xf32, #tpu.memory_space<vmem>>, %arg13: memref<256x16xf32, #tpu.memory_space<vmem>>) attributes {dimension_semantics = [#tpu.dimension_semantics<arbitrary>], iteration_bounds = array<i64: 1>, scalar_prefetch = 0 : i64, scratch_operands = 0 : i64, tpu.core_type = #tpu.core_type<tc>, window_params = [{transform_indices = @transform_0, window_bounds = array<i64: 256, 64>}, {transform_indices = @transform_1, window_bounds = array<i64: 256, 16>}, {pipeline_mode = #tpu.pipeline_mode<synchronous>, transform_indices = @transform_2, window_bounds = array<i64: 128, 512>}, {pipeline_mode = #tpu.pipeline_mode<synchronous>, transform_indices = @transform_3, window_bounds = array<i64: 1, 512>}, {pipeline_mode = #tpu.pipeline_mode<synchronous>, transform_indices = @transform_4, window_bounds = array<i64: 512, 256>}, {pipeline_mode = #tpu.pipeline_mode<synchronous>, transform_indices = @transform_5, window_bounds = array<i64: 1, 256>}, {pipeline_mode = #tpu.pipeline_mode<synchronous>, transform_indices = @transform_6, window_bounds = array<i64: 128, 512>}, {pipeline_mode = #tpu.pipeline_mode<synchronous>, transform_indices = @transform_7, window_bounds = array<i64: 1, 512>}, {pipeline_mode = #tpu.pipeline_mode<synchronous>, transform_indices = @transform_8, window_bounds = array<i64: 512, 128>}, {pipeline_mode = #tpu.pipeline_mode<synchronous>, transform_indices = @transform_9, window_bounds = array<i64: 1, 128>}, {transform_indices = @transform_10, window_bounds = array<i64: 256, 64>}, {transform_indices = @transform_11, window_bounds = array<i64: 256, 16>}, {transform_indices = @transform_12, window_bounds = array<i64: 256, 16>}]} {
    %c0 = arith.constant 0 : index
    %c0_0 = arith.constant 0 : index
    %0 = vector.load %arg1[%c0, %c0_0] : memref<256x64xf32, #tpu.memory_space<vmem>>, vector<256x64xf32>
    %1 = arith.truncf %0 : vector<256x64xf32> to vector<256x64xbf16>
    %cst = arith.constant 0.000000e+00 : bf16
    %2 = vector.broadcast %cst : bf16 to vector<256x64xbf16>
    %3 = tpu.concatenate %1, %2 in 1 : vector<256x64xbf16>, vector<256x64xbf16> -> vector<256x128xbf16>
    %c0_1 = arith.constant 0 : index
    %c0_2 = arith.constant 0 : index
    %4 = vector.load %arg2[%c0_1, %c0_2] : memref<256x16xf32, #tpu.memory_space<vmem>>, vector<256x16xf32>
    %cst_3 = arith.constant 0.000000e+00 : f32
    %5 = vector.broadcast %cst_3 : f32 to vector<256x112xf32>
    %6 = tpu.concatenate %4, %5 in 1 : vector<256x16xf32>, vector<256x112xf32> -> vector<256x128xf32>
    %c0_4 = arith.constant 0 : index
    %c0_5 = arith.constant 0 : index
    %7 = vector.load %arg3[%c0_4, %c0_5] : memref<128x512xbf16, #tpu.memory_space<vmem>>, vector<128x512xbf16>
    %cst_6 = arith.constant dense<0.000000e+00> : vector<256x512xf32>
    %8 = tpu.matmul %3, %7, %cst_6 {dimension_numbers = #tpu.dot_dimension_numbers<[1], [0], [0], [1], [0, 0, 1, 1], [], []>} : vector<256x128xbf16>, vector<128x512xbf16>, vector<256x512xf32> -> vector<256x512xf32>
    %c0_7 = arith.constant 0 : index
    %c0_8 = arith.constant 0 : index
    %9 = vector.load %arg4[%c0_7, %c0_8] : memref<1x512xf32, #tpu.memory_space<vmem>>, vector<1x512xf32>
    %10 = vector.broadcast %9 : vector<1x512xf32> to vector<256x512xf32>
    %11 = arith.addf %8, %10 : vector<256x512xf32>
    %cst_9 = arith.constant 0.000000e+00 : f32
    %12 = vector.broadcast %cst_9 : f32 to vector<256x512xf32>
    %13 = arith.maximumf %11, %12 : vector<256x512xf32>
    %14 = arith.truncf %13 : vector<256x512xf32> to vector<256x512xbf16>
    %c0_10 = arith.constant 0 : index
    %c0_11 = arith.constant 0 : index
    %15 = vector.load %arg5[%c0_10, %c0_11] : memref<512x256xbf16, #tpu.memory_space<vmem>>, vector<512x256xbf16>
    %cst_12 = arith.constant dense<0.000000e+00> : vector<256x256xf32>
    %16 = tpu.matmul %14, %15, %cst_12 {dimension_numbers = #tpu.dot_dimension_numbers<[1], [0], [0], [1], [0, 0, 1, 1], [], []>} : vector<256x512xbf16>, vector<512x256xbf16>, vector<256x256xf32> -> vector<256x256xf32>
    %c0_13 = arith.constant 0 : index
    %c0_14 = arith.constant 0 : index
    %17 = vector.load %arg6[%c0_13, %c0_14] : memref<1x256xf32, #tpu.memory_space<vmem>>, vector<1x256xf32>
    %18 = vector.broadcast %17 : vector<1x256xf32> to vector<256x256xf32>
    %19 = arith.addf %16, %18 : vector<256x256xf32>
    %20 = vector.extract_strided_slice %19 {offsets = [0, 0], sizes = [256, 128], strides = [1, 1]} : vector<256x256xf32> to vector<256x128xf32>
    %21 = vector.extract_strided_slice %19 {offsets = [0, 128], sizes = [256, 128], strides = [1, 1]} : vector<256x256xf32> to vector<256x128xf32>
    %cst_15 = arith.constant 5.000000e-01 : f32
    %22 = vector.broadcast %cst_15 : f32 to vector<256x128xf32>
    %23 = arith.mulf %22, %21 : vector<256x128xf32>
    %24 = math.exp %23 : vector<256x128xf32>
    %25 = arith.mulf %6, %24 : vector<256x128xf32>
    %26 = arith.addf %20, %25 : vector<256x128xf32>
    %27 = arith.truncf %26 : vector<256x128xf32> to vector<256x128xbf16>
    %c0_16 = arith.constant 0 : index
    %c0_17 = arith.constant 0 : index
    %28 = vector.load %arg7[%c0_16, %c0_17] : memref<128x512xbf16, #tpu.memory_space<vmem>>, vector<128x512xbf16>
    %cst_18 = arith.constant dense<0.000000e+00> : vector<256x512xf32>
    %29 = tpu.matmul %27, %28, %cst_18 {dimension_numbers = #tpu.dot_dimension_numbers<[1], [0], [0], [1], [0, 0, 1, 1], [], []>} : vector<256x128xbf16>, vector<128x512xbf16>, vector<256x512xf32> -> vector<256x512xf32>
    %c0_19 = arith.constant 0 : index
    %c0_20 = arith.constant 0 : index
    %30 = vector.load %arg8[%c0_19, %c0_20] : memref<1x512xf32, #tpu.memory_space<vmem>>, vector<1x512xf32>
    %31 = vector.broadcast %30 : vector<1x512xf32> to vector<256x512xf32>
    %32 = arith.addf %29, %31 : vector<256x512xf32>
    %cst_21 = arith.constant 0.000000e+00 : f32
    %33 = vector.broadcast %cst_21 : f32 to vector<256x512xf32>
    %34 = arith.maximumf %32, %33 : vector<256x512xf32>
    %35 = arith.truncf %34 : vector<256x512xf32> to vector<256x512xbf16>
    %c0_22 = arith.constant 0 : index
    %c0_23 = arith.constant 0 : index
    %36 = vector.load %arg9[%c0_22, %c0_23] : memref<512x128xbf16, #tpu.memory_space<vmem>>, vector<512x128xbf16>
    %cst_24 = arith.constant dense<0.000000e+00> : vector<256x128xf32>
    %37 = tpu.matmul %35, %36, %cst_24 {dimension_numbers = #tpu.dot_dimension_numbers<[1], [0], [0], [1], [0, 0, 1, 1], [], []>} : vector<256x512xbf16>, vector<512x128xbf16>, vector<256x128xf32> -> vector<256x128xf32>
    %c0_25 = arith.constant 0 : index
    %c0_26 = arith.constant 0 : index
    %38 = vector.load %arg10[%c0_25, %c0_26] : memref<1x128xf32, #tpu.memory_space<vmem>>, vector<1x128xf32>
    %39 = vector.broadcast %38 : vector<1x128xf32> to vector<256x128xf32>
    %40 = arith.addf %37, %39 : vector<256x128xf32>
    %41 = vector.extract_strided_slice %40 {offsets = [0, 0], sizes = [256, 64], strides = [1, 1]} : vector<256x128xf32> to vector<256x64xf32>
    %42 = arith.negf %41 : vector<256x64xf32>
    %43 = math.exp %42 : vector<256x64xf32>
    %cst_27 = arith.constant 1.000000e+00 : f32
    %44 = vector.broadcast %cst_27 : f32 to vector<256x64xf32>
    %45 = arith.addf %44, %43 : vector<256x64xf32>
    %46 = arith.divf %44, %45 : vector<256x64xf32>
    %c0_28 = arith.constant 0 : index
    %c0_29 = arith.constant 0 : index
    %47 = vector.load %arg11[%c0_28, %c0_29] : memref<256x64xf32, #tpu.memory_space<vmem>>, vector<256x64xf32>
    tpu.vector_store %arg11[%c0_28, %c0_29], %46 {strides = array<i32>} : memref<256x64xf32, #tpu.memory_space<vmem>>, vector<256x64xf32>,
    %48 = vector.extract_strided_slice %20 {offsets = [0, 0], sizes = [256, 16], strides = [1, 1]} : vector<256x128xf32> to vector<256x16xf32>
    %c0_30 = arith.constant 0 : index
    %c0_31 = arith.constant 0 : index
    %49 = vector.load %arg12[%c0_30, %c0_31] : memref<256x16xf32, #tpu.memory_space<vmem>>, vector<256x16xf32>
    tpu.vector_store %arg12[%c0_30, %c0_31], %48 {strides = array<i32>} : memref<256x16xf32, #tpu.memory_space<vmem>>, vector<256x16xf32>,
    %50 = vector.extract_strided_slice %21 {offsets = [0, 0], sizes = [256, 16], strides = [1, 1]} : vector<256x128xf32> to vector<256x16xf32>
    %c0_32 = arith.constant 0 : index
    %c0_33 = arith.constant 0 : index
    %51 = vector.load %arg13[%c0_32, %c0_33] : memref<256x16xf32, #tpu.memory_space<vmem>>, vector<256x16xf32>
    tpu.vector_store %arg13[%c0_32, %c0_33], %50 {strides = array<i32>} : memref<256x16xf32, #tpu.memory_space<vmem>>, vector<256x16xf32>,
    return
  }
  func.func @transform_0(%arg0: i32) -> (i32, i32) {
    %c0_i32 = arith.constant 0 : i32
    %c0_i32_0 = arith.constant 0 : i32
    return %arg0, %c0_i32 : i32, i32
  }
  func.func @transform_1(%arg0: i32) -> (i32, i32) {
    %c0_i32 = arith.constant 0 : i32
    %c0_i32_0 = arith.constant 0 : i32
    return %arg0, %c0_i32 : i32, i32
  }
  func.func @transform_2(%arg0: i32) -> (i32, i32) {
    %c0_i32 = arith.constant 0 : i32
    %c0_i32_0 = arith.constant 0 : i32
    %c0_i32_1 = arith.constant 0 : i32
    return %c0_i32, %c0_i32_0 : i32, i32
  }
  func.func @transform_3(%arg0: i32) -> (i32, i32) {
    %c0_i32 = arith.constant 0 : i32
    %c0_i32_0 = arith.constant 0 : i32
    %c0_i32_1 = arith.constant 0 : i32
    return %c0_i32, %c0_i32_0 : i32, i32
  }
  func.func @transform_4(%arg0: i32) -> (i32, i32) {
    %c0_i32 = arith.constant 0 : i32
    %c0_i32_0 = arith.constant 0 : i32
    %c0_i32_1 = arith.constant 0 : i32
    return %c0_i32, %c0_i32_0 : i32, i32
  }
  func.func @transform_5(%arg0: i32) -> (i32, i32) {
    %c0_i32 = arith.constant 0 : i32
    %c0_i32_0 = arith.constant 0 : i32
    %c0_i32_1 = arith.constant 0 : i32
    return %c0_i32, %c0_i32_0 : i32, i32
  }
  func.func @transform_6(%arg0: i32) -> (i32, i32) {
    %c0_i32 = arith.constant 0 : i32
    %c0_i32_0 = arith.constant 0 : i32
    %c0_i32_1 = arith.constant 0 : i32
    return %c0_i32, %c0_i32_0 : i32, i32
  }
  func.func @transform_7(%arg0: i32) -> (i32, i32) {
    %c0_i32 = arith.constant 0 : i32
    %c0_i32_0 = arith.constant 0 : i32
    %c0_i32_1 = arith.constant 0 : i32
    return %c0_i32, %c0_i32_0 : i32, i32
  }
  func.func @transform_8(%arg0: i32) -> (i32, i32) {
    %c0_i32 = arith.constant 0 : i32
    %c0_i32_0 = arith.constant 0 : i32
    %c0_i32_1 = arith.constant 0 : i32
    return %c0_i32, %c0_i32_0 : i32, i32
  }
  func.func @transform_9(%arg0: i32) -> (i32, i32) {
    %c0_i32 = arith.constant 0 : i32
    %c0_i32_0 = arith.constant 0 : i32
    %c0_i32_1 = arith.constant 0 : i32
    return %c0_i32, %c0_i32_0 : i32, i32
  }
  func.func @transform_10(%arg0: i32) -> (i32, i32) {
    %c0_i32 = arith.constant 0 : i32
    %c0_i32_0 = arith.constant 0 : i32
    return %arg0, %c0_i32 : i32, i32
  }
  func.func @transform_11(%arg0: i32) -> (i32, i32) {
    %c0_i32 = arith.constant 0 : i32
    %c0_i32_0 = arith.constant 0 : i32
    return %arg0, %c0_i32 : i32, i32
  }
  func.func @transform_12(%arg0: i32) -> (i32, i32) {
    %c0_i32 = arith.constant 0 : i32
    %c0_i32_0 = arith.constant 0 : i32
    return %arg0, %c0_i32 : i32, i32
  }
}

</mosaic_0001>

<bundles_post_ra>
// kernel: tpu_custom_call.1
= control target key start
LH: loop header
LB: loop body
LE: loop exit
PB: predicated region body
PF: predicated region fallthrough
CT: control target
= control target key end

     0   :  { %18 = vsyncpa [#allocation3], 0  ;;  %s6531_s0 = inlined_call_operand.vmem [shape: f32[256,64], index: 0, kind: input, shape index: {}]   ;;  %s6532_s1 = inlined_call_operand.vmem [shape: f32[256,16], index: 1, kind: input, shape index: {}]   ;;  %s6533_s2 = inlined_call_operand.hbm [shape: bf16[128,512], index: 2, kind: input, shape index: {}]   ;;  %s6534_s3 = inlined_call_operand.vmem [shape: f32[1,512], index: 3, kind: input, shape index: {}]   ;;  %s6535_s4 = inlined_call_operand.vmem [shape: bf16[512,256], index: 4, kind: input, shape index: {}]   ;;  %s6536_s5 = inlined_call_operand.vmem [shape: f32[1,256], index: 5, kind: input, shape index: {}]   ;;  %s6537_s6 = inlined_call_operand.hbm [shape: bf16[128,512], index: 6, kind: input, shape index: {}]   ;;  %s6538_s7 = inlined_call_operand.vmem [shape: f32[1,512], index: 7, kind: input, shape index: {}]   ;;  %s6539_s8 = inlined_call_operand.hbm [shape: bf16[512,128], index: 8, kind: input, shape index: {}]   ;;  %s6540_s9 = inlined_call_operand.vmem [shape: f32[1,128], index: 9, kind: input, shape index: {}]   ;;  %s6541_s10 = inlined_call_operand.vmem [shape: f32[256,64], index: 10, kind: output, shape index: {0}]   ;;  %s6542_s11 = inlined_call_operand.vmem [shape: f32[256,16], index: 11, kind: output, shape index: {1}]   ;;  %s6543_s12 = inlined_call_operand.vmem [shape: f32[256,16], index: 12, kind: output, shape index: {2}]  }
   0x1   :  { %19 = vsyncpa [#allocation5], 0  ;;  %s4743_s21 = smov [#allocation4]   ;;  %s4744_s23 = smov [#allocation2]  }
   0x2   :  { %s47_s22 = sshll.u32 %s4743_s21, 4  ;;  %s29_s24 = sshll.u32 %s4744_s23, 4  ;;  %s48_s22 = int_to_ptr.vmem [resolvable:$true] %s47_s22  ;;  %s4816_s24 = int_to_ptr.vmem [resolvable:$true] %s29_s24 }
   0x3   :  { %s4673_s27 = scalar_lea.hbm %s6537_s6, 4096 }
   0x4   :  { %p4674_p0 = scmp.ne.s32.totalorder %s6537_s6, %s4673_s27  ;;  %p4677_p1 = scmp.lt.u32.totalorder %s4673_s27, %s6537_s6 }
   0x6   :  { %p4679_p2 = pnand %p4677_p1, %p4674_p0 }
   0x8   :  { %4682 = shalt.err (!%p4679_p2)
}
   0x9   :  { %s4683_s14 = scalar_lea.vmem %s48_s22, 4096  ;;  %p4688_p4 = scmp.lt.s32.totalorder %s48_s22, %s48_s22 }
   0xa   :  { %p4684_p3 = scmp.ne.s32.totalorder %s48_s22, %s4683_s14  ;;  %p4689_p5 = scmp.lt.s32.totalorder %s4683_s14, %s4683_s14 }
   0xc   :  { %p4690_p6 = por %p4689_p5, %p4688_p4 }
   0xe   :  { %p4691_p7 = pnand %p4690_p6, %p4684_p3 }
  0x10   :  { %4694 = shalt.err (!%p4691_p7)
}
  0x11   :  { %s4745_s15 = smov 256   ;;  %s4746_s16 = smov 16  }
  0x12   :  { %53 = dma.hbm_to_vmem [thread:$0]  %s6537_s6, 4096, %s48_s22, [#allocation5], %s4745_s15, %s4745_s15, %s4746_s16  }
  0x13   :  { %s4695_s21 = scalar_lea.hbm %s6533_s2, 4096 }
  0x14   :  { %p4696_p8 = scmp.ne.s32.totalorder %s6533_s2, %s4695_s21  ;;  %p4699_p9 = scmp.lt.u32.totalorder %s4695_s21, %s6533_s2 }
  0x16   :  { %p4701_p10 = pnand %p4699_p9, %p4696_p8 }
  0x18   :  { %4704 = shalt.err (!%p4701_p10)
}
  0x19   :  { %s4705_s28 = scalar_lea.vmem %s4816_s24, 4096  ;;  %p4710_p12 = scmp.lt.s32.totalorder %s4816_s24, %s4816_s24 }
  0x1a   :  { %p4706_p11 = scmp.ne.s32.totalorder %s4816_s24, %s4705_s28  ;;  %p4711_p13 = scmp.lt.s32.totalorder %s4705_s28, %s4705_s28 }
  0x1c   :  { %p4712_p0 = por %p4711_p13, %p4710_p12 }
  0x1e   :  { %p4713_p1 = pnand %p4712_p0, %p4706_p11 }
  0x20   :  { %4716 = shalt.err (!%p4713_p1)
}
  0x21   :  { %35 = dma.hbm_to_vmem [thread:$0]  %s6533_s2, 4096, %s4816_s24, [#allocation3], %s4745_s15, %s4745_s15, %s4746_s16  }
  0x22   :  { %s4747_s29 = smov [#allocation6]   ;;  %s4717_s17 = scalar_lea.hbm %s6539_s8, 4096 }
  0x23   :  { %s61_s30 = sshll.u32 %s4747_s29, 4  ;;  %p4718_p2 = scmp.ne.s32.totalorder %s6539_s8, %s4717_s17  ;;  %s62_s30 = int_to_ptr.vmem [resolvable:$true] %s61_s30 }
  0x24   :  { %p4721_p3 = scmp.lt.u32.totalorder %s4717_s17, %s6539_s8 }
  0x26   :  { %p4723_p4 = pnand %p4721_p3, %p4718_p2 }
  0x28   :  { %4726 = shalt.err (!%p4723_p4)
}
  0x29   :  { %s4727_s23 = scalar_lea.vmem %s62_s30, 4096  ;;  %p4732_p6 = scmp.lt.s32.totalorder %s62_s30, %s62_s30 }
  0x2a   :  { %p4728_p5 = scmp.ne.s32.totalorder %s62_s30, %s4727_s23  ;;  %p4733_p7 = scmp.lt.s32.totalorder %s4727_s23, %s4727_s23 }
  0x2c   :  { %p4734_p8 = por %p4733_p7, %p4732_p6 }
  0x2e   :  { %p4735_p9 = pnand %p4734_p8, %p4728_p5 }
  0x30   :  { %4738 = shalt.err (!%p4735_p9)
}
  0x31   :  { %s4748_s2 = smov 64   ;;  %s4749_s24 = smov 4  }
  0x32   :  { %67 = dma.hbm_to_vmem [thread:$0]  %s6539_s8, 4096, %s62_s30, [#allocation5], %s4748_s2, %s4748_s2, %s4749_s24  }
  0x33   :  { %4739 = dma.done.wait [#allocation3], 4096  }
  0x34   :  { %4740 = vsyncadd [#allocation3], 4294963200 }
  0x35   :  { %4741 = dma.done.wait [#allocation5], 8192  }
  0x36   :  { %4742 = vsyncadd [#allocation5], 4294959104  ;;  %v4750_v0 = vmov 0   ;;  %v4257_v1 = vld [vmem:[#allocation2 + $0x4] ss:$16 sps:$4 sm:$0xff]   ;;  %v81_v23 = vld [vmem:[%s6531_s0 + $0x8] sm:$0xff] }
  0x37   :  { %489 = vmatprep.mubr.bf16.mxu0 %v4750_v0  ;;  %682 = vmatprep.mubr.bf16.mxu1 %v4750_v0  ;;  %v4259_v2 = vld [vmem:[#allocation2] ss:$16 sps:$4 sm:$0xff]   ;;  %v4260_v3 = vld [vmem:[#allocation2 + $0x24] ss:$16 sps:$4 sm:$0xff]   ;;  %v4281_v13 = vld [vmem:[#allocation2 + $0xc] ss:$16 sps:$4 sm:$0xff]  }
  0x38   :  { %457 = vmatprep.subr.bf16.mxu0 %v4257_v1  ;;  %v4262_v4 = vld [vmem:[#allocation2 + $0x20] ss:$16 sps:$4 sm:$0xff]   ;;  %v4263_v5 = vld [vmem:[#allocation2 + $0x44] ss:$16 sps:$4 sm:$0xff]   ;;  %650 = vmatprep.subr.bf16.mxu1 %v4281_v13  ;;  %v4286_v16 = vld [vmem:[#allocation2 + $0x8] ss:$16 sps:$4 sm:$0xff]  }
  0x39   :  { %458 = vmatpush1.bf16.msra.mxu0 %v4259_v2  ;;  %v4265_v6 = vld [vmem:[#allocation2 + $0x40] ss:$16 sps:$4 sm:$0xff]   ;;  %v4266_v7 = vld [vmem:[#allocation2 + $0x64] ss:$16 sps:$4 sm:$0xff]   ;;  %v4287_v18 = vld [vmem:[#allocation2 + $0x2c] ss:$16 sps:$4 sm:$0xff]   ;;  %651 = vmatpush1.bf16.msra.mxu1 %v4286_v16 }
  0x3a   :  { %459 = vmatprep.subr.bf16.mxu0 %v4260_v3  ;;  %v4268_v8 = vld [vmem:[#allocation2 + $0x60] ss:$16 sps:$4 sm:$0xff]   ;;  %v4269_v9 = vld [vmem:[#allocation2 + $0x84] ss:$16 sps:$4 sm:$0xff]   ;;  %v4289_v19 = vld [vmem:[#allocation2 + $0x28] ss:$16 sps:$4 sm:$0xff]   ;;  %652 = vmatprep.subr.bf16.mxu1 %v4287_v18 }
  0x3b   :  { %v4271_v10 = vld [vmem:[#allocation2 + $0x80] ss:$16 sps:$4 sm:$0xff]   ;;  %v4272_v11 = vld [vmem:[#allocation2 + $0xa4] ss:$16 sps:$4 sm:$0xff]   ;;  %v4290_v20 = vld [vmem:[#allocation2 + $0x4c] ss:$16 sps:$4 sm:$0xff]  }
  0x3c   :  { %v4274_v12 = vld [vmem:[#allocation2 + $0xa0] ss:$16 sps:$4 sm:$0xff]   ;;  %v4275_v14 = vld [vmem:[#allocation2 + $0xc4] ss:$16 sps:$4 sm:$0xff]   ;;  %v4295_v25 = vld [vmem:[#allocation2 + $0x48] ss:$16 sps:$4 sm:$0xff]  }
  0x3d   :  { %460 = vmatpush1.bf16.msra.mxu0 %v4262_v4  ;;  %v4277_v15 = vld [vmem:[#allocation2 + $0xc0] ss:$16 sps:$4 sm:$0xff]   ;;  %v4278_v17 = vld [vmem:[#allocation2 + $0xe4] ss:$16 sps:$4 sm:$0xff]   ;;  %653 = vmatpush1.bf16.msra.mxu1 %v4289_v19  ;;  %v4296_v26 = vld [vmem:[#allocation2 + $0x6c] ss:$16 sps:$4 sm:$0xff]  }
  0x3e   :  { %461 = vmatprep.subr.bf16.mxu0 %v4263_v5  ;;  %v4280_v21 = vld [vmem:[#allocation2 + $0xe0] ss:$16 sps:$4 sm:$0xff]   ;;  %v4285_v24 = vld [vmem:[%s6535_s4 + $0x4] ss:$8 sps:$4 sm:$0xff]   ;;  %654 = vmatprep.subr.bf16.mxu1 %v4290_v20  ;;  %vm128_vm0 = vcmask 523264   ;;  %v83_v33 = vld [vmem:[%s6531_s0 + $0x18] sm:$0xff] }
  0x3f   :  { %v80_v22 = vld [vmem:[%s6531_s0] sm:$0xff]  ;;  %v4294_v29 = vld [vmem:[%s6535_s4 + $0x14] ss:$8 sps:$4 sm:$0xff]   ;;  %v4298_v30 = vld [vmem:[#allocation2 + $0x68] ss:$16 sps:$4 sm:$0xff]   ;;  %vm210_vm1 = vcmask 130048  }
  0x40   :  { %v4870_v27 = vpack.c.bf16 %v81_v23, %v80_v22  ;;  %v4283_v28 = vld [vmem:[%s6535_s4] ss:$8 sps:$4 sm:$0xff]   ;;  %v4299_v31 = vld [vmem:[#allocation2 + $0x8c] ss:$16 sps:$4 sm:$0xff]   ;;  %v82_v32 = vld [vmem:[%s6531_s0 + $0x10] sm:$0xff] }
  0x41   :  { %462 = vmatpush1.bf16.msra.mxu0 %v4265_v6  ;;  %655 = vmatpush1.bf16.msra.mxu1 %v4295_v25  ;;  %v4292_v34 = vld [vmem:[%s6535_s4 + $0x10] ss:$8 sps:$4 sm:$0xff]   ;;  %v4303_v35 = vld [vmem:[%s6535_s4 + $0x24] ss:$8 sps:$4 sm:$0xff]   ;;  %v113_v38 = vpack.c.bf16 %v83_v33, %v82_v32  ;;  %v4301_v39 = vld [vmem:[%s6535_s4 + $0x20] ss:$8 sps:$4 sm:$0xff]  }
  0x42   :  { %463 = vmatprep.subr.bf16.mxu0 %v4266_v7  ;;  %656 = vmatprep.subr.bf16.mxu1 %v4296_v26  ;;  %v4304_v36 = vld [vmem:[#allocation2 + $0x88] ss:$16 sps:$4 sm:$0xff]   ;;  %v4305_v37 = vld [vmem:[#allocation2 + $0xac] ss:$16 sps:$4 sm:$0xff]   ;;  %v84_v43 = vld [vmem:[%s6531_s0 + $0x20] sm:$0xff] }
  0x43   :  { %v4307_v40 = vld [vmem:[#allocation2 + $0xa8] ss:$16 sps:$4 sm:$0xff]   ;;  %v4312_v41 = vld [vmem:[%s6535_s4 + $0x34] ss:$8 sps:$4 sm:$0xff]   ;;  %v4319_v47 = vld [vmem:[%s6535_s4 + $0x44] ss:$8 sps:$4 sm:$0xff]  }
  0x44   :  { %v4308_v42 = vld [vmem:[#allocation2 + $0xcc] ss:$16 sps:$4 sm:$0xff]   ;;  %v4310_v45 = vld [vmem:[%s6535_s4 + $0x30] ss:$8 sps:$4 sm:$0xff]   ;;  %v4317_v51 = vld [vmem:[%s6535_s4 + $0x40] ss:$8 sps:$4 sm:$0xff]  }
  0x45   :  { %464 = vmatpush1.bf16.msra.mxu0 %v4268_v8  ;;  %657 = vmatpush1.bf16.msra.mxu1 %v4298_v30  ;;  %v85_v44 = vld [vmem:[%s6531_s0 + $0x28] sm:$0xff]  ;;  %v4322_v52 = vld [vmem:[%s6535_s4 + $0x54] ss:$8 sps:$4 sm:$0xff]   ;;  %v4320_v55 = vld [vmem:[%s6535_s4 + $0x50] ss:$8 sps:$4 sm:$0xff]  }
  0x46   :  { %465 = vmatprep.subr.bf16.mxu0 %v4269_v9  ;;  %658 = vmatprep.subr.bf16.mxu1 %v4299_v31  ;;  %v4313_v46 = vld [vmem:[#allocation2 + $0xc8] ss:$16 sps:$4 sm:$0xff]   ;;  %v4314_v48 = vld [vmem:[#allocation2 + $0xec] ss:$16 sps:$4 sm:$0xff]   ;;  %v114_v49 = vpack.c.bf16 %v85_v44, %v84_v43  ;;  %v86_v53 = vld [vmem:[%s6531_s0 + $0x30] sm:$0xff] }
  0x47   :  { %v4316_v50 = vld [vmem:[#allocation2 + $0xe8] ss:$16 sps:$4 sm:$0xff]   ;;  %v4325_v56 = vld [vmem:[%s6535_s4 + $0x64] ss:$8 sps:$4 sm:$0xff]   ;;  %v4328_v59 = vld [vmem:[%s6535_s4 + $0x74] ss:$8 sps:$4 sm:$0xff]  }
  0x48   :  { %v87_v54 = vld [vmem:[%s6531_s0 + $0x38] sm:$0xff]  ;;  %v4323_v57 = vld [vmem:[%s6535_s4 + $0x60] ss:$8 sps:$4 sm:$0xff]   ;;  %v4331_v63 = vld [vmem:[%s6535_s4 + $0x84] ss:$8 sps:$4 sm:$0xff]  }
  0x49   :  { %466 = vmatpush1.bf16.msra.mxu0 %v4271_v10  ;;  %659 = vmatpush1.bf16.msra.mxu1 %v4304_v36  ;;  %v115_v58 = vpack.c.bf16 %v87_v54, %v86_v53  ;;  %v88_v60 = vld [vmem:[%s6531_s0 + $0x40] sm:$0xff]  ;;  %v89_v61 = vld [vmem:[%s6531_s0 + $0x48] sm:$0xff]  ;;  %v4326_v62 = vld [vmem:[%s6535_s4 + $0x70] ss:$8 sps:$4 sm:$0xff]  }
  0x4a   :  { %467 = vmatprep.subr.bf16.mxu0 %v4272_v11  ;;  %660 = vmatprep.subr.bf16.mxu1 %v4305_v37  ;;  %v4329_v1 = vld [vmem:[%s6535_s4 + $0x80] ss:$8 sps:$4 sm:$0xff]   ;;  %v116_v2 = vpack.c.bf16 %v89_v61, %v88_v60  ;;  %v4334_v3 = vld [vmem:[%s6535_s4 + $0x94] ss:$8 sps:$4 sm:$0xff]   ;;  %v4332_v6 = vld [vmem:[%s6535_s4 + $0x90] ss:$8 sps:$4 sm:$0xff]  }
  0x4b   :  { %v90_v4 = vld [vmem:[%s6531_s0 + $0x50] sm:$0xff]  ;;  %v91_v5 = vld [vmem:[%s6531_s0 + $0x58] sm:$0xff]  ;;  %v4337_v7 = vld [vmem:[%s6535_s4 + $0xa4] ss:$8 sps:$4 sm:$0xff]  }
  0x4c   :  { %v4335_v8 = vld [vmem:[%s6535_s4 + $0xa0] ss:$8 sps:$4 sm:$0xff]   ;;  %v117_v9 = vpack.c.bf16 %v91_v5, %v90_v4  ;;  %v4340_v10 = vld [vmem:[%s6535_s4 + $0xb4] ss:$8 sps:$4 sm:$0xff]   ;;  %v4338_v13 = vld [vmem:[%s6535_s4 + $0xb0] ss:$8 sps:$4 sm:$0xff]  }
  0x4d   :  { %468 = vmatpush1.bf16.msra.mxu0 %v4274_v12  ;;  %661 = vmatpush1.bf16.msra.mxu1 %v4307_v40  ;;  %v92_v11 = vld [vmem:[%s6531_s0 + $0x60] sm:$0xff]  ;;  %v93_v12 = vld [vmem:[%s6531_s0 + $0x68] sm:$0xff]  ;;  %v94_v18 = vld [vmem:[%s6531_s0 + $0x70] sm:$0xff] }
  0x4e   :  { %469 = vmatprep.subr.bf16.mxu0 %v4275_v14  ;;  %662 = vmatprep.subr.bf16.mxu1 %v4308_v42  ;;  %v4343_v14 = vld [vmem:[%s6535_s4 + $0xc4] ss:$8 sps:$4 sm:$0xff]   ;;  %v118_v16 = vpack.c.bf16 %v93_v12, %v92_v11  ;;  %v95_v19 = vld [vmem:[%s6531_s0 + $0x78] sm:$0xff]  ;;  %v4347_v22 = vld [vmem:[%s6535_s4 + $0xe0] ss:$8 sps:$4 sm:$0xff]  }
  0x4f   :  { %v4344_v20 = vld [vmem:[%s6535_s4 + $0xd0] ss:$8 sps:$4 sm:$0xff]   ;;  %v119_v23 = vpack.c.bf16 %v95_v19, %v94_v18  ;;  %v97_v25 = vld [vmem:[%s6531_s0 + $0x88] sm:$0xff]  ;;  %v100_v30 = vld [vmem:[%s6531_s0 + $0xa0] sm:$0xff] }
  0x50   :  { %v101_v31 = vld [vmem:[%s6531_s0 + $0xa8] sm:$0xff]  ;;  %v102_v33 = vld [vmem:[%s6531_s0 + $0xb0] sm:$0xff]  ;;  %v104_v37 = vld [vmem:[%s6531_s0 + $0xc0] sm:$0xff] }
  0x51   :  { %470 = vmatpush1.bf16.msra.mxu0 %v4277_v15  ;;  %663 = vmatpush1.bf16.msra.mxu1 %v4313_v46  ;;  %v4341_v15 = vld [vmem:[%s6535_s4 + $0xc0] ss:$8 sps:$4 sm:$0xff]   ;;  %v122_v32 = vpack.c.bf16 %v101_v31, %v100_v30  ;;  %v4352_v36 = vld [vmem:[%s6535_s4 + $0xf4] ss:$8 sps:$4 sm:$0xff]   ;;  %v4355_v43 = vld [vmem:[%s6535_s4 + $0x104] ss:$8 sps:$4 sm:$0xff]  }
  0x52   :  { %471 = vmatprep.subr.bf16.mxu0 %v4278_v17  ;;  %664 = vmatprep.subr.bf16.mxu1 %v4314_v48  ;;  %v4346_v17 = vld [vmem:[%s6535_s4 + $0xd4] ss:$8 sps:$4 sm:$0xff]   ;;  %v109_v46 = vld [vmem:[%s6531_s0 + $0xe8] sm:$0xff]  ;;  %v275_v54 = vld [vmem:[%s6534_s3] sm:$0xf] }
  0x53   :  { %v107_v42 = vld [vmem:[%s6531_s0 + $0xd8] sm:$0xff]  ;;  %v110_v48 = vld [vmem:[%s6531_s0 + $0xf0] sm:$0xff]  ;;  %v4359_v30 = vld [vmem:[%s6535_s4 + $0x120] ss:$8 sps:$4 sm:$0xff]  }
  0x54   :  { %v4356_v19 = vld [vmem:[%s6535_s4 + $0x110] ss:$8 sps:$4 sm:$0xff]  }
  0x55   :  { %472 = vmatpush1.bf16.msra.mxu0 %v4280_v21  ;;  %665 = vmatpush1.bf16.msra.mxu1 %v4316_v50  ;;  %v4349_v21 = vld [vmem:[%s6535_s4 + $0xe4] ss:$8 sps:$4 sm:$0xff]  }
  0x56   :  { %1431 = vmatprep.subr.bf16.mxu0 %v4285_v24  ;;  %v96_v24 = vld [vmem:[%s6531_s0 + $0x80] sm:$0xff] }
  0x57   :  { %v120_v26 = vpack.c.bf16 %v97_v25, %v96_v24 }
  0x58   :  { %3704 = vmatmul.mubr.msk.bf16.vlgmr.msra.gmra.mrb[0].mxu0 %vm128_vm0, %v4870_v27  ;;  %3720 = vmatmul.mubr.msk.bf16.vlgmr.msra.gmra.mrb[0].mxu1 %vm128_vm0, %v4870_v27  ;;  %v98_v27 = vld [vmem:[%s6531_s0 + $0x90] sm:$0xff] }
  0x59   :  { %499 = vmatprep.mubr.bf16.mxu0 %v4750_v0  ;;  %1432 = vmatpush1.bf16.msra.mxu0 %v4283_v28  ;;  %v99_v28 = vld [vmem:[%s6531_s0 + $0x98] sm:$0xff] }
  0x5a   :  { %1433 = vmatprep.subr.bf16.mxu0 %v4294_v29  ;;  %692 = vmatprep.mubr.bf16.mxu1 %v4750_v0  ;;  %v121_v29 = vpack.c.bf16 %v99_v28, %v98_v27 }
  0x5d   :  { %1434 = vmatpush1.bf16.msra.mxu0 %v4292_v34  ;;  %v103_v34 = vld [vmem:[%s6531_s0 + $0xb8] sm:$0xff] }
  0x5e   :  { %1435 = vmatprep.subr.bf16.mxu0 %v4303_v35  ;;  %v123_v35 = vpack.c.bf16 %v103_v34, %v102_v33  ;;  %v4364_v33 = vld [vmem:[%s6535_s4 + $0x134] ss:$8 sps:$4 sm:$0xff]  }
  0x60   :  { %3705 = vmatmul.mubr.msk.bf16.gmra.mrb[4].mxu0 %vm128_vm0, %v113_v38  ;;  %3721 = vmatmul.mubr.msk.bf16.gmra.mrb[4].mxu1 %vm128_vm0, %v113_v38  ;;  %v105_v38 = vld [vmem:[%s6531_s0 + $0xc8] sm:$0xff] }
  0x61   :  { %509 = vmatprep.mubr.bf16.mxu0 %v4750_v0  ;;  %1436 = vmatpush1.bf16.msra.mxu0 %v4301_v39  ;;  %v4350_v39 = vld [vmem:[%s6535_s4 + $0xf0] ss:$8 sps:$4 sm:$0xff]   ;;  %v124_v40 = vpack.c.bf16 %v105_v38, %v104_v37 }
  0x62   :  { %1437 = vmatprep.subr.bf16.mxu0 %v4312_v41  ;;  %702 = vmatprep.mubr.bf16.mxu1 %v4750_v0  ;;  %v106_v41 = vld [vmem:[%s6531_s0 + $0xd0] sm:$0xff] }
  0x63   :  { %v125_v44 = vpack.c.bf16 %v107_v42, %v106_v41  ;;  %v4362_v41 = vld [vmem:[%s6535_s4 + $0x130] ss:$8 sps:$4 sm:$0xff]  }
  0x65   :  { %1438 = vmatpush1.bf16.msra.mxu0 %v4310_v45  ;;  %v108_v45 = vld [vmem:[%s6531_s0 + $0xe0] sm:$0xff] }
  0x66   :  { %1439 = vmatprep.subr.bf16.mxu0 %v4319_v47  ;;  %v126_v47 = vpack.c.bf16 %v109_v46, %v108_v45 }
  0x68   :  { %3706 = vmatmul.mubr.msk.bf16.gmra.mrb[8].mxu0 %vm128_vm0, %v114_v49  ;;  %3722 = vmatmul.mubr.msk.bf16.gmra.mrb[8].mxu1 %vm128_vm0, %v114_v49  ;;  %v111_v49 = vld [vmem:[%s6531_s0 + $0xf8] sm:$0xff] }
  0x69   :  { %519 = vmatprep.mubr.bf16.mxu0 %v4750_v0  ;;  %1440 = vmatpush1.bf16.msra.mxu0 %v4317_v51  ;;  %v127_v50 = vpack.c.bf16 %v111_v49, %v110_v48  ;;  %v277_v51 = vlaneseq }
  0x6a   :  { %1441 = vmatprep.subr.bf16.mxu0 %v4322_v52  ;;  %712 = vmatprep.mubr.bf16.mxu1 %v4750_v0 }
  0x6b   :  { %v5123_v52 = vshrl.u32 %v277_v51, 7 }
  0x6d   :  { %1442 = vmatpush1.bf16.msra.mxu0 %v4320_v55  ;;  %v5126_v53 = vsub.s32 0, %v5123_v52  ;;  %v5132_v55 = vsub.s32 1, %v5123_v52  ;;  %v287_v25 = vsub.s32 2, %v5123_v52  ;;  %v291_v27 = vsub.s32 3, %v5123_v52 }
  0x6e   :  { %1443 = vmatprep.subr.bf16.mxu0 %v4325_v56 }
  0x6f   :  { %v5135_v56 = vrot.slane %v275_v54, %v5126_v53 }
  0x70   :  { %3707 = vmatmul.mubr.msk.bf16.gmra.mrb[12].mxu0 %vm128_vm0, %v115_v58  ;;  %3723 = vmatmul.mubr.msk.bf16.gmra.mrb[12].mxu1 %vm128_vm0, %v115_v58 }
  0x71   :  { %529 = vmatprep.mubr.bf16.mxu0 %v4750_v0  ;;  %1444 = vmatpush1.bf16.msra.mxu0 %v4323_v57  ;;  %v5138_v57 = vrot.slane %v275_v54, %v5132_v55 }
  0x72   :  { %1445 = vmatprep.subr.bf16.mxu0 %v4328_v59  ;;  %722 = vmatprep.mubr.bf16.mxu1 %v4750_v0 }
  0x75   :  { %1446 = vmatpush1.bf16.msra.mxu0 %v4326_v62 }
  0x76   :  { %1447 = vmatprep.subr.bf16.mxu0 %v4331_v63 }
  0x78   :  { %3708 = vmatmul.mubr.msk.bf16.gmra.mrb[16].mxu0 %vm128_vm0, %v116_v2  ;;  %3724 = vmatmul.mubr.msk.bf16.gmra.mrb[16].mxu1 %vm128_vm0, %v116_v2 }
  0x79   :  { %539 = vmatprep.mubr.bf16.mxu0 %v4750_v0  ;;  %1448 = vmatpush1.bf16.msra.mxu0 %v4329_v1 }
  0x7a   :  { %1449 = vmatprep.subr.bf16.mxu0 %v4334_v3  ;;  %732 = vmatprep.mubr.bf16.mxu1 %v4750_v0 }
  0x7d   :  { %1450 = vmatpush1.bf16.msra.mxu0 %v4332_v6 }
  0x7e   :  { %1451 = vmatprep.subr.bf16.mxu0 %v4337_v7 }
  0x80   :  { %3709 = vmatmul.mubr.msk.bf16.gmra.mrb[20].mxu0 %vm128_vm0, %v117_v9  ;;  %3725 = vmatmul.mubr.msk.bf16.gmra.mrb[20].mxu1 %vm128_vm0, %v117_v9 }
  0x81   :  { %549 = vmatprep.mubr.bf16.mxu0 %v4750_v0  ;;  %1452 = vmatpush1.bf16.msra.mxu0 %v4335_v8 }
  0x82   :  { %1453 = vmatprep.subr.bf16.mxu0 %v4340_v10  ;;  %742 = vmatprep.mubr.bf16.mxu1 %v4750_v0  ;;  %v4353_v10 = vld [vmem:[%s6535_s4 + $0x100] ss:$8 sps:$4 sm:$0xff]  }
  0x85   :  { %1454 = vmatpush1.bf16.msra.mxu0 %v4338_v13  ;;  %v4358_v13 = vld [vmem:[%s6535_s4 + $0x114] ss:$8 sps:$4 sm:$0xff]  }
  0x86   :  { %1455 = vmatprep.subr.bf16.mxu0 %v4343_v14 }
  0x88   :  { %3710 = vmatmul.mubr.msk.bf16.gmra.mrb[24].mxu0 %vm128_vm0, %v118_v16  ;;  %3726 = vmatmul.mubr.msk.bf16.gmra.mrb[24].mxu1 %vm128_vm0, %v118_v16 }
  0x89   :  { %559 = vmatprep.mubr.bf16.mxu0 %v4750_v0  ;;  %1456 = vmatpush1.bf16.msra.mxu0 %v4341_v15 }
  0x8a   :  { %1457 = vmatprep.subr.bf16.mxu0 %v4346_v17  ;;  %752 = vmatprep.mubr.bf16.mxu1 %v4750_v0 }
  0x8d   :  { %1458 = vmatpush1.bf16.msra.mxu0 %v4344_v20 }
  0x8e   :  { %1459 = vmatprep.subr.bf16.mxu0 %v4349_v21 }
  0x90   :  { %3711 = vmatmul.mubr.msk.bf16.gmra.mrb[28].mxu0 %vm128_vm0, %v119_v23  ;;  %3727 = vmatmul.mubr.msk.bf16.gmra.mrb[28].mxu1 %vm128_vm0, %v119_v23 }
  0x91   :  { %569 = vmatprep.mubr.bf16.mxu0 %v4750_v0  ;;  %1460 = vmatpush1.bf16.msra.mxu0 %v4347_v22  ;;  %v4361_v22 = vld [vmem:[%s6535_s4 + $0x124] ss:$8 sps:$4 sm:$0xff]  }
  0x92   :  { %762 = vmatprep.mubr.bf16.mxu1 %v4750_v0  ;;  %1461 = vmatprep.subr.bf16.mxu0 %v4352_v36  ;;  %v5172_v36 = vrot.slane %v275_v54, %v287_v25 }
  0x95   :  { %1462 = vmatpush1.bf16.msra.mxu0 %v4350_v39  ;;  %v5177_v39 = vrot.slane %v275_v54, %v291_v27 }
  0x96   :  { %1624 = vmatprep.subr.bf16.mxu0 %v4355_v43 }
  0x98   :  { %3712 = vmatmul.mubr.msk.bf16.gmra.mrb[32].mxu0 %vm128_vm0, %v120_v26  ;;  %3728 = vmatmul.mubr.msk.bf16.gmra.mrb[32].mxu1 %vm128_vm0, %v120_v26 }
  0x99   :  { %579 = vmatprep.mubr.bf16.mxu0 %v4750_v0  ;;  %772 = vmatprep.mubr.bf16.mxu1 %v4750_v0 }
  0xa0   :  { %3713 = vmatmul.mubr.msk.bf16.gmra.mrb[36].mxu0 %vm128_vm0, %v121_v29  ;;  %3729 = vmatmul.mubr.msk.bf16.gmra.mrb[36].mxu1 %vm128_vm0, %v121_v29 }
  0xa1   :  { %589 = vmatprep.mubr.bf16.mxu0 %v4750_v0  ;;  %782 = vmatprep.mubr.bf16.mxu1 %v4750_v0 }
  0xa8   :  { %3714 = vmatmul.mubr.msk.bf16.gmra.mrb[40].mxu0 %vm128_vm0, %v122_v32  ;;  %3730 = vmatmul.mubr.msk.bf16.gmra.mrb[40].mxu1 %vm128_vm0, %v122_v32 }
  0xa9   :  { %599 = vmatprep.mubr.bf16.mxu0 %v4750_v0  ;;  %792 = vmatprep.mubr.bf16.mxu1 %v4750_v0 }
  0xb0   :  { %3715 = vmatmul.mubr.msk.bf16.gmra.mrb[44].mxu0 %vm128_vm0, %v123_v35  ;;  %3731 = vmatmul.mubr.msk.bf16.gmra.mrb[44].mxu1 %vm128_vm0, %v123_v35 }
  0xb1   :  { %609 = vmatprep.mubr.bf16.mxu0 %v4750_v0  ;;  %802 = vmatprep.mubr.bf16.mxu1 %v4750_v0 }
  0xb8   :  { %3716 = vmatmul.mubr.msk.bf16.gmra.mrb[48].mxu0 %vm128_vm0, %v124_v40  ;;  %3732 = vmatmul.mubr.msk.bf16.gmra.mrb[48].mxu1 %vm128_vm0, %v124_v40 }
  0xb9   :  { %619 = vmatprep.mubr.bf16.mxu0 %v4750_v0  ;;  %812 = vmatprep.mubr.bf16.mxu1 %v4750_v0 }
  0xc0   :  { %3717 = vmatmul.mubr.msk.bf16.gmra.mrb[52].mxu0 %vm128_vm0, %v125_v44  ;;  %3733 = vmatmul.mubr.msk.bf16.gmra.mrb[52].mxu1 %vm128_vm0, %v125_v44  ;;  %v4367_v44 = vld [vmem:[%s6535_s4 + $0x144] ss:$8 sps:$4 sm:$0xff]  }
  0xc1   :  { %629 = vmatprep.mubr.bf16.mxu0 %v4750_v0  ;;  %822 = vmatprep.mubr.bf16.mxu1 %v4750_v0 }
  0xc8   :  { %3718 = vmatmul.mubr.msk.bf16.gmra.mrb[56].mxu0 %vm128_vm0, %v126_v47  ;;  %3734 = vmatmul.mubr.msk.bf16.gmra.mrb[56].mxu1 %vm128_vm0, %v126_v47 }
  0xc9   :  { %639 = vmatprep.mubr.bf16.mxu0 %v4750_v0  ;;  %832 = vmatprep.mubr.bf16.mxu1 %v4750_v0 }
  0xd0   :  { %3719 = vmatmul.mubr.msk.bf16.gmra.mrb[60].mxu0 %vm128_vm0, %v127_v50  ;;  %3735 = vmatmul.mubr.msk.bf16.gmra.mrb[60].mxu1 %vm128_vm0, %v127_v50 }
  0xd1   :  { %2239 = vmatprep.mubr.bf16.mxu1 %v4750_v0 }
 0x12b   :  { %v491_v58 = vpop.f32.mrb[0].mxu0  ;;  %v684_v45 = vpop.f32.mrb[0].mxu1 }
 0x12c   :  { %v492_v59 = vadd.f32 %v491_v58, %v5135_v56  ;;  %v493_v60 = vpop.f32.mrb[1].mxu0  ;;  %v685_v48 = vadd.f32 %v684_v45, %v5172_v36  ;;  %v686_v49 = vpop.f32.mrb[1].mxu1 }
 0x12d   :  { %v494_v61 = vadd.f32 %v493_v60, %v5138_v57  ;;  %v495_v62 = vpop.f32.mrb[2].mxu0  ;;  %v687_v51 = vadd.f32 %v686_v49, %v5177_v39  ;;  %v688_v54 = vpop.f32.mrb[2].mxu1  ;;  %v4365_v60 = vld [vmem:[%s6535_s4 + $0x140] ss:$8 sps:$4 sm:$0xff]   ;;  %v4374_v49 = vld [vmem:[%s6535_s4 + $0x170] ss:$8 sps:$4 sm:$0xff]  }
 0x12e   :  { %v496_v63 = vadd.f32 %v495_v62, %v5135_v56  ;;  %v497_v1 = vpop.f32.mrb[3].mxu0  ;;  %v843_v3 = vmax.f32 %v492_v59, 0.0  ;;  %v689_v62 = vadd.f32 %v688_v54, %v5172_v36 }
 0x12f   :  { %v498_v2 = vadd.f32 %v497_v1, %v5138_v57  ;;  %v844_v5 = vmax.f32 %v494_v61, 0.0  ;;  %v845_v61 = vmax.f32 %v685_v48, 0.0 }
 0x130   :  { %v847_v4 = vmax.f32 %v496_v63, 0.0  ;;  %v690_v63 = vpop.f32.mrb[3].mxu1 }
 0x131   :  { %v848_v6 = vmax.f32 %v498_v2, 0.0 }
 0x132   :  { %v971_v7 = vpack.c.bf16 %v847_v4, %v843_v3  ;;  %v4370_v3 = vld [vmem:[%s6535_s4 + $0x154] ss:$8 sps:$4 sm:$0xff]   ;;  %v846_v4 = vmax.f32 %v687_v51, 0.0 }
 0x133   :  { %v972_v8 = vpack.c.bf16 %v848_v6, %v844_v5  ;;  %v501_v9 = vpop.f32.mrb[4].mxu0  ;;  %v691_v5 = vadd.f32 %v690_v63, %v5177_v39 }
 0x134   :  { %v502_v11 = vadd.f32 %v501_v9, %v5135_v56  ;;  %v503_v12 = vpop.f32.mrb[5].mxu0 }
 0x135   :  { %v504_v14 = vadd.f32 %v503_v12, %v5138_v57  ;;  %v505_v15 = vpop.f32.mrb[6].mxu0  ;;  %1463 = vmatprep.mubr.bf16.mxu0 %v972_v8  ;;  %v849_v8 = vmax.f32 %v689_v62, 0.0 }
 0x136   :  { %v506_v16 = vadd.f32 %v505_v15, %v5135_v56  ;;  %v507_v17 = vpop.f32.mrb[7].mxu0  ;;  %1464 = vmatmul.mubr.bf16.vlgmr.msra.gmra.mrb[64].mxu0 %v971_v7  ;;  %v851_v20 = vmax.f32 %v502_v11, 0.0  ;;  %v850_v11 = vmax.f32 %v691_v5, 0.0 }
 0x137   :  { %v508_v18 = vadd.f32 %v507_v17, %v5138_v57  ;;  %1625 = vmatpush1.bf16.msra.mxu0 %v4353_v10  ;;  %v852_v23 = vmax.f32 %v504_v14, 0.0  ;;  %v5203_v14 = vpack.c.bf16 %v849_v8, %v845_v61  ;;  %v4373_v17 = vld [vmem:[%s6535_s4 + $0x164] ss:$8 sps:$4 sm:$0xff]  }
 0x138   :  { %v855_v21 = vmax.f32 %v506_v16, 0.0  ;;  %1626 = vmatprep.subr.bf16.mxu0 %v4358_v13  ;;  %v4368_v13 = vld [vmem:[%s6535_s4 + $0x150] ss:$8 sps:$4 sm:$0xff]  }
 0x139   :  { %v856_v24 = vmax.f32 %v508_v18, 0.0  ;;  %v5208_v18 = vpack.c.bf16 %v850_v11, %v846_v4 }
 0x13a   :  { %v975_v26 = vpack.c.bf16 %v855_v21, %v851_v20 }
 0x13b   :  { %v976_v28 = vpack.c.bf16 %v856_v24, %v852_v23  ;;  %v511_v29 = vpop.f32.mrb[8].mxu0  ;;  %1627 = vmatpush1.bf16.msra.mxu0 %v4356_v19  ;;  %v694_v19 = vpop.f32.mrb[4].mxu1 }
 0x13c   :  { %v512_v31 = vadd.f32 %v511_v29, %v5135_v56  ;;  %v513_v32 = vpop.f32.mrb[9].mxu0  ;;  %1628 = vmatprep.subr.bf16.mxu0 %v4361_v22  ;;  %v695_v22 = vadd.f32 %v694_v19, %v5172_v36  ;;  %v696_v23 = vpop.f32.mrb[5].mxu1 }
 0x13d   :  { %v514_v34 = vadd.f32 %v513_v32, %v5138_v57  ;;  %v515_v35 = vpop.f32.mrb[10].mxu0  ;;  %1473 = vmatprep.mubr.bf16.mxu0 %v976_v28  ;;  %v698_v28 = vpop.f32.mrb[6].mxu1 }
 0x13e   :  { %v516_v37 = vadd.f32 %v515_v35, %v5135_v56  ;;  %v517_v38 = vpop.f32.mrb[11].mxu0  ;;  %1474 = vmatmul.mubr.bf16.gmra.mrb[68].mxu0 %v975_v26  ;;  %v859_v42 = vmax.f32 %v512_v31, 0.0  ;;  %v697_v26 = vadd.f32 %v696_v23, %v5177_v39  ;;  %v4371_v31 = vld [vmem:[%s6535_s4 + $0x160] ss:$8 sps:$4 sm:$0xff]   ;;  %v853_v32 = vmax.f32 %v695_v22, 0.0 }
 0x13f   :  { %v518_v40 = vadd.f32 %v517_v38, %v5138_v57  ;;  %1629 = vmatpush1.bf16.msra.mxu0 %v4359_v30  ;;  %v860_v46 = vmax.f32 %v514_v34, 0.0  ;;  %v700_v34 = vpop.f32.mrb[7].mxu1  ;;  %v4376_v38 = vld [vmem:[%s6535_s4 + $0x174] ss:$8 sps:$4 sm:$0xff]  }
 0x140   :  { %v863_v43 = vmax.f32 %v516_v37, 0.0  ;;  %1630 = vmatprep.subr.bf16.mxu0 %v4364_v33  ;;  %v699_v33 = vadd.f32 %v698_v28, %v5172_v36 }
 0x141   :  { %v864_v47 = vmax.f32 %v518_v40, 0.0  ;;  %v854_v40 = vmax.f32 %v697_v26, 0.0  ;;  %v4380_v26 = vld [vmem:[%s6535_s4 + $0x190] ss:$8 sps:$4 sm:$0xff]  }
 0x142   :  { %v979_v50 = vpack.c.bf16 %v863_v43, %v859_v42 }
 0x143   :  { %v980_v58 = vpack.c.bf16 %v864_v47, %v860_v46  ;;  %v521_v59 = vpop.f32.mrb[12].mxu0  ;;  %1631 = vmatpush1.bf16.msra.mxu0 %v4362_v41  ;;  %v701_v41 = vadd.f32 %v700_v34, %v5177_v39 }
 0x144   :  { %v522_v1 = vadd.f32 %v521_v59, %v5135_v56  ;;  %v523_v2 = vpop.f32.mrb[13].mxu0  ;;  %1632 = vmatprep.subr.bf16.mxu0 %v4367_v44  ;;  %v857_v44 = vmax.f32 %v699_v33, 0.0 }
 0x145   :  { %v524_v6 = vadd.f32 %v523_v2, %v5138_v57  ;;  %v525_v7 = vpop.f32.mrb[14].mxu0  ;;  %1483 = vmatprep.mubr.bf16.mxu0 %v980_v58  ;;  %v858_v47 = vmax.f32 %v701_v41, 0.0  ;;  %v4379_v58 = vld [vmem:[%s6535_s4 + $0x184] ss:$8 sps:$4 sm:$0xff]  }
 0x146   :  { %v526_v9 = vadd.f32 %v525_v7, %v5135_v56  ;;  %v527_v10 = vpop.f32.mrb[15].mxu0  ;;  %1484 = vmatmul.mubr.bf16.gmra.mrb[72].mxu0 %v979_v50  ;;  %v867_v15 = vmax.f32 %v522_v1, 0.0  ;;  %v5227_v50 = vpack.c.bf16 %v857_v44, %v853_v32  ;;  %v4377_v7 = vld [vmem:[%s6535_s4 + $0x180] ss:$8 sps:$4 sm:$0xff]  }
 0x147   :  { %v528_v12 = vadd.f32 %v527_v10, %v5138_v57  ;;  %1633 = vmatpush1.bf16.msra.mxu0 %v4365_v60  ;;  %v868_v20 = vmax.f32 %v524_v6, 0.0  ;;  %v5232_v59 = vpack.c.bf16 %v858_v47, %v854_v40  ;;  %v704_v60 = vpop.f32.mrb[8].mxu1 }
 0x148   :  { %v871_v16 = vmax.f32 %v526_v9, 0.0  ;;  %1634 = vmatprep.subr.bf16.mxu0 %v4370_v3  ;;  %v705_v63 = vadd.f32 %v704_v60, %v5172_v36  ;;  %v706_v1 = vpop.f32.mrb[9].mxu1 }
 0x149   :  { %v872_v21 = vmax.f32 %v528_v12, 0.0  ;;  %v707_v3 = vadd.f32 %v706_v1, %v5177_v39  ;;  %v708_v4 = vpop.f32.mrb[10].mxu1 }
 0x14a   :  { %v983_v24 = vpack.c.bf16 %v871_v16, %v867_v15  ;;  %v861_v8 = vmax.f32 %v705_v63, 0.0  ;;  %v709_v9 = vadd.f32 %v708_v4, %v5172_v36  ;;  %v710_v10 = vpop.f32.mrb[11].mxu1 }
 0x14b   :  { %v984_v29 = vpack.c.bf16 %v872_v21, %v868_v20  ;;  %v531_v30 = vpop.f32.mrb[16].mxu0  ;;  %1635 = vmatpush1.bf16.msra.mxu0 %v4368_v13  ;;  %v4382_v13 = vld [vmem:[%s6535_s4 + $0x194] ss:$8 sps:$4 sm:$0xff]   ;;  %v862_v15 = vmax.f32 %v707_v3, 0.0  ;;  %v711_v16 = vadd.f32 %v710_v10, %v5177_v39  ;;  %v714_v33 = vpop.f32.mrb[12].mxu1 }
 0x14c   :  { %v532_v35 = vadd.f32 %v531_v30, %v5135_v56  ;;  %v533_v37 = vpop.f32.mrb[17].mxu0  ;;  %1636 = vmatprep.subr.bf16.mxu0 %v4373_v17  ;;  %v865_v20 = vmax.f32 %v709_v9, 0.0  ;;  %v4391_v9 = vld [vmem:[%s6535_s4 + $0x1c4] ss:$8 sps:$4 sm:$0xff]  }
 0x14d   :  { %v534_v42 = vadd.f32 %v533_v37, %v5138_v57  ;;  %v535_v43 = vpop.f32.mrb[18].mxu0  ;;  %1493 = vmatprep.mubr.bf16.mxu0 %v984_v29  ;;  %v866_v23 = vmax.f32 %v711_v16, 0.0  ;;  %v715_v37 = vadd.f32 %v714_v33, %v5172_v36  ;;  %v4394_v33 = vld [vmem:[%s6535_s4 + $0x1d4] ss:$8 sps:$4 sm:$0xff]  }
 0x14e   :  { %v536_v45 = vadd.f32 %v535_v43, %v5135_v56  ;;  %v537_v46 = vpop.f32.mrb[19].mxu0  ;;  %1494 = vmatmul.mubr.bf16.gmra.mrb[76].mxu0 %v983_v24  ;;  %v875_v51 = vmax.f32 %v532_v35, 0.0  ;;  %v5251_v28 = vpack.c.bf16 %v865_v20, %v861_v8 }
 0x14f   :  { %v538_v48 = vadd.f32 %v537_v46, %v5138_v57  ;;  %1637 = vmatpush1.bf16.msra.mxu0 %v4371_v31  ;;  %v876_v61 = vmax.f32 %v534_v42, 0.0  ;;  %v4385_v31 = vld [vmem:[%s6535_s4 + $0x1a4] ss:$8 sps:$4 sm:$0xff]   ;;  %v5256_v32 = vpack.c.bf16 %v866_v23, %v862_v15  ;;  %v869_v46 = vmax.f32 %v715_v37, 0.0  ;;  %v4389_v23 = vld [vmem:[%s6535_s4 + $0x1c0] ss:$8 sps:$4 sm:$0xff]  }
 0x150   :  { %v879_v54 = vmax.f32 %v536_v45, 0.0  ;;  %1638 = vmatprep.subr.bf16.mxu0 %v4376_v38  ;;  %v716_v38 = vpop.f32.mrb[13].mxu1  ;;  %v4383_v45 = vld [vmem:[%s6535_s4 + $0x1a0] ss:$8 sps:$4 sm:$0xff]  }
 0x151   :  { %v880_v62 = vmax.f32 %v538_v48, 0.0  ;;  %v717_v41 = vadd.f32 %v716_v38, %v5177_v39  ;;  %v718_v42 = vpop.f32.mrb[14].mxu1 }
 0x152   :  { %v987_v2 = vpack.c.bf16 %v879_v54, %v875_v51  ;;  %v719_v47 = vadd.f32 %v718_v42, %v5172_v36  ;;  %v720_v48 = vpop.f32.mrb[15].mxu1  ;;  %v4388_v54 = vld [vmem:[%s6535_s4 + $0x1b4] ss:$8 sps:$4 sm:$0xff]  }
 0x153   :  { %v988_v5 = vpack.c.bf16 %v880_v62, %v876_v61  ;;  %v541_v6 = vpop.f32.mrb[20].mxu0  ;;  %1639 = vmatpush1.bf16.msra.mxu0 %v4374_v49  ;;  %v721_v60 = vadd.f32 %v720_v48, %v5177_v39 }
 0x154   :  { %v542_v11 = vadd.f32 %v541_v6, %v5135_v56  ;;  %v543_v12 = vpop.f32.mrb[21].mxu0  ;;  %1640 = vmatprep.subr.bf16.mxu0 %v4379_v58  ;;  %v870_v58 = vmax.f32 %v717_v41, 0.0  ;;  %v873_v63 = vmax.f32 %v719_v47, 0.0 }
 0x155   :  { %v544_v17 = vadd.f32 %v543_v12, %v5138_v57  ;;  %v545_v19 = vpop.f32.mrb[22].mxu0  ;;  %1503 = vmatprep.mubr.bf16.mxu0 %v988_v5  ;;  %v874_v3 = vmax.f32 %v721_v60, 0.0  ;;  %v4386_v5 = vld [vmem:[%s6535_s4 + $0x1b0] ss:$8 sps:$4 sm:$0xff]  }
 0x156   :  { %v546_v21 = vadd.f32 %v545_v19, %v5135_v56  ;;  %v547_v22 = vpop.f32.mrb[23].mxu0  ;;  %1504 = vmatmul.mubr.bf16.gmra.mrb[80].mxu0 %v987_v2  ;;  %v883_v29 = vmax.f32 %v542_v11, 0.0  ;;  %v5275_v6 = vpack.c.bf16 %v873_v63, %v869_v46  ;;  %v724_v11 = vpop.f32.mrb[16].mxu1 }
 0x157   :  { %v548_v24 = vadd.f32 %v547_v22, %v5138_v57  ;;  %1641 = vmatpush1.bf16.msra.mxu0 %v4377_v7  ;;  %v884_v34 = vmax.f32 %v544_v17, 0.0  ;;  %v5280_v10 = vpack.c.bf16 %v874_v3, %v870_v58  ;;  %v725_v15 = vadd.f32 %v724_v11, %v5172_v36  ;;  %v726_v16 = vpop.f32.mrb[17].mxu1 }
 0x158   :  { %v887_v30 = vmax.f32 %v546_v21, 0.0  ;;  %1642 = vmatprep.subr.bf16.mxu0 %v4382_v13  ;;  %v727_v19 = vadd.f32 %v726_v16, %v5177_v39  ;;  %v728_v20 = vpop.f32.mrb[18].mxu1 }
 0x159   :  { %v888_v35 = vmax.f32 %v548_v24, 0.0  ;;  %v877_v24 = vmax.f32 %v725_v15, 0.0 }
 0x15a   :  { %v991_v40 = vpack.c.bf16 %v887_v30, %v883_v29  ;;  %v730_v29 = vpop.f32.mrb[19].mxu1 }
 0x15b   :  { %v992_v43 = vpack.c.bf16 %v888_v35, %v884_v34  ;;  %v551_v44 = vpop.f32.mrb[24].mxu0  ;;  %1643 = vmatpush1.bf16.msra.mxu0 %v4380_v26  ;;  %v729_v26 = vadd.f32 %v728_v20, %v5172_v36  ;;  %v878_v34 = vmax.f32 %v727_v19, 0.0  ;;  %v731_v35 = vadd.f32 %v730_v29, %v5177_v39 }
 0x15c   :  { %v552_v49 = vadd.f32 %v551_v44, %v5135_v56  ;;  %v553_v51 = vpop.f32.mrb[25].mxu0  ;;  %1644 = vmatprep.subr.bf16.mxu0 %v4385_v31 }
 0x15d   :  { %v554_v61 = vadd.f32 %v553_v51, %v5138_v57  ;;  %v555_v62 = vpop.f32.mrb[26].mxu0  ;;  %1513 = vmatprep.mubr.bf16.mxu0 %v992_v43  ;;  %v882_v43 = vmax.f32 %v731_v35, 0.0 }
 0x15e   :  { %v556_v1 = vadd.f32 %v555_v62, %v5135_v56  ;;  %v557_v2 = vpop.f32.mrb[27].mxu0  ;;  %1514 = vmatmul.mubr.bf16.gmra.mrb[84].mxu0 %v991_v40  ;;  %v891_v7 = vmax.f32 %v552_v49, 0.0  ;;  %v881_v40 = vmax.f32 %v729_v26, 0.0  ;;  %v4397_v49 = vld [vmem:[%s6535_s4 + $0x1e4] ss:$8 sps:$4 sm:$0xff]  }
 0x15f   :  { %v558_v4 = vadd.f32 %v557_v2, %v5138_v57  ;;  %1645 = vmatpush1.bf16.msra.mxu0 %v4383_v45  ;;  %v892_v12 = vmax.f32 %v554_v61, 0.0  ;;  %v4392_v45 = vld [vmem:[%s6535_s4 + $0x1d0] ss:$8 sps:$4 sm:$0xff]   ;;  %v5304_v51 = vpack.c.bf16 %v882_v43, %v878_v34 }
 0x160   :  { %v895_v8 = vmax.f32 %v556_v1, 0.0  ;;  %1646 = vmatprep.subr.bf16.mxu0 %v4388_v54  ;;  %v5299_v46 = vpack.c.bf16 %v881_v40, %v877_v24  ;;  %v734_v54 = vpop.f32.mrb[20].mxu1  ;;  %v4398_v26 = vld [vmem:[%s6535_s4 + $0x1f0] ss:$8 sps:$4 sm:$0xff]  }
 0x161   :  { %v896_v13 = vmax.f32 %v558_v4, 0.0  ;;  %v735_v61 = vadd.f32 %v734_v54, %v5172_v36  ;;  %v736_v62 = vpop.f32.mrb[21].mxu1 }
 0x162   :  { %v995_v17 = vpack.c.bf16 %v895_v8, %v891_v7  ;;  %v737_v1 = vadd.f32 %v736_v62, %v5177_v39  ;;  %v738_v2 = vpop.f32.mrb[22].mxu1 }
 0x163   :  { %v996_v21 = vpack.c.bf16 %v896_v13, %v892_v12  ;;  %v561_v22 = vpop.f32.mrb[28].mxu0  ;;  %1647 = vmatpush1.bf16.msra.mxu0 %v4386_v5  ;;  %v4395_v5 = vld [vmem:[%s6535_s4 + $0x1e0] ss:$8 sps:$4 sm:$0xff]   ;;  %v885_v7 = vmax.f32 %v735_v61, 0.0  ;;  %v739_v8 = vadd.f32 %v738_v2, %v5172_v36  ;;  %v4400_v13 = vld [vmem:[%s6535_s4 + $0x1f4] ss:$8 sps:$4 sm:$0xff]  }
 0x164   :  { %v562_v30 = vadd.f32 %v561_v22, %v5135_v56  ;;  %v563_v31 = vpop.f32.mrb[29].mxu0  ;;  %1648 = vmatprep.subr.bf16.mxu0 %v4391_v9  ;;  %v740_v9 = vpop.f32.mrb[23].mxu1  ;;  %v886_v15 = vmax.f32 %v737_v1, 0.0 }
 0x165   :  { %v564_v37 = vadd.f32 %v563_v31, %v5138_v57  ;;  %v565_v38 = vpop.f32.mrb[30].mxu0  ;;  %1523 = vmatprep.mubr.bf16.mxu0 %v996_v21  ;;  %v741_v16 = vadd.f32 %v740_v9, %v5177_v39  ;;  %v889_v20 = vmax.f32 %v739_v8, 0.0  ;;  %v744_v34 = vpop.f32.mrb[24].mxu1 }
 0x166   :  { %v566_v41 = vadd.f32 %v565_v38, %v5135_v56  ;;  %v567_v42 = vpop.f32.mrb[31].mxu0  ;;  %1524 = vmatmul.mubr.bf16.gmra.mrb[88].mxu0 %v995_v17  ;;  %v899_v47 = vmax.f32 %v562_v30, 0.0  ;;  %v745_v38 = vadd.f32 %v744_v34, %v5172_v36  ;;  %v746_v40 = vpop.f32.mrb[25].mxu1 }
 0x167   :  { %v568_v44 = vadd.f32 %v567_v42, %v5138_v57  ;;  %1649 = vmatpush1.bf16.msra.mxu0 %v4389_v23  ;;  %v900_v58 = vmax.f32 %v564_v37, 0.0  ;;  %v890_v23 = vmax.f32 %v741_v16, 0.0  ;;  %v5323_v29 = vpack.c.bf16 %v889_v20, %v885_v7  ;;  %v748_v43 = vpop.f32.mrb[26].mxu1 }
 0x168   :  { %v903_v48 = vmax.f32 %v566_v41, 0.0  ;;  %1650 = vmatprep.subr.bf16.mxu0 %v4394_v33  ;;  %v747_v42 = vadd.f32 %v746_v40, %v5177_v39 }
 0x169   :  { %v904_v60 = vmax.f32 %v568_v44, 0.0  ;;  %v5325_v33 = vpack.c.bf16 %v890_v23, %v886_v15 }
 0x16a   :  { %v999_v63 = vpack.c.bf16 %v903_v48, %v899_v47  ;;  %v893_v47 = vmax.f32 %v745_v38, 0.0  ;;  %v749_v48 = vadd.f32 %v748_v43, %v5172_v36 }
 0x16b   :  { %v1000_v3 = vpack.c.bf16 %v904_v60, %v900_v58  ;;  %v571_v4 = vpop.f32.mrb[32].mxu0  ;;  %1651 = vmatpush1.bf16.msra.mxu0 %v4392_v45  ;;  %v894_v60 = vmax.f32 %v747_v42, 0.0 }
 0x16c   :  { %v572_v11 = vadd.f32 %v571_v4, %v5135_v56  ;;  %v573_v12 = vpop.f32.mrb[33].mxu0  ;;  %1652 = vmatprep.subr.bf16.mxu0 %v4397_v49  ;;  %v750_v49 = vpop.f32.mrb[27].mxu1  ;;  %v897_v1 = vmax.f32 %v749_v48, 0.0 }
 0x16d   :  { %v574_v17 = vadd.f32 %v573_v12, %v5138_v57  ;;  %v575_v19 = vpop.f32.mrb[34].mxu0  ;;  %1533 = vmatprep.mubr.bf16.mxu0 %v1000_v3  ;;  %v751_v61 = vadd.f32 %v750_v49, %v5177_v39  ;;  %v754_v12 = vpop.f32.mrb[28].mxu1 }
 0x16e   :  { %v576_v21 = vadd.f32 %v575_v19, %v5135_v56  ;;  %v577_v22 = vpop.f32.mrb[35].mxu0  ;;  %1534 = vmatmul.mubr.bf16.gmra.mrb[92].mxu0 %v999_v63  ;;  %v907_v30 = vmax.f32 %v572_v11, 0.0  ;;  %v5335_v7 = vpack.c.bf16 %v897_v1, %v893_v47  ;;  %v755_v16 = vadd.f32 %v754_v12, %v5172_v36 }
 0x16f   :  { %v578_v24 = vadd.f32 %v577_v22, %v5138_v57  ;;  %1653 = vmatpush1.bf16.msra.mxu0 %v4395_v5  ;;  %v908_v35 = vmax.f32 %v574_v17, 0.0  ;;  %v898_v4 = vmax.f32 %v751_v61, 0.0  ;;  %v756_v17 = vpop.f32.mrb[29].mxu1 }
 0x170   :  { %v911_v31 = vmax.f32 %v576_v21, 0.0  ;;  %1654 = vmatprep.subr.bf16.mxu0 %v4400_v13  ;;  %v757_v20 = vadd.f32 %v756_v17, %v5177_v39  ;;  %v758_v21 = vpop.f32.mrb[30].mxu1 }
 0x171   :  { %v912_v37 = vmax.f32 %v578_v24, 0.0  ;;  %v5337_v11 = vpack.c.bf16 %v898_v4, %v894_v60  ;;  %v901_v24 = vmax.f32 %v755_v16, 0.0 }
 0x172   :  { %v1003_v41 = vpack.c.bf16 %v911_v31, %v907_v30  ;;  %v760_v30 = vpop.f32.mrb[31].mxu1 }
 0x173   :  { %v1004_v44 = vpack.c.bf16 %v912_v37, %v908_v35  ;;  %v581_v45 = vpop.f32.mrb[36].mxu0  ;;  %1655 = vmatpush1.bf16.msra.mxu0 %v4398_v26  ;;  %v759_v26 = vadd.f32 %v758_v21, %v5172_v36  ;;  %v902_v35 = vmax.f32 %v757_v20, 0.0  ;;  %v761_v37 = vadd.f32 %v760_v30, %v5177_v39 }
 0x174   :  { %v582_v54 = vadd.f32 %v581_v45, %v5135_v56  ;;  %v583_v58 = vpop.f32.mrb[37].mxu0 }
 0x175   :  { %v584_v62 = vadd.f32 %v583_v58, %v5138_v57  ;;  %v585_v63 = vpop.f32.mrb[38].mxu0  ;;  %1543 = vmatprep.mubr.bf16.mxu0 %v1004_v44  ;;  %v906_v44 = vmax.f32 %v761_v37, 0.0  ;;  %v764_v58 = vpop.f32.mrb[32].mxu1 }
 0x176   :  { %v586_v2 = vadd.f32 %v585_v63, %v5135_v56  ;;  %v587_v3 = vpop.f32.mrb[39].mxu0  ;;  %1544 = vmatmul.mubr.bf16.gmra.mrb[96].mxu0 %v1003_v41  ;;  %v915_v8 = vmax.f32 %v582_v54, 0.0  ;;  %v905_v41 = vmax.f32 %v759_v26, 0.0  ;;  %v766_v63 = vpop.f32.mrb[33].mxu1 }
 0x177   :  { %v588_v5 = vadd.f32 %v587_v3, %v5138_v57  ;;  %v916_v13 = vmax.f32 %v584_v62, 0.0  ;;  %v5349_v54 = vpack.c.bf16 %v906_v44, %v902_v35  ;;  %v765_v62 = vadd.f32 %v764_v58, %v5172_v36  ;;  %v768_v3 = vpop.f32.mrb[34].mxu1 }
 0x178   :  { %v919_v9 = vmax.f32 %v586_v2, 0.0  ;;  %v5347_v47 = vpack.c.bf16 %v905_v41, %v901_v24  ;;  %v767_v2 = vadd.f32 %v766_v63, %v5177_v39  ;;  %v770_v12 = vpop.f32.mrb[35].mxu1 }
 0x179   :  { %v920_v15 = vmax.f32 %v588_v5, 0.0  ;;  %v771_v17 = vadd.f32 %v770_v12, %v5177_v39  ;;  %v774_v37 = vpop.f32.mrb[36].mxu1 }
 0x17a   :  { %v1007_v19 = vpack.c.bf16 %v919_v9, %v915_v8  ;;  %v909_v8 = vmax.f32 %v765_v62, 0.0  ;;  %v769_v9 = vadd.f32 %v768_v3, %v5172_v36  ;;  %v910_v16 = vmax.f32 %v767_v2, 0.0 }
 0x17b   :  { %v1008_v22 = vpack.c.bf16 %v920_v15, %v916_v13  ;;  %v591_v23 = vpop.f32.mrb[40].mxu0  ;;  %v914_v24 = vmax.f32 %v771_v17, 0.0  ;;  %v775_v41 = vadd.f32 %v774_v37, %v5172_v36 }
 0x17c   :  { %v592_v31 = vadd.f32 %v591_v23, %v5135_v56  ;;  %v593_v34 = vpop.f32.mrb[41].mxu0  ;;  %v913_v21 = vmax.f32 %v769_v9, 0.0 }
 0x17d   :  { %v594_v38 = vadd.f32 %v593_v34, %v5138_v57  ;;  %v595_v40 = vpop.f32.mrb[42].mxu0  ;;  %1553 = vmatprep.mubr.bf16.mxu0 %v1008_v22  ;;  %v5361_v35 = vpack.c.bf16 %v914_v24, %v910_v16  ;;  %v917_v58 = vmax.f32 %v775_v41, 0.0 }
 0x17e   :  { %v596_v42 = vadd.f32 %v595_v40, %v5135_v56  ;;  %v597_v43 = vpop.f32.mrb[43].mxu0  ;;  %1554 = vmatmul.mubr.bf16.gmra.mrb[100].mxu0 %v1007_v19  ;;  %v923_v48 = vmax.f32 %v592_v31, 0.0  ;;  %v5359_v30 = vpack.c.bf16 %v913_v21, %v909_v8 }
 0x17f   :  { %v598_v45 = vadd.f32 %v597_v43, %v5138_v57  ;;  %v924_v60 = vmax.f32 %v594_v38, 0.0 }
 0x180   :  { %v927_v49 = vmax.f32 %v596_v42, 0.0  ;;  %v776_v42 = vpop.f32.mrb[37].mxu1 }
 0x181   :  { %v928_v61 = vmax.f32 %v598_v45, 0.0  ;;  %v777_v44 = vadd.f32 %v776_v42, %v5177_v39  ;;  %v778_v45 = vpop.f32.mrb[38].mxu1 }
 0x182   :  { %v1011_v1 = vpack.c.bf16 %v927_v49, %v923_v48 }
 0x183   :  { %v1012_v4 = vpack.c.bf16 %v928_v61, %v924_v60  ;;  %v601_v5 = vpop.f32.mrb[44].mxu0  ;;  %v779_v60 = vadd.f32 %v778_v45, %v5172_v36  ;;  %v780_v61 = vpop.f32.mrb[39].mxu1 }
 0x184   :  { %v602_v13 = vadd.f32 %v601_v5, %v5135_v56  ;;  %v603_v15 = vpop.f32.mrb[45].mxu0  ;;  %v781_v2 = vadd.f32 %v780_v61, %v5177_v39 }
 0x185   :  { %v604_v19 = vadd.f32 %v603_v15, %v5138_v57  ;;  %v605_v20 = vpop.f32.mrb[46].mxu0  ;;  %1563 = vmatprep.mubr.bf16.mxu0 %v1012_v4  ;;  %v921_v5 = vmax.f32 %v779_v60, 0.0 }
 0x186   :  { %v606_v22 = vadd.f32 %v605_v20, %v5135_v56  ;;  %v607_v23 = vpop.f32.mrb[47].mxu0  ;;  %1564 = vmatmul.mubr.bf16.gmra.mrb[104].mxu0 %v1011_v1  ;;  %v931_v31 = vmax.f32 %v602_v13, 0.0  ;;  %v918_v1 = vmax.f32 %v777_v44, 0.0  ;;  %v922_v12 = vmax.f32 %v781_v2, 0.0  ;;  %v784_v20 = vpop.f32.mrb[40].mxu1 }
 0x187   :  { %v608_v26 = vadd.f32 %v607_v23, %v5138_v57  ;;  %v932_v38 = vmax.f32 %v604_v19, 0.0  ;;  %v5371_v15 = vpack.c.bf16 %v921_v5, %v917_v58  ;;  %v785_v23 = vadd.f32 %v784_v20, %v5172_v36  ;;  %v786_v24 = vpop.f32.mrb[41].mxu1 }
 0x188   :  { %v935_v34 = vmax.f32 %v606_v22, 0.0  ;;  %v5373_v19 = vpack.c.bf16 %v922_v12, %v918_v1 }
 0x189   :  { %v936_v40 = vmax.f32 %v608_v26, 0.0 }
 0x18a   :  { %v1015_v43 = vpack.c.bf16 %v935_v34, %v931_v31  ;;  %v787_v31 = vadd.f32 %v786_v24, %v5177_v39  ;;  %v788_v34 = vpop.f32.mrb[42].mxu1 }
 0x18b   :  { %v1016_v48 = vpack.c.bf16 %v936_v40, %v932_v38  ;;  %v611_v49 = vpop.f32.mrb[48].mxu0  ;;  %v925_v40 = vmax.f32 %v785_v23, 0.0  ;;  %v789_v41 = vadd.f32 %v788_v34, %v5172_v36  ;;  %v790_v42 = vpop.f32.mrb[43].mxu1 }
 0x18c   :  { %v612_v62 = vadd.f32 %v611_v49, %v5135_v56  ;;  %v613_v63 = vpop.f32.mrb[49].mxu0  ;;  %v926_v45 = vmax.f32 %v787_v31, 0.0 }
 0x18d   :  { %v614_v3 = vadd.f32 %v613_v63, %v5138_v57  ;;  %v615_v4 = vpop.f32.mrb[50].mxu0  ;;  %1573 = vmatprep.mubr.bf16.mxu0 %v1016_v48  ;;  %v791_v48 = vadd.f32 %v790_v42, %v5177_v39  ;;  %v929_v60 = vmax.f32 %v789_v41, 0.0 }
 0x18e   :  { %v616_v8 = vadd.f32 %v615_v4, %v5135_v56  ;;  %v617_v9 = vpop.f32.mrb[51].mxu0  ;;  %1574 = vmatmul.mubr.bf16.gmra.mrb[108].mxu0 %v1015_v43  ;;  %v939_v16 = vmax.f32 %v612_v62, 0.0 }
 0x18f   :  { %v618_v13 = vadd.f32 %v617_v9, %v5138_v57  ;;  %v940_v21 = vmax.f32 %v614_v3, 0.0  ;;  %v930_v63 = vmax.f32 %v791_v48, 0.0  ;;  %v5383_v2 = vpack.c.bf16 %v929_v60, %v925_v40  ;;  %v4401_v60 = vld [vmem:[#allocation4] ss:$16 sps:$4 sm:$0xff]  }
 0x190   :  { %v943_v17 = vmax.f32 %v616_v8, 0.0  ;;  %v794_v8 = vpop.f32.mrb[44].mxu1 }
 0x191   :  { %v944_v22 = vmax.f32 %v618_v13, 0.0  ;;  %v5385_v5 = vpack.c.bf16 %v930_v63, %v926_v45  ;;  %v795_v13 = vadd.f32 %v794_v8, %v5172_v36 }
 0x192   :  { %v1019_v26 = vpack.c.bf16 %v943_v17, %v939_v16  ;;  %v796_v16 = vpop.f32.mrb[45].mxu1 }
 0x193   :  { %v1020_v37 = vpack.c.bf16 %v944_v22, %v940_v21  ;;  %v621_v38 = vpop.f32.mrb[52].mxu0  ;;  %v797_v20 = vadd.f32 %v796_v16, %v5177_v39  ;;  %v798_v21 = vpop.f32.mrb[46].mxu1  ;;  %v933_v24 = vmax.f32 %v795_v13, 0.0 }
 0x194   :  { %v622_v43 = vadd.f32 %v621_v38, %v5135_v56  ;;  %v623_v44 = vpop.f32.mrb[53].mxu0  ;;  %v800_v31 = vpop.f32.mrb[47].mxu1 }
 0x195   :  { %v624_v49 = vadd.f32 %v623_v44, %v5138_v57  ;;  %v625_v58 = vpop.f32.mrb[54].mxu0  ;;  %1583 = vmatprep.mubr.bf16.mxu0 %v1020_v37  ;;  %v934_v38 = vmax.f32 %v797_v20, 0.0  ;;  %v801_v40 = vadd.f32 %v800_v31, %v5177_v39 }
 0x196   :  { %v626_v61 = vadd.f32 %v625_v58, %v5135_v56  ;;  %v627_v62 = vpop.f32.mrb[55].mxu0  ;;  %1584 = vmatmul.mubr.bf16.gmra.mrb[112].mxu0 %v1019_v26  ;;  %v947_v3 = vmax.f32 %v622_v43, 0.0  ;;  %v799_v26 = vadd.f32 %v798_v21, %v5172_v36 }
 0x197   :  { %v628_v1 = vadd.f32 %v627_v62, %v5138_v57  ;;  %v948_v9 = vmax.f32 %v624_v49, 0.0  ;;  %v938_v48 = vmax.f32 %v801_v40, 0.0 }
 0x198   :  { %v951_v4 = vmax.f32 %v626_v61, 0.0  ;;  %v937_v43 = vmax.f32 %v799_v26, 0.0  ;;  %v4403_v61 = vld [vmem:[#allocation4 + $0x4] ss:$16 sps:$4 sm:$0xff]  }
 0x199   :  { %v952_v12 = vmax.f32 %v628_v1, 0.0  ;;  %v5397_v1 = vpack.c.bf16 %v938_v48, %v934_v38  ;;  %2207 = vmatprep.subr.bf16.mxu1 %v4403_v61 }
 0x19a   :  { %v1023_v17 = vpack.c.bf16 %v951_v4, %v947_v3  ;;  %v5395_v58 = vpack.c.bf16 %v937_v43, %v933_v24  ;;  %v804_v3 = vpop.f32.mrb[48].mxu1  ;;  %2208 = vmatpush1.bf16.msra.mxu1 %v4401_v60 }
 0x19b   :  { %v1024_v22 = vpack.c.bf16 %v952_v12, %v948_v9  ;;  %v631_v23 = vpop.f32.mrb[56].mxu0  ;;  %v805_v9 = vadd.f32 %v804_v3, %v5172_v36  ;;  %v806_v12 = vpop.f32.mrb[49].mxu1 }
 0x19c   :  { %v632_v34 = vadd.f32 %v631_v23, %v5135_v56  ;;  %v633_v37 = vpop.f32.mrb[57].mxu0  ;;  %v807_v16 = vadd.f32 %v806_v12, %v5177_v39 }
 0x19d   :  { %v634_v41 = vadd.f32 %v633_v37, %v5138_v57  ;;  %v635_v42 = vpop.f32.mrb[58].mxu0  ;;  %1593 = vmatprep.mubr.bf16.mxu0 %v1024_v22  ;;  %v941_v22 = vmax.f32 %v805_v9, 0.0 }
 0x19e   :  { %v636_v44 = vadd.f32 %v635_v42, %v5135_v56  ;;  %v637_v45 = vpop.f32.mrb[59].mxu0  ;;  %1594 = vmatmul.mubr.bf16.gmra.mrb[116].mxu0 %v1023_v17  ;;  %v955_v62 = vmax.f32 %v632_v34, 0.0  ;;  %v808_v17 = vpop.f32.mrb[50].mxu1  ;;  %v942_v34 = vmax.f32 %v807_v16, 0.0 }
 0x19f   :  { %v638_v49 = vadd.f32 %v637_v45, %v5138_v57  ;;  %v956_v4 = vmax.f32 %v634_v41, 0.0  ;;  %v809_v23 = vadd.f32 %v808_v17, %v5172_v36  ;;  %v810_v24 = vpop.f32.mrb[51].mxu1 }
 0x1a0   :  { %v959_v63 = vmax.f32 %v636_v44, 0.0  ;;  %v811_v37 = vadd.f32 %v810_v24, %v5177_v39  ;;  %v4404_v24 = vld [vmem:[#allocation4 + $0x20] ss:$16 sps:$4 sm:$0xff]  }
 0x1a1   :  { %v960_v8 = vmax.f32 %v638_v49, 0.0  ;;  %v945_v41 = vmax.f32 %v809_v23, 0.0 }
 0x1a2   :  { %v1027_v13 = vpack.c.bf16 %v959_v63, %v955_v62  ;;  %v946_v44 = vmax.f32 %v811_v37, 0.0  ;;  %v814_v62 = vpop.f32.mrb[52].mxu1 }
 0x1a3   :  { %v1028_v20 = vpack.c.bf16 %v960_v8, %v956_v4  ;;  %v641_v21 = vpop.f32.mrb[60].mxu0  ;;  %v5407_v48 = vpack.c.bf16 %v945_v41, %v941_v22  ;;  %v815_v4 = vadd.f32 %v814_v62, %v5172_v36  ;;  %v816_v8 = vpop.f32.mrb[53].mxu1 }
 0x1a4   :  { %v642_v26 = vadd.f32 %v641_v21, %v5135_v56  ;;  %v643_v31 = vpop.f32.mrb[61].mxu0  ;;  %v5409_v61 = vpack.c.bf16 %v946_v44, %v942_v34  ;;  %v818_v12 = vpop.f32.mrb[54].mxu1  ;;  %v4409_v34 = vld [vmem:[#allocation4 + $0x44] ss:$16 sps:$4 sm:$0xff]  }
 0x1a5   :  { %v644_v38 = vadd.f32 %v643_v31, %v5138_v57  ;;  %v645_v40 = vpop.f32.mrb[62].mxu0  ;;  %1603 = vmatprep.mubr.bf16.mxu0 %v1028_v20  ;;  %v949_v16 = vmax.f32 %v815_v4, 0.0  ;;  %v820_v17 = vpop.f32.mrb[55].mxu1  ;;  %v4410_v4 = vld [vmem:[#allocation4 + $0x60] ss:$16 sps:$4 sm:$0xff]  }
 0x1a6   :  { %v646_v42 = vadd.f32 %v645_v40, %v5135_v56  ;;  %v647_v43 = vpop.f32.mrb[63].mxu0  ;;  %1604 = vmatmul.mubr.bf16.gmra.mrb[120].mxu0 %v1027_v13  ;;  %v963_v49 = vmax.f32 %v642_v26, 0.0  ;;  %v817_v56 = vadd.f32 %v816_v8, %v5177_v39  ;;  %v821_v21 = vadd.f32 %v820_v17, %v5177_v39  ;;  %v4406_v26 = vld [vmem:[#allocation4 + $0x24] ss:$16 sps:$4 sm:$0xff]   ;;  %v4413_v17 = vld [vmem:[#allocation4 + $0x80] ss:$16 sps:$4 sm:$0xff]  }
 0x1a7   :  { %v648_v45 = vadd.f32 %v647_v43, %v5138_v57  ;;  %v964_v63 = vmax.f32 %v644_v38, 0.0  ;;  %v819_v57 = vadd.f32 %v818_v12, %v5172_v36  ;;  %v824_v38 = vpop.f32.mrb[56].mxu1  ;;  %2209 = vmatprep.subr.bf16.mxu1 %v4406_v26 }
 0x1a8   :  { %v967_v60 = vmax.f32 %v646_v42, 0.0  ;;  %v950_v20 = vmax.f32 %v817_v56, 0.0  ;;  %v954_v23 = vmax.f32 %v821_v21, 0.0  ;;  %v825_v40 = vadd.f32 %v824_v38, %v5172_v36  ;;  %v826_v41 = vpop.f32.mrb[57].mxu1  ;;  %2210 = vmatpush1.bf16.msra.mxu1 %v4404_v24  ;;  %v4407_v42 = vld [vmem:[#allocation4 + $0x40] ss:$16 sps:$4 sm:$0xff]  }
 0x1a9   :  { %v968_v3 = vmax.f32 %v648_v45, 0.0  ;;  %v953_v22 = vmax.f32 %v819_v57, 0.0  ;;  %v827_v43 = vadd.f32 %v826_v41, %v5177_v39  ;;  %v828_v44 = vpop.f32.mrb[58].mxu1  ;;  %2211 = vmatprep.subr.bf16.mxu1 %v4409_v34  ;;  %v4412_v45 = vld [vmem:[#allocation4 + $0x64] ss:$16 sps:$4 sm:$0xff]  }
 0x1aa   :  { %v1031_v9 = vpack.c.bf16 %v967_v60, %v963_v49  ;;  %v5418_v37 = vpack.c.bf16 %v954_v23, %v950_v20  ;;  %v957_v49 = vmax.f32 %v825_v40, 0.0  ;;  %v830_v60 = vpop.f32.mrb[59].mxu1  ;;  %v4416_v38 = vld [vmem:[#allocation4 + $0xa0] ss:$16 sps:$4 sm:$0xff]   ;;  %v4421_v41 = vld [vmem:[#allocation4 + $0xc4] ss:$16 sps:$4 sm:$0xff]  }
 0x1ab   :  { %v1032_v13 = vpack.c.bf16 %v968_v3, %v964_v63  ;;  %v5416_v31 = vpack.c.bf16 %v953_v22, %v949_v16  ;;  %v958_v62 = vmax.f32 %v827_v43, 0.0  ;;  %v831_v63 = vadd.f32 %v830_v60, %v5177_v39  ;;  %v4418_v22 = vld [vmem:[#allocation4 + $0xa4] ss:$16 sps:$4 sm:$0xff]   ;;  %v179_v60 = vld [vmem:[%s6532_s1 + $0x8] sm:$0xff] }
 0x1ac   :  { %2212 = vmatpush1.bf16.msra.mxu1 %v4407_v42 }
 0x1ad   :  { %1613 = vmatprep.mubr.bf16.mxu0 %v1032_v13  ;;  %v962_v8 = vmax.f32 %v831_v63, 0.0  ;;  %2213 = vmatprep.subr.bf16.mxu1 %v4412_v45  ;;  %v834_v13 = vpop.f32.mrb[60].mxu1  ;;  %v178_v45 = vld [vmem:[%s6532_s1] sm:$0xff] }
 0x1ae   :  { %1614 = vmatmul.mubr.bf16.gmra.mrb[124].mxu0 %v1031_v9  ;;  %v4415_v9 = vld [vmem:[#allocation4 + $0x84] ss:$16 sps:$4 sm:$0xff]   ;;  %v835_v16 = vadd.f32 %v834_v13, %v5172_v36  ;;  %v836_v57 = vpop.f32.mrb[61].mxu1 }
 0x1af   :  { %1656 = vmatprep.mubr.bf16.mxu0 %v5208_v18  ;;  %v829_v18 = vadd.f32 %v828_v44, %v5172_v36  ;;  %v1030_v12 = vpack.c.bf16 %v962_v8, %v958_v62  ;;  %v837_v20 = vadd.f32 %v836_v57, %v5177_v39  ;;  %v838_v21 = vpop.f32.mrb[62].mxu1  ;;  %v4419_v44 = vld [vmem:[#allocation4 + $0xc0] ss:$16 sps:$4 sm:$0xff]   ;;  %v211_v62 = vsel %vm210_vm1, %v178_v45, 0.0 }
 0x1b0   :  { %2214 = vmatpush1.bf16.msra.mxu1 %v4410_v4  ;;  %v965_v23 = vmax.f32 %v835_v16, 0.0  ;;  %v840_v24 = vpop.f32.mrb[63].mxu1 }
 0x1b1   :  { %v961_v3 = vmax.f32 %v829_v18, 0.0  ;;  %2215 = vmatprep.subr.bf16.mxu1 %v4415_v9  ;;  %v966_v26 = vmax.f32 %v837_v20, 0.0 }
 0x1b3   :  { %v1029_v56 = vpack.c.bf16 %v961_v3, %v957_v49 }
 0x1b4   :  { %2216 = vmatpush1.bf16.msra.mxu1 %v4413_v17 }
 0x1b5   :  { %2217 = vmatprep.subr.bf16.mxu1 %v4418_v22 }
 0x1b6   :  { %1657 = vmatmul.mubr.bf16.vlgmr.msra.gmra.mrb[64].mxu0 %v5203_v14  ;;  %v839_v14 = vadd.f32 %v838_v21, %v5172_v36  ;;  %v4422_v36 = vld [vmem:[#allocation4 + $0xe0] ss:$16 sps:$4 sm:$0xff]  }
 0x1b7   :  { %1666 = vmatprep.mubr.bf16.mxu0 %v5232_v59  ;;  %v841_v59 = vadd.f32 %v840_v24, %v5177_v39  ;;  %v4424_v39 = vld [vmem:[#allocation4 + $0xe4] ss:$16 sps:$4 sm:$0xff]  }
 0x1b8   :  { %v969_v34 = vmax.f32 %v839_v14, 0.0  ;;  %2218 = vmatpush1.bf16.msra.mxu1 %v4416_v38  ;;  %v180_v24 = vld [vmem:[%s6532_s1 + $0x10] sm:$0xff]  ;;  %v181_v38 = vld [vmem:[%s6532_s1 + $0x18] sm:$0xff] }
 0x1b9   :  { %v970_v40 = vmax.f32 %v841_v59, 0.0  ;;  %2219 = vmatprep.subr.bf16.mxu1 %v4421_v41 }
 0x1ba   :  { %v1033_v42 = vpack.c.bf16 %v969_v34, %v965_v23 }
 0x1bb   :  { %v1034_v43 = vpack.c.bf16 %v970_v40, %v966_v26 }
 0x1bc   :  { %2220 = vmatpush1.bf16.msra.mxu1 %v4419_v44 }
 0x1bd   :  { %2221 = vmatprep.subr.bf16.mxu1 %v4424_v39 }
 0x1be   :  { %1667 = vmatmul.mubr.bf16.gmra.mrb[68].mxu0 %v5227_v50  ;;  %v4427_v50 = vld [vmem:[#allocation4 + $0xc] ss:$16 sps:$4 sm:$0xff]  }
 0x1bf   :  { %1676 = vmatprep.mubr.bf16.mxu0 %v5256_v32 }
 0x1c0   :  { %2222 = vmatpush1.bf16.msra.mxu1 %v4422_v36 }
 0x1c1   :  { %2400 = vmatprep.subr.bf16.mxu1 %v4427_v50  ;;  %v4430_v50 = vld [vmem:[#allocation4 + $0x2c] ss:$16 sps:$4 sm:$0xff]  }
 0x1c6   :  { %1677 = vmatmul.mubr.bf16.gmra.mrb[72].mxu0 %v5251_v28  ;;  %v1099_v28 = vld [vmem:[%s6536_s5] sm:$0x3] }
 0x1c7   :  { %1686 = vmatprep.mubr.bf16.mxu0 %v5280_v10  ;;  %v5459_v32 = vrot.slane %v1099_v28, %v5126_v53 }
 0x1ce   :  { %1687 = vmatmul.mubr.bf16.gmra.mrb[76].mxu0 %v5275_v6  ;;  %v5462_v6 = vrot.slane %v1099_v28, %v5132_v55 }
 0x1cf   :  { %1696 = vmatprep.mubr.bf16.mxu0 %v5304_v51 }
 0x1d6   :  { %1697 = vmatmul.mubr.bf16.gmra.mrb[80].mxu0 %v5299_v46 }
 0x1d7   :  { %1706 = vmatprep.mubr.bf16.mxu0 %v5325_v33 }
 0x1de   :  { %1707 = vmatmul.mubr.bf16.gmra.mrb[84].mxu0 %v5323_v29 }
 0x1df   :  { %1716 = vmatprep.mubr.bf16.mxu0 %v5337_v11 }
 0x1e6   :  { %1717 = vmatmul.mubr.bf16.gmra.mrb[88].mxu0 %v5335_v7 }
 0x1e7   :  { %1726 = vmatprep.mubr.bf16.mxu0 %v5349_v54 }
 0x1ee   :  { %1727 = vmatmul.mubr.bf16.gmra.mrb[92].mxu0 %v5347_v47 }
 0x1ef   :  { %1736 = vmatprep.mubr.bf16.mxu0 %v5361_v35 }
 0x1f6   :  { %1737 = vmatmul.mubr.bf16.gmra.mrb[96].mxu0 %v5359_v30 }
 0x1f7   :  { %1746 = vmatprep.mubr.bf16.mxu0 %v5373_v19 }
 0x1fe   :  { %1747 = vmatmul.mubr.bf16.gmra.mrb[100].mxu0 %v5371_v15 }
 0x1ff   :  { %1756 = vmatprep.mubr.bf16.mxu0 %v5385_v5 }
 0x206   :  { %1757 = vmatmul.mubr.bf16.gmra.mrb[104].mxu0 %v5383_v2 }
 0x207   :  { %1766 = vmatprep.mubr.bf16.mxu0 %v5397_v1 }
 0x20e   :  { %1767 = vmatmul.mubr.bf16.gmra.mrb[108].mxu0 %v5395_v58 }
 0x20f   :  { %1776 = vmatprep.mubr.bf16.mxu0 %v5409_v61 }
 0x216   :  { %1777 = vmatmul.mubr.bf16.gmra.mrb[112].mxu0 %v5407_v48 }
 0x217   :  { %1786 = vmatprep.mubr.bf16.mxu0 %v5418_v37 }
 0x21e   :  { %1787 = vmatmul.mubr.bf16.gmra.mrb[116].mxu0 %v5416_v31 }
 0x21f   :  { %1796 = vmatprep.mubr.bf16.mxu0 %v1030_v12 }
 0x226   :  { %1797 = vmatmul.mubr.bf16.gmra.mrb[120].mxu0 %v1029_v56  ;;  %v212_v56 = vsel %vm210_vm1, %v179_v60, 0.0 }
 0x227   :  { %1806 = vmatprep.mubr.bf16.mxu0 %v1034_v43  ;;  %v213_v43 = vsel %vm210_vm1, %v180_v24, 0.0  ;;  %v4439_v24 = vld [vmem:[#allocation4 + $0x8c] ss:$16 sps:$4 sm:$0xff]  }
 0x22e   :  { %1807 = vmatmul.mubr.bf16.gmra.mrb[124].mxu0 %v1033_v42  ;;  %v4425_v42 = vld [vmem:[#allocation4 + $0x8] ss:$16 sps:$4 sm:$0xff]  }
 0x289   :  { %v1658_v10 = vpop.f32.mrb[64].mxu0 }
 0x28a   :  { %v4121_v46 = vadd.f32 %v1658_v10, %v5459_v32  ;;  %v1660_v51 = vpop.f32.mrb[65].mxu0 }
 0x28b   :  { %v4122_v29 = vadd.f32 %v1660_v51, %v5462_v6  ;;  %v1662_v33 = vpop.f32.mrb[66].mxu0  ;;  %v214_v51 = vsel %vm210_vm1, %v181_v38, 0.0  ;;  %v185_v38 = vld [vmem:[%s6532_s1 + $0x38] sm:$0xff] }
 0x28c   :  { %3594 = vst.msk [vmem:[%s6542_s11] sm:$0xff] %vm210_vm1, %v4121_v46  ;;  %v4123_v7 = vadd.f32 %v1662_v33, %v5459_v32  ;;  %v1664_v11 = vpop.f32.mrb[67].mxu0 }
 0x28d   :  { %v1817_v47 = vmul.f32 0.5, %v4122_v29  ;;  %3626 = vst.msk [vmem:[%s6543_s12] sm:$0xff] %vm210_vm1, %v4122_v29  ;;  %v4124_v54 = vadd.f32 %v1664_v11, %v5462_v6 }
 0x28e   :  { %3595 = vst.msk [vmem:[%s6542_s11 + $0x8] sm:$0xff] %vm210_vm1, %v4123_v7 }
 0x28f   :  { %v1849_v30 = vmul.f32 1.442695, %v1817_v47  ;;  %v1818_v35 = vmul.f32 0.5, %v4124_v54  ;;  %3627 = vst.msk [vmem:[%s6543_s12 + $0x8] sm:$0xff] %vm210_vm1, %v4124_v54 }
 0x291   :  { %4481 = vpow2.f32 %v1849_v30  ;;  %v1851_v15 = vmul.f32 1.442695, %v1818_v35  ;;  %v1668_v19 = vpop.f32.mrb[68].mxu0  ;;  %v4428_v30 = vld [vmem:[#allocation4 + $0x28] ss:$16 sps:$4 sm:$0xff]  }
 0x292   :  { %v5485_v2 = vadd.f32 %v1668_v19, %v5459_v32  ;;  %v1670_v5 = vpop.f32.mrb[69].mxu0  ;;  %v182_v19 = vld [vmem:[%s6532_s1 + $0x20] sm:$0xff] }
 0x293   :  { %4483 = vpow2.f32 %v1851_v15  ;;  %v4126_v58 = vadd.f32 %v1670_v5, %v5462_v6  ;;  %v1672_v1 = vpop.f32.mrb[70].mxu0  ;;  %v4433_v5 = vld [vmem:[#allocation4 + $0x4c] ss:$16 sps:$4 sm:$0xff]   ;;  %v215_v45 = vsel %vm210_vm1, %v182_v19, 0.0 }
 0x294   :  { %3596 = vst.msk [vmem:[%s6542_s11 + $0x10] sm:$0xff] %vm210_vm1, %v5485_v2  ;;  %v5494_v48 = vadd.f32 %v1672_v1, %v5459_v32  ;;  %v1674_v61 = vpop.f32.mrb[71].mxu0 }
 0x295   :  { %v1819_v31 = vmul.f32 0.5, %v4126_v58  ;;  %3628 = vst.msk [vmem:[%s6543_s12 + $0x10] sm:$0xff] %vm210_vm1, %v4126_v58  ;;  %v4128_v37 = vadd.f32 %v1674_v61, %v5462_v6 }
 0x296   :  { %3597 = vst.msk [vmem:[%s6542_s11 + $0x18] sm:$0xff] %vm210_vm1, %v5494_v48 }
 0x297   :  { %v1853_v49 = vmul.f32 1.442695, %v1819_v31  ;;  %v1820_v18 = vmul.f32 0.5, %v4128_v37  ;;  %3629 = vst.msk [vmem:[%s6543_s12 + $0x18] sm:$0xff] %vm210_vm1, %v4128_v37  ;;  %v183_v31 = vld [vmem:[%s6532_s1 + $0x28] sm:$0xff] }
 0x299   :  { %4485 = vpow2.f32 %v1853_v49  ;;  %v1855_v63 = vmul.f32 1.442695, %v1820_v18  ;;  %v1678_v3 = vpop.f32.mrb[72].mxu0  ;;  %v4431_v49 = vld [vmem:[#allocation4 + $0x48] ss:$16 sps:$4 sm:$0xff]  }
 0x29a   :  { %v5518_v4 = vadd.f32 %v1678_v3, %v5459_v32  ;;  %v1680_v8 = vpop.f32.mrb[73].mxu0 }
 0x29b   :  { %v4482_v9 = vpop.eup %4481  ;;  %4487 = vpow2.f32 %v1855_v63  ;;  %v4130_v12 = vadd.f32 %v1680_v8, %v5462_v6  ;;  %v1682_v13 = vpop.f32.mrb[74].mxu0  ;;  %v4436_v63 = vld [vmem:[#allocation4 + $0x6c] ss:$16 sps:$4 sm:$0xff]  }
 0x29c   :  { %v1913_v16 = vmul.f32 %v4482_v9, %v211_v62  ;;  %3598 = vst.msk [vmem:[%s6542_s11 + $0x20] sm:$0xff] %vm210_vm1, %v5518_v4  ;;  %v5528_v57 = vadd.f32 %v1682_v13, %v5459_v32  ;;  %v1684_v17 = vpop.f32.mrb[75].mxu0  ;;  %v216_v9 = vsel %vm210_vm1, %v183_v31, 0.0 }
 0x29d   :  { %v4484_v20 = vpop.eup %4483  ;;  %v1821_v21 = vmul.f32 0.5, %v4130_v12  ;;  %3630 = vst.msk [vmem:[%s6543_s12 + $0x20] sm:$0xff] %vm210_vm1, %v4130_v12  ;;  %v4132_v22 = vadd.f32 %v1684_v17, %v5462_v6 }
 0x29e   :  { %v1914_v23 = vmul.f32 %v4484_v20, %v212_v56  ;;  %3599 = vst.msk [vmem:[%s6542_s11 + $0x28] sm:$0xff] %vm210_vm1, %v5528_v57  ;;  %v1945_v14 = vadd.f32 %v4121_v46, %v1913_v16 }
 0x29f   :  { %v1857_v26 = vmul.f32 1.442695, %v1821_v21  ;;  %v1822_v59 = vmul.f32 0.5, %v4132_v22  ;;  %3631 = vst.msk [vmem:[%s6543_s12 + $0x28] sm:$0xff] %vm210_vm1, %v4132_v22  ;;  %v4434_v21 = vld [vmem:[#allocation4 + $0x68] ss:$16 sps:$4 sm:$0xff]  }
 0x2a0   :  { %v1946_v34 = vadd.f32 %v4123_v7, %v1914_v23 }
 0x2a1   :  { %4489 = vpow2.f32 %v1857_v26  ;;  %v1859_v40 = vmul.f32 1.442695, %v1822_v59  ;;  %v1688_v41 = vpop.f32.mrb[76].mxu0 }
 0x2a2   :  { %v5552_v44 = vadd.f32 %v1688_v41, %v5459_v32  ;;  %v1690_v36 = vpop.f32.mrb[77].mxu0  ;;  %v5554_v39 = vpack.c.bf16 %v1946_v34, %v1945_v14  ;;  %v184_v14 = vld [vmem:[%s6532_s1 + $0x30] sm:$0xff] }
 0x2a3   :  { %v4486_v28 = vpop.eup %4485  ;;  %4491 = vpow2.f32 %v1859_v40  ;;  %v4134_v10 = vadd.f32 %v1690_v36, %v5462_v6  ;;  %v1692_v46 = vpop.f32.mrb[78].mxu0  ;;  %v217_v41 = vsel %vm210_vm1, %v184_v14, 0.0 }
 0x2a4   :  { %3600 = vst.msk [vmem:[%s6542_s11 + $0x30] sm:$0xff] %vm210_vm1, %v5552_v44  ;;  %v5564_v29 = vadd.f32 %v1692_v46, %v5459_v32  ;;  %v1694_v33 = vpop.f32.mrb[79].mxu0  ;;  %2240 = vmatmul.mubr.bf16.vlgmr.msra.gmra.mrb[64].mxu1 %v5554_v39  ;;  %v1915_v7 = vmul.f32 %v4486_v28, %v213_v43  ;;  %v4442_v28 = vld [vmem:[#allocation4 + $0xac] ss:$16 sps:$4 sm:$0xff]  }
 0x2a5   :  { %v4488_v11 = vpop.eup %4487  ;;  %v1823_v47 = vmul.f32 0.5, %v4134_v10  ;;  %3632 = vst.msk [vmem:[%s6543_s12 + $0x30] sm:$0xff] %vm210_vm1, %v4134_v10  ;;  %v4136_v54 = vadd.f32 %v1694_v33, %v5462_v6  ;;  %2401 = vmatpush1.bf16.msra.mxu1 %v4425_v42  ;;  %2249 = vmatprep.mubr.bf16.mxu1 %v4750_v0  ;;  %v4437_v42 = vld [vmem:[#allocation4 + $0x88] ss:$16 sps:$4 sm:$0xff]  }
 0x2a6   :  { %3601 = vst.msk [vmem:[%s6542_s11 + $0x38] sm:$0xff] %vm210_vm1, %v5564_v29  ;;  %v1916_v35 = vmul.f32 %v4488_v11, %v214_v51  ;;  %v1947_v15 = vadd.f32 %v5485_v2, %v1915_v7  ;;  %2402 = vmatprep.subr.bf16.mxu1 %v4430_v50  ;;  %v218_v51 = vsel %vm210_vm1, %v185_v38, 0.0 }
 0x2a7   :  { %v1861_v58 = vmul.f32 1.442695, %v1823_v47  ;;  %v1824_v1 = vmul.f32 0.5, %v4136_v54  ;;  %3633 = vst.msk [vmem:[%s6543_s12 + $0x38] sm:$0xff] %vm210_vm1, %v4136_v54 }
 0x2a8   :  { %v1948_v61 = vadd.f32 %v5494_v48, %v1916_v35  ;;  %v4440_v35 = vld [vmem:[#allocation4 + $0xa8] ss:$16 sps:$4 sm:$0xff]  }
 0x2a9   :  { %4493 = vpow2.f32 %v1861_v58  ;;  %v1863_v2 = vmul.f32 1.442695, %v1824_v1  ;;  %v1698_v37 = vpop.f32.mrb[80].mxu0  ;;  %2403 = vmatpush1.bf16.msra.mxu1 %v4428_v30  ;;  %v4445_v58 = vld [vmem:[#allocation4 + $0xcc] ss:$16 sps:$4 sm:$0xff]  }
 0x2aa   :  { %v5592_v18 = vadd.f32 %v1698_v37, %v5459_v32  ;;  %v1700_v60 = vpop.f32.mrb[81].mxu0  ;;  %v5594_v62 = vpack.c.bf16 %v1948_v61, %v1947_v15  ;;  %2404 = vmatprep.subr.bf16.mxu1 %v4433_v5  ;;  %v186_v5 = vld [vmem:[%s6532_s1 + $0x40] sm:$0xff] }
 0x2ab   :  { %v4490_v48 = vpop.eup %4489  ;;  %4495 = vpow2.f32 %v1863_v2  ;;  %v4138_v3 = vadd.f32 %v1700_v60, %v5462_v6  ;;  %v1702_v8 = vpop.f32.mrb[82].mxu0  ;;  %v187_v2 = vld [vmem:[%s6532_s1 + $0x48] sm:$0xff] }
 0x2ac   :  { %3602 = vst.msk [vmem:[%s6542_s11 + $0x40] sm:$0xff] %vm210_vm1, %v5592_v18  ;;  %v5604_v56 = vadd.f32 %v1702_v8, %v5459_v32  ;;  %v1704_v12 = vpop.f32.mrb[83].mxu0  ;;  %2250 = vmatmul.mubr.bf16.gmra.mrb[68].mxu1 %v5594_v62  ;;  %v1917_v13 = vmul.f32 %v4490_v48, %v215_v45  ;;  %v219_v45 = vsel %vm210_vm1, %v186_v5, 0.0 }
 0x2ad   :  { %v4492_v16 = vpop.eup %4491  ;;  %v1825_v17 = vmul.f32 0.5, %v4138_v3  ;;  %3634 = vst.msk [vmem:[%s6543_s12 + $0x40] sm:$0xff] %vm210_vm1, %v4138_v3  ;;  %v4140_v20 = vadd.f32 %v1704_v12, %v5462_v6  ;;  %2259 = vmatprep.mubr.bf16.mxu1 %v4750_v0  ;;  %2405 = vmatpush1.bf16.msra.mxu1 %v4431_v49  ;;  %v4443_v49 = vld [vmem:[#allocation4 + $0xc8] ss:$16 sps:$4 sm:$0xff]   ;;  %v4448_v3 = vld [vmem:[#allocation4 + $0xec] ss:$16 sps:$4 sm:$0xff]  }
 0x2ae   :  { %3603 = vst.msk [vmem:[%s6542_s11 + $0x48] sm:$0xff] %vm210_vm1, %v5604_v56  ;;  %v1918_v22 = vmul.f32 %v4492_v16, %v216_v9  ;;  %v1949_v23 = vadd.f32 %v5518_v4, %v1917_v13  ;;  %2406 = vmatprep.subr.bf16.mxu1 %v4436_v63  ;;  %v220_v12 = vsel %vm210_vm1, %v187_v2, 0.0 }
 0x2af   :  { %v1865_v26 = vmul.f32 1.442695, %v1825_v17  ;;  %v1826_v59 = vmul.f32 0.5, %v4140_v20  ;;  %3635 = vst.msk [vmem:[%s6543_s12 + $0x48] sm:$0xff] %vm210_vm1, %v4140_v20 }
 0x2b0   :  { %v1950_v34 = vadd.f32 %v5528_v57, %v1918_v22 }
 0x2b1   :  { %4497 = vpow2.f32 %v1865_v26  ;;  %v1867_v4 = vmul.f32 1.442695, %v1826_v59  ;;  %v1708_v40 = vpop.f32.mrb[84].mxu0  ;;  %2407 = vmatpush1.bf16.msra.mxu1 %v4434_v21  ;;  %v188_v26 = vld [vmem:[%s6532_s1 + $0x50] sm:$0xff] }
 0x2b2   :  { %v5632_v43 = vadd.f32 %v1708_v40, %v5459_v32  ;;  %v1710_v36 = vpop.f32.mrb[85].mxu0  ;;  %v5634_v50 = vpack.c.bf16 %v1950_v34, %v1949_v23  ;;  %2408 = vmatprep.subr.bf16.mxu1 %v4439_v24  ;;  %v4446_v23 = vld [vmem:[#allocation4 + $0xe8] ss:$16 sps:$4 sm:$0xff]  }
 0x2b3   :  { %v4494_v57 = vpop.eup %4493  ;;  %4499 = vpow2.f32 %v1867_v4  ;;  %v4142_v10 = vadd.f32 %v1710_v36, %v5462_v6  ;;  %v1712_v46 = vpop.f32.mrb[86].mxu0  ;;  %v189_v4 = vld [vmem:[%s6532_s1 + $0x58] sm:$0xff] }
 0x2b4   :  { %3604 = vst.msk [vmem:[%s6542_s11 + $0x50] sm:$0xff] %vm210_vm1, %v5632_v43  ;;  %v5644_v33 = vadd.f32 %v1712_v46, %v5459_v32  ;;  %v1714_v7 = vpop.f32.mrb[87].mxu0  ;;  %2260 = vmatmul.mubr.bf16.gmra.mrb[72].mxu1 %v5634_v50  ;;  %v1919_v11 = vmul.f32 %v4494_v57, %v217_v41  ;;  %v221_v41 = vsel %vm210_vm1, %v188_v26, 0.0  ;;  %v222_v46 = vsel %vm210_vm1, %v189_v4, 0.0  ;;  %v193_v26 = vld [vmem:[%s6532_s1 + $0x78] sm:$0xff] }
 0x2b5   :  { %v4496_v47 = vpop.eup %4495  ;;  %v1827_v54 = vmul.f32 0.5, %v4142_v10  ;;  %3636 = vst.msk [vmem:[%s6543_s12 + $0x50] sm:$0xff] %vm210_vm1, %v4142_v10  ;;  %v4144_v30 = vadd.f32 %v1714_v7, %v5462_v6  ;;  %2269 = vmatprep.mubr.bf16.mxu1 %v4750_v0  ;;  %2409 = vmatpush1.bf16.msra.mxu1 %v4437_v42 }
 0x2b6   :  { %3605 = vst.msk [vmem:[%s6542_s11 + $0x58] sm:$0xff] %vm210_vm1, %v5644_v33  ;;  %v1920_v15 = vmul.f32 %v4496_v47, %v218_v51  ;;  %v1951_v19 = vadd.f32 %v5552_v44, %v1919_v11  ;;  %2410 = vmatprep.subr.bf16.mxu1 %v4442_v28 }
 0x2b7   :  { %v1869_v1 = vmul.f32 1.442695, %v1827_v54  ;;  %v1828_v61 = vmul.f32 0.5, %v4144_v30  ;;  %3637 = vst.msk [vmem:[%s6543_s12 + $0x58] sm:$0xff] %vm210_vm1, %v4144_v30 }
 0x2b8   :  { %v1952_v31 = vadd.f32 %v5564_v29, %v1920_v15 }
 0x2b9   :  { %4501 = vpow2.f32 %v1869_v1  ;;  %v1871_v44 = vmul.f32 1.442695, %v1828_v61  ;;  %v1718_v37 = vpop.f32.mrb[88].mxu0  ;;  %2411 = vmatpush1.bf16.msra.mxu1 %v4440_v35  ;;  %v191_v61 = vld [vmem:[%s6532_s1 + $0x68] sm:$0xff] }
 0x2ba   :  { %v5672_v60 = vadd.f32 %v1718_v37, %v5459_v32  ;;  %v1720_v63 = vpop.f32.mrb[89].mxu0  ;;  %v5674_v48 = vpack.c.bf16 %v1952_v31, %v1951_v19  ;;  %2412 = vmatprep.subr.bf16.mxu1 %v4445_v58  ;;  %v190_v19 = vld [vmem:[%s6532_s1 + $0x60] sm:$0xff] }
 0x2bb   :  { %v4498_v29 = vpop.eup %4497  ;;  %4503 = vpow2.f32 %v1871_v44  ;;  %v4146_v8 = vadd.f32 %v1720_v63, %v5462_v6  ;;  %v1722_v9 = vpop.f32.mrb[90].mxu0  ;;  %v223_v2 = vsel %vm210_vm1, %v190_v19, 0.0 }
 0x2bc   :  { %3606 = vst.msk [vmem:[%s6542_s11 + $0x60] sm:$0xff] %vm210_vm1, %v5672_v60  ;;  %v5684_v13 = vadd.f32 %v1722_v9, %v5459_v32  ;;  %v1724_v16 = vpop.f32.mrb[91].mxu0  ;;  %2270 = vmatmul.mubr.bf16.gmra.mrb[76].mxu1 %v5674_v48  ;;  %v1921_v17 = vmul.f32 %v4498_v29, %v219_v45 }
 0x2bd   :  { %v4500_v20 = vpop.eup %4499  ;;  %v1829_v21 = vmul.f32 0.5, %v4146_v8  ;;  %3638 = vst.msk [vmem:[%s6543_s12 + $0x60] sm:$0xff] %vm210_vm1, %v4146_v8  ;;  %v4148_v22 = vadd.f32 %v1724_v16, %v5462_v6  ;;  %2279 = vmatprep.mubr.bf16.mxu1 %v4750_v0  ;;  %2413 = vmatpush1.bf16.msra.mxu1 %v4443_v49 }
 0x2be   :  { %3607 = vst.msk [vmem:[%s6542_s11 + $0x68] sm:$0xff] %vm210_vm1, %v5684_v13  ;;  %v1922_v14 = vmul.f32 %v4500_v20, %v220_v12  ;;  %v1953_v24 = vadd.f32 %v5592_v18, %v1921_v17  ;;  %2414 = vmatprep.subr.bf16.mxu1 %v4448_v3  ;;  %v224_v3 = vsel %vm210_vm1, %v191_v61, 0.0 }
 0x2bf   :  { %v1873_v59 = vmul.f32 1.442695, %v1829_v21  ;;  %v1830_v34 = vmul.f32 0.5, %v4148_v22  ;;  %3639 = vst.msk [vmem:[%s6543_s12 + $0x68] sm:$0xff] %vm210_vm1, %v4148_v22  ;;  %v192_v22 = vld [vmem:[%s6532_s1 + $0x70] sm:$0xff] }
 0x2c0   :  { %v1954_v38 = vadd.f32 %v5604_v56, %v1922_v14 }
 0x2c1   :  { %4505 = vpow2.f32 %v1873_v59  ;;  %v1875_v18 = vmul.f32 1.442695, %v1830_v34  ;;  %v1728_v40 = vpop.f32.mrb[92].mxu0  ;;  %2415 = vmatpush1.bf16.msra.mxu1 %v4446_v23  ;;  %v225_v34 = vsel %vm210_vm1, %v192_v22, 0.0  ;;  %v196_v22 = vld [vmem:[%s6532_s1 + $0x90] sm:$0xff] }
 0x2c2   :  { %v5712_v42 = vadd.f32 %v1728_v40, %v5459_v32  ;;  %v1730_v36 = vpop.f32.mrb[93].mxu0  ;;  %v5714_v28 = vpack.c.bf16 %v1954_v38, %v1953_v24 }
 0x2c3   :  { %v4502_v57 = vpop.eup %4501  ;;  %4507 = vpow2.f32 %v1875_v18  ;;  %v4150_v56 = vadd.f32 %v1730_v36, %v5462_v6  ;;  %v1732_v10 = vpop.f32.mrb[94].mxu0  ;;  %v226_v36 = vsel %vm210_vm1, %v193_v26, 0.0  ;;  %v197_v26 = vld [vmem:[%s6532_s1 + $0x98] sm:$0xff] }
 0x2c4   :  { %3608 = vst.msk [vmem:[%s6542_s11 + $0x70] sm:$0xff] %vm210_vm1, %v5712_v42  ;;  %v5724_v51 = vadd.f32 %v1732_v10, %v5459_v32  ;;  %v1734_v7 = vpop.f32.mrb[95].mxu0  ;;  %2280 = vmatmul.mubr.bf16.gmra.mrb[80].mxu1 %v5714_v28  ;;  %v1923_v11 = vmul.f32 %v4502_v57, %v221_v41 }
 0x2c5   :  { %v4504_v47 = vpop.eup %4503  ;;  %v1831_v54 = vmul.f32 0.5, %v4150_v56  ;;  %3640 = vst.msk [vmem:[%s6543_s12 + $0x70] sm:$0xff] %vm210_vm1, %v4150_v56  ;;  %v4152_v30 = vadd.f32 %v1734_v7, %v5462_v6  ;;  %2289 = vmatprep.mubr.bf16.mxu1 %v4750_v0 }
 0x2c6   :  { %3609 = vst.msk [vmem:[%s6542_s11 + $0x78] sm:$0xff] %vm210_vm1, %v5724_v51  ;;  %v1924_v35 = vmul.f32 %v4504_v47, %v222_v46  ;;  %v1955_v15 = vadd.f32 %v5632_v43, %v1923_v11 }
 0x2c7   :  { %v1877_v5 = vmul.f32 1.442695, %v1831_v54  ;;  %v1832_v58 = vmul.f32 0.5, %v4152_v30  ;;  %3641 = vst.msk [vmem:[%s6543_s12 + $0x78] sm:$0xff] %vm210_vm1, %v4152_v30  ;;  %v194_v30 = vld [vmem:[%s6532_s1 + $0x80] sm:$0xff] }
 0x2c8   :  { %v1956_v1 = vadd.f32 %v5644_v33, %v1924_v35 }
 0x2c9   :  { %4509 = vpow2.f32 %v1877_v5  ;;  %v1879_v31 = vmul.f32 1.442695, %v1832_v58  ;;  %v1738_v43 = vpop.f32.mrb[96].mxu0  ;;  %v195_v5 = vld [vmem:[%s6532_s1 + $0x88] sm:$0xff] }
 0x2ca   :  { %v5752_v44 = vadd.f32 %v1738_v43, %v5459_v32  ;;  %v1740_v37 = vpop.f32.mrb[97].mxu0  ;;  %v5754_v45 = vpack.c.bf16 %v1956_v1, %v1955_v15  ;;  %v227_v1 = vsel %vm210_vm1, %v194_v30, 0.0 }
 0x2cb   :  { %v4506_v49 = vpop.eup %4505  ;;  %4511 = vpow2.f32 %v1879_v31  ;;  %v4154_v63 = vadd.f32 %v1740_v37, %v5462_v6  ;;  %v1742_v33 = vpop.f32.mrb[98].mxu0 }
 0x2cc   :  { %3610 = vst.msk [vmem:[%s6542_s11 + $0x80] sm:$0xff] %vm210_vm1, %v5752_v44  ;;  %v5764_v29 = vadd.f32 %v1742_v33, %v5459_v32  ;;  %v1744_v8 = vpop.f32.mrb[99].mxu0  ;;  %2290 = vmatmul.mubr.bf16.gmra.mrb[84].mxu1 %v5754_v45  ;;  %v1925_v9 = vmul.f32 %v4506_v49, %v223_v2  ;;  %v228_v49 = vsel %vm210_vm1, %v195_v5, 0.0  ;;  %v198_v5 = vld [vmem:[%s6532_s1 + $0xa0] sm:$0xff] }
 0x2cd   :  { %v4508_v12 = vpop.eup %4507  ;;  %v1833_v16 = vmul.f32 0.5, %v4154_v63  ;;  %3642 = vst.msk [vmem:[%s6543_s12 + $0x80] sm:$0xff] %vm210_vm1, %v4154_v63  ;;  %v4156_v17 = vadd.f32 %v1744_v8, %v5462_v6  ;;  %2299 = vmatprep.mubr.bf16.mxu1 %v4750_v0  ;;  %v4449_v8 = vld [vmem:[#allocation6 + $0x40] sm:$0xff]  }
 0x2ce   :  { %3611 = vst.msk [vmem:[%s6542_s11 + $0x88] sm:$0xff] %vm210_vm1, %v5764_v29  ;;  %v1926_v20 = vmul.f32 %v4508_v12, %v224_v3  ;;  %v1957_v21 = vadd.f32 %v5672_v60, %v1925_v9  ;;  %3897 = vmatprep.subr.bf16.mxu0 %v4449_v8 }
 0x2cf   :  { %v1881_v23 = vmul.f32 1.442695, %v1833_v16  ;;  %v1834_v14 = vmul.f32 0.5, %v4156_v17  ;;  %3643 = vst.msk [vmem:[%s6543_s12 + $0x88] sm:$0xff] %vm210_vm1, %v4156_v17  ;;  %v4450_v17 = vld [vmem:[#allocation6] sm:$0xff]  }
 0x2d0   :  { %v1958_v24 = vadd.f32 %v5684_v13, %v1926_v20  ;;  %3898 = vmatpush3.bf16.msra.mxu0 %v4450_v17 }
 0x2d1   :  { %4513 = vpow2.f32 %v1881_v23  ;;  %v1883_v59 = vmul.f32 1.442695, %v1834_v14  ;;  %v1748_v60 = vpop.f32.mrb[100].mxu0 }
 0x2d2   :  { %v5792_v38 = vadd.f32 %v1748_v60, %v5459_v32  ;;  %v1750_v4 = vpop.f32.mrb[101].mxu0  ;;  %v5794_v18 = vpack.c.bf16 %v1958_v24, %v1957_v21  ;;  %v229_v60 = vsel %vm210_vm1, %v196_v22, 0.0  ;;  %v4456_v22 = vld [vmem:[#allocation6 + $0x18] sm:$0xff]  }
 0x2d3   :  { %v4510_v40 = vpop.eup %4509  ;;  %4515 = vpow2.f32 %v1883_v59  ;;  %v4158_v41 = vadd.f32 %v1750_v4, %v5462_v6  ;;  %v1752_v13 = vpop.f32.mrb[102].mxu0 }
 0x2d4   :  { %3612 = vst.msk [vmem:[%s6542_s11 + $0x90] sm:$0xff] %vm210_vm1, %v5792_v38  ;;  %v5804_v57 = vadd.f32 %v1752_v13, %v5459_v32  ;;  %v1754_v56 = vpop.f32.mrb[103].mxu0  ;;  %2300 = vmatmul.mubr.bf16.gmra.mrb[88].mxu1 %v5794_v18  ;;  %v1927_v10 = vmul.f32 %v4510_v40, %v225_v34 }
 0x2d5   :  { %v4512_v46 = vpop.eup %4511  ;;  %v1835_v7 = vmul.f32 0.5, %v4158_v41  ;;  %3644 = vst.msk [vmem:[%s6543_s12 + $0x90] sm:$0xff] %vm210_vm1, %v4158_v41  ;;  %v4160_v11 = vadd.f32 %v1754_v56, %v5462_v6  ;;  %2309 = vmatprep.mubr.bf16.mxu1 %v4750_v0 }
 0x2d6   :  { %3613 = vst.msk [vmem:[%s6542_s11 + $0x98] sm:$0xff] %vm210_vm1, %v5804_v57  ;;  %v1928_v47 = vmul.f32 %v4512_v46, %v226_v36  ;;  %v1959_v54 = vadd.f32 %v5712_v42, %v1927_v10  ;;  %v230_v36 = vsel %vm210_vm1, %v197_v26, 0.0 }
 0x2d7   :  { %v1885_v35 = vmul.f32 1.442695, %v1835_v7  ;;  %v1836_v15 = vmul.f32 0.5, %v4160_v11  ;;  %3645 = vst.msk [vmem:[%s6543_s12 + $0x98] sm:$0xff] %vm210_vm1, %v4160_v11  ;;  %v4451_v7 = vld [vmem:[#allocation6 + $0x48] sm:$0xff]  }
 0x2d8   :  { %v1960_v19 = vadd.f32 %v5724_v51, %v1928_v47  ;;  %v4452_v11 = vld [vmem:[#allocation6 + $0x8] sm:$0xff]   ;;  %v4453_v47 = vld [vmem:[#allocation6 + $0x50] sm:$0xff]   ;;  %3899 = vmatprep.subr.bf16.mxu0 %v4451_v7 }
 0x2d9   :  { %4517 = vpow2.f32 %v1885_v35  ;;  %v1887_v58 = vmul.f32 1.442695, %v1836_v15  ;;  %v1758_v42 = vpop.f32.mrb[104].mxu0  ;;  %3900 = vmatpush3.bf16.msra.mxu0 %v4452_v11 }
 0x2da   :  { %v5832_v61 = vadd.f32 %v1758_v42, %v5459_v32  ;;  %v1760_v31 = vpop.f32.mrb[105].mxu0  ;;  %v5834_v43 = vpack.c.bf16 %v1960_v19, %v1959_v54  ;;  %3901 = vmatprep.subr.bf16.mxu0 %v4453_v47 }
 0x2db   :  { %v4514_v2 = vpop.eup %4513  ;;  %4519 = vpow2.f32 %v1887_v58  ;;  %v4162_v37 = vadd.f32 %v1760_v31, %v5462_v6  ;;  %v1762_v51 = vpop.f32.mrb[106].mxu0 }
 0x2dc   :  { %3614 = vst.msk [vmem:[%s6542_s11 + $0xa0] sm:$0xff] %vm210_vm1, %v5832_v61  ;;  %v5844_v63 = vadd.f32 %v1762_v51, %v5459_v32  ;;  %v1764_v33 = vpop.f32.mrb[107].mxu0  ;;  %2310 = vmatmul.mubr.bf16.gmra.mrb[92].mxu1 %v5834_v43  ;;  %v1929_v3 = vmul.f32 %v4514_v2, %v227_v1  ;;  %v4454_v1 = vld [vmem:[#allocation6 + $0x10] sm:$0xff]   ;;  %v231_v51 = vsel %vm210_vm1, %v198_v5, 0.0 }
 0x2dd   :  { %v4516_v9 = vpop.eup %4515  ;;  %v1837_v12 = vmul.f32 0.5, %v4162_v37  ;;  %3646 = vst.msk [vmem:[%s6543_s12 + $0xa0] sm:$0xff] %vm210_vm1, %v4162_v37  ;;  %v4164_v16 = vadd.f32 %v1764_v33, %v5462_v6  ;;  %2319 = vmatprep.mubr.bf16.mxu1 %v4750_v0  ;;  %3902 = vmatpush3.bf16.msra.mxu0 %v4454_v1 }
 0x2de   :  { %3615 = vst.msk [vmem:[%s6542_s11 + $0xa8] sm:$0xff] %vm210_vm1, %v5844_v63  ;;  %v1930_v20 = vmul.f32 %v4516_v9, %v228_v49  ;;  %v1961_v21 = vadd.f32 %v5752_v44, %v1929_v3 }
 0x2df   :  { %v1889_v23 = vmul.f32 1.442695, %v1837_v12  ;;  %v1838_v14 = vmul.f32 0.5, %v4164_v16  ;;  %3647 = vst.msk [vmem:[%s6543_s12 + $0xa8] sm:$0xff] %vm210_vm1, %v4164_v16 }
 0x2e0   :  { %v1962_v24 = vadd.f32 %v5764_v29, %v1930_v20 }
 0x2e1   :  { %4521 = vpow2.f32 %v1889_v23  ;;  %v1891_v44 = vmul.f32 1.442695, %v1838_v14  ;;  %v1768_v59 = vpop.f32.mrb[108].mxu0  ;;  %v4457_v23 = vld [vmem:[#allocation6 + $0x60] sm:$0xff]  }
 0x2e2   :  { %v5872_v34 = vadd.f32 %v1768_v59, %v5459_v32  ;;  %v1770_v4 = vpop.f32.mrb[109].mxu0  ;;  %v5874_v40 = vpack.c.bf16 %v1962_v24, %v1961_v21  ;;  %v4455_v21 = vld [vmem:[#allocation6 + $0x58] sm:$0xff]  }
 0x2e3   :  { %v4518_v41 = vpop.eup %4517  ;;  %4523 = vpow2.f32 %v1891_v44  ;;  %v4166_v13 = vadd.f32 %v1770_v4, %v5462_v6  ;;  %v1772_v29 = vpop.f32.mrb[110].mxu0  ;;  %3903 = vmatprep.subr.bf16.mxu0 %v4455_v21  ;;  %v4462_v21 = vld [vmem:[#allocation6 + $0x30] sm:$0xff]  }
 0x2e4   :  { %3616 = vst.msk [vmem:[%s6542_s11 + $0xb0] sm:$0xff] %vm210_vm1, %v5872_v34  ;;  %v5884_v56 = vadd.f32 %v1772_v29, %v5459_v32  ;;  %v1774_v10 = vpop.f32.mrb[111].mxu0  ;;  %2320 = vmatmul.mubr.bf16.gmra.mrb[96].mxu1 %v5874_v40  ;;  %v1931_v46 = vmul.f32 %v4518_v41, %v229_v60  ;;  %v200_v60 = vld [vmem:[%s6532_s1 + $0xb0] sm:$0xff]  ;;  %3904 = vmatpush3.bf16.msra.mxu0 %v4456_v22 }
 0x2e5   :  { %v4520_v54 = vpop.eup %4519  ;;  %v1839_v30 = vmul.f32 0.5, %v4166_v13  ;;  %3648 = vst.msk [vmem:[%s6543_s12 + $0xb0] sm:$0xff] %vm210_vm1, %v4166_v13  ;;  %v4168_v35 = vadd.f32 %v1774_v10, %v5462_v6  ;;  %2329 = vmatprep.mubr.bf16.mxu1 %v4750_v0  ;;  %v4458_v13 = vld [vmem:[#allocation6 + $0x20] sm:$0xff]   ;;  %3905 = vmatprep.subr.bf16.mxu0 %v4457_v23 }
 0x2e6   :  { %3617 = vst.msk [vmem:[%s6542_s11 + $0xb8] sm:$0xff] %vm210_vm1, %v5884_v56  ;;  %v1932_v15 = vmul.f32 %v4520_v54, %v230_v36  ;;  %v1963_v19 = vadd.f32 %v5792_v38, %v1931_v46  ;;  %v199_v38 = vld [vmem:[%s6532_s1 + $0xa8] sm:$0xff]  ;;  %v233_v46 = vsel %vm210_vm1, %v200_v60, 0.0 }
 0x2e7   :  { %v1893_v58 = vmul.f32 1.442695, %v1839_v30  ;;  %v1840_v42 = vmul.f32 0.5, %v4168_v35  ;;  %3649 = vst.msk [vmem:[%s6543_s12 + $0xb8] sm:$0xff] %vm210_vm1, %v4168_v35  ;;  %v232_v12 = vsel %vm210_vm1, %v199_v38, 0.0  ;;  %v4460_v38 = vld [vmem:[#allocation6 + $0x28] sm:$0xff]  }
 0x2e8   :  { %v1964_v31 = vadd.f32 %v5804_v57, %v1932_v15  ;;  %3906 = vmatpush3.bf16.msra.mxu0 %v4458_v13 }
 0x2e9   :  { %4525 = vpow2.f32 %v1893_v58  ;;  %v1895_v2 = vmul.f32 1.442695, %v1840_v42  ;;  %v1778_v37 = vpop.f32.mrb[112].mxu0  ;;  %v4459_v58 = vld [vmem:[#allocation6 + $0x68] sm:$0xff]  }
 0x2ea   :  { %v5912_v49 = vadd.f32 %v1778_v37, %v5459_v32  ;;  %v1780_v33 = vpop.f32.mrb[113].mxu0  ;;  %v5914_v3 = vpack.c.bf16 %v1964_v31, %v1963_v19  ;;  %3907 = vmatprep.subr.bf16.mxu0 %v4459_v58 }
 0x2eb   :  { %v4522_v8 = vpop.eup %4521  ;;  %4527 = vpow2.f32 %v1895_v2  ;;  %v4170_v57 = vadd.f32 %v1780_v33, %v5462_v6  ;;  %v1782_v9 = vpop.f32.mrb[114].mxu0 }
 0x2ec   :  { %3618 = vst.msk [vmem:[%s6542_s11 + $0xc0] sm:$0xff] %vm210_vm1, %v5912_v49  ;;  %v5924_v16 = vadd.f32 %v1782_v9, %v5459_v32  ;;  %v1784_v17 = vpop.f32.mrb[115].mxu0  ;;  %2330 = vmatmul.mubr.bf16.gmra.mrb[100].mxu1 %v5914_v3  ;;  %v1933_v20 = vmul.f32 %v4522_v8, %v231_v51  ;;  %v202_v51 = vld [vmem:[%s6532_s1 + $0xc0] sm:$0xff]  ;;  %3908 = vmatpush3.bf16.msra.mxu0 %v4460_v38  ;;  %v203_v9 = vld [vmem:[%s6532_s1 + $0xc8] sm:$0xff] }
 0x2ed   :  { %v4524_v14 = vpop.eup %4523  ;;  %v1841_v24 = vmul.f32 0.5, %v4170_v57  ;;  %3650 = vst.msk [vmem:[%s6543_s12 + $0xc0] sm:$0xff] %vm210_vm1, %v4170_v57  ;;  %v4172_v26 = vadd.f32 %v1784_v17, %v5462_v6  ;;  %2339 = vmatprep.mubr.bf16.mxu1 %v4750_v0 }
 0x2ee   :  { %3619 = vst.msk [vmem:[%s6542_s11 + $0xc8] sm:$0xff] %vm210_vm1, %v5924_v16  ;;  %v1934_v44 = vmul.f32 %v4524_v14, %v232_v12  ;;  %v1965_v59 = vadd.f32 %v5832_v61, %v1933_v20  ;;  %v201_v61 = vld [vmem:[%s6532_s1 + $0xb8] sm:$0xff]  ;;  %v235_v20 = vsel %vm210_vm1, %v202_v51, 0.0 }
 0x2ef   :  { %v1897_v4 = vmul.f32 1.442695, %v1841_v24  ;;  %v1842_v41 = vmul.f32 0.5, %v4172_v26  ;;  %3651 = vst.msk [vmem:[%s6543_s12 + $0xc8] sm:$0xff] %vm210_vm1, %v4172_v26  ;;  %v234_v35 = vsel %vm210_vm1, %v201_v61, 0.0 }
 0x2f0   :  { %v1966_v29 = vadd.f32 %v5844_v63, %v1934_v44  ;;  %v236_v44 = vsel %vm210_vm1, %v203_v9, 0.0 }
 0x2f1   :  { %4529 = vpow2.f32 %v1897_v4  ;;  %v1899_v36 = vmul.f32 1.442695, %v1842_v41  ;;  %v1788_v10 = vpop.f32.mrb[116].mxu0  ;;  %v4463_v41 = vld [vmem:[#allocation6 + $0x78] sm:$0xff]  }
 0x2f2   :  { %v5952_v7 = vadd.f32 %v1788_v10, %v5459_v32  ;;  %v1790_v11 = vpop.f32.mrb[117].mxu0  ;;  %v5954_v47 = vpack.c.bf16 %v1966_v29, %v1965_v59 }
 0x2f3   :  { %v4526_v54 = vpop.eup %4525  ;;  %4531 = vpow2.f32 %v1899_v36  ;;  %v4174_v63 = vadd.f32 %v1790_v11, %v5462_v6  ;;  %v1792_v30 = vpop.f32.mrb[118].mxu0  ;;  %v4464_v36 = vld [vmem:[#allocation6 + $0x38] sm:$0xff]   ;;  %v204_v11 = vld [vmem:[%s6532_s1 + $0xd0] sm:$0xff] }
 0x2f4   :  { %3620 = vst.msk [vmem:[%s6542_s11 + $0xd0] sm:$0xff] %vm210_vm1, %v5952_v7  ;;  %v5964_v15 = vadd.f32 %v1792_v30, %v5459_v32  ;;  %v1794_v19 = vpop.f32.mrb[119].mxu0  ;;  %2340 = vmatmul.mubr.bf16.gmra.mrb[104].mxu1 %v5954_v47  ;;  %v1935_v5 = vmul.f32 %v4526_v54, %v233_v46 }
 0x2f5   :  { %v4528_v42 = vpop.eup %4527  ;;  %v1843_v1 = vmul.f32 0.5, %v4174_v63  ;;  %3652 = vst.msk [vmem:[%s6543_s12 + $0xd0] sm:$0xff] %vm210_vm1, %v4174_v63  ;;  %v4176_v31 = vadd.f32 %v1794_v19, %v5462_v6  ;;  %2349 = vmatprep.mubr.bf16.mxu1 %v4750_v0 }
 0x2f6   :  { %3621 = vst.msk [vmem:[%s6542_s11 + $0xd8] sm:$0xff] %vm210_vm1, %v5964_v15  ;;  %v1936_v2 = vmul.f32 %v4528_v42, %v234_v35  ;;  %v1967_v37 = vadd.f32 %v5872_v34, %v1935_v5  ;;  %v4461_v34 = vld [vmem:[#allocation6 + $0x70] sm:$0xff]   ;;  %v205_v35 = vld [vmem:[%s6532_s1 + $0xd8] sm:$0xff]  ;;  %v237_v5 = vsel %vm210_vm1, %v204_v11, 0.0 }
 0x2f7   :  { %v1901_v33 = vmul.f32 1.442695, %v1843_v1  ;;  %v1844_v8 = vmul.f32 0.5, %v4176_v31  ;;  %3653 = vst.msk [vmem:[%s6543_s12 + $0xd8] sm:$0xff] %vm210_vm1, %v4176_v31  ;;  %3909 = vmatprep.subr.bf16.mxu0 %v4461_v34 }
 0x2f8   :  { %v1968_v57 = vadd.f32 %v5884_v56, %v1936_v2  ;;  %3910 = vmatpush3.bf16.msra.mxu0 %v4462_v21 }
 0x2f9   :  { %4533 = vpow2.f32 %v1901_v33  ;;  %v1903_v12 = vmul.f32 1.442695, %v1844_v8  ;;  %v1798_v17 = vpop.f32.mrb[120].mxu0  ;;  %3911 = vmatprep.subr.bf16.mxu0 %v4463_v41 }
 0x2fa   :  { %v5992_v22 = vadd.f32 %v1798_v17, %v5459_v32  ;;  %v1800_v23 = vpop.f32.mrb[121].mxu0  ;;  %v5994_v14 = vpack.c.bf16 %v1968_v57, %v1967_v37  ;;  %v4465_v17 = vld [vmem:[#allocation6 + $0xc0] sm:$0xff]  }
 0x2fb   :  { %v4530_v24 = vpop.eup %4529  ;;  %4535 = vpow2.f32 %v1903_v12  ;;  %v4178_v56 = vadd.f32 %v1800_v23, %v5462_v6  ;;  %v1802_v26 = vpop.f32.mrb[122].mxu0  ;;  %v206_v12 = vld [vmem:[%s6532_s1 + $0xe0] sm:$0xff]  ;;  %v207_v23 = vld [vmem:[%s6532_s1 + $0xe8] sm:$0xff]  ;;  %4009 = vmatprep.subr.bf16.mxu1 %v4465_v17 }
 0x2fc   :  { %3622 = vst.msk [vmem:[%s6542_s11 + $0xe0] sm:$0xff] %vm210_vm1, %v5992_v22  ;;  %v6004_v59 = vadd.f32 %v1802_v26, %v5459_v32  ;;  %v1804_v60 = vpop.f32.mrb[123].mxu0  ;;  %2350 = vmatmul.mubr.bf16.gmra.mrb[108].mxu1 %v5994_v14  ;;  %v1937_v4 = vmul.f32 %v4530_v24, %v235_v20  ;;  %3912 = vmatpush3.bf16.msra.mxu0 %v4464_v36  ;;  %v239_v24 = vsel %vm210_vm1, %v206_v12, 0.0 }
 0x2fd   :  { %v4532_v13 = vpop.eup %4531  ;;  %v1845_v29 = vmul.f32 0.5, %v4178_v56  ;;  %3654 = vst.msk [vmem:[%s6543_s12 + $0xe0] sm:$0xff] %vm210_vm1, %v4178_v56  ;;  %v4180_v61 = vadd.f32 %v1804_v60, %v5462_v6  ;;  %2359 = vmatprep.mubr.bf16.mxu1 %v4750_v0 }
 0x2fe   :  { %3623 = vst.msk [vmem:[%s6542_s11 + $0xe8] sm:$0xff] %vm210_vm1, %v6004_v59  ;;  %v1938_v10 = vmul.f32 %v4532_v13, %v236_v44  ;;  %v1969_v46 = vadd.f32 %v5912_v49, %v1937_v4  ;;  %v240_v44 = vsel %vm210_vm1, %v207_v23, 0.0  ;;  %v208_v13 = vld [vmem:[%s6532_s1 + $0xf0] sm:$0xff] }
 0x2ff   :  { %v1905_v54 = vmul.f32 1.442695, %v1845_v29  ;;  %v1846_v63 = vmul.f32 0.5, %v4180_v61  ;;  %3655 = vst.msk [vmem:[%s6543_s12 + $0xe8] sm:$0xff] %vm210_vm1, %v4180_v61  ;;  %v209_v61 = vld [vmem:[%s6532_s1 + $0xf8] sm:$0xff]  ;;  %v241_v36 = vsel %vm210_vm1, %v208_v13, 0.0 }
 0x300   :  { %v1970_v30 = vadd.f32 %v5924_v16, %v1938_v10  ;;  %v238_v16 = vsel %vm210_vm1, %v205_v35, 0.0  ;;  %v242_v11 = vsel %vm210_vm1, %v209_v61, 0.0 }
 0x301   :  { %4537 = vpow2.f32 %v1905_v54  ;;  %v1907_v49 = vmul.f32 1.442695, %v1846_v63  ;;  %v1808_v19 = vpop.f32.mrb[124].mxu0 }
 0x302   :  { %v4181_v58 = vadd.f32 %v1808_v19, %v5459_v32  ;;  %v1810_v42 = vpop.f32.mrb[125].mxu0  ;;  %v6032_v1 = vpack.c.bf16 %v1970_v30, %v1969_v46  ;;  %v4467_v19 = vld [vmem:[#allocation6 + $0xc8] sm:$0xff]  }
 0x303   :  { %v4534_v31 = vpop.eup %4533  ;;  %4539 = vpow2.f32 %v1907_v49  ;;  %v4182_v38 = vadd.f32 %v1810_v42, %v5462_v6  ;;  %v1812_v2 = vpop.f32.mrb[126].mxu0  ;;  %v4466_v49 = vld [vmem:[#allocation6 + $0x80] sm:$0xff]   ;;  %v4469_v42 = vld [vmem:[#allocation6 + $0xd0] sm:$0xff]  }
 0x304   :  { %3624 = vst.msk [vmem:[%s6542_s11 + $0xf0] sm:$0xff] %vm210_vm1, %v4181_v58  ;;  %v4183_v37 = vadd.f32 %v1812_v2, %v5459_v32  ;;  %v1814_v51 = vpop.f32.mrb[127].mxu0  ;;  %2360 = vmatmul.mubr.bf16.gmra.mrb[112].mxu1 %v6032_v1  ;;  %v1939_v33 = vmul.f32 %v4534_v31, %v237_v5  ;;  %v4468_v5 = vld [vmem:[#allocation6 + $0x88] sm:$0xff]   ;;  %v4470_v31 = vld [vmem:[#allocation6 + $0x90] sm:$0xff]  }
 0x305   :  { %v4536_v8 = vpop.eup %4535  ;;  %v1847_v57 = vmul.f32 0.5, %v4182_v38  ;;  %3656 = vst.msk [vmem:[%s6543_s12 + $0xf0] sm:$0xff] %vm210_vm1, %v4182_v38  ;;  %v4184_v9 = vadd.f32 %v1814_v51, %v5462_v6  ;;  %2369 = vmatprep.mubr.bf16.mxu1 %v4750_v0  ;;  %v4474_v38 = vld [vmem:[#allocation6 + $0xa0] sm:$0xff]  }
 0x306   :  { %3625 = vst.msk [vmem:[%s6542_s11 + $0xf8] sm:$0xff] %vm210_vm1, %v4183_v37  ;;  %v1940_v32 = vmul.f32 %v4536_v8, %v238_v16  ;;  %v1971_v34 = vadd.f32 %v5952_v7, %v1939_v33  ;;  %v4480_v16 = vld [vmem:[#allocation6 + $0xb8] sm:$0xff]  }
 0x307   :  { %v1909_v20 = vmul.f32 1.442695, %v1847_v57  ;;  %v1848_v21 = vmul.f32 0.5, %v4184_v9  ;;  %3657 = vst.msk [vmem:[%s6543_s12 + $0xf8] sm:$0xff] %vm210_vm1, %v4184_v9 }
 0x308   :  { %v1972_v6 = vadd.f32 %v5964_v15, %v1940_v32 }
 0x309   :  { %4541 = vpow2.f32 %v1909_v20  ;;  %v1911_v7 = vmul.f32 1.442695, %v1848_v21 }
 0x30a   :  { %v6065_v56 = vpack.c.bf16 %v1972_v6, %v1971_v34 }
 0x30b   :  { %v4538_v26 = vpop.eup %4537  ;;  %4543 = vpow2.f32 %v1911_v7 }
 0x30c   :  { %2370 = vmatmul.mubr.bf16.gmra.mrb[116].mxu1 %v6065_v56  ;;  %v1941_v60 = vmul.f32 %v4538_v26, %v239_v24 }
 0x30d   :  { %v4540_v4 = vpop.eup %4539  ;;  %2379 = vmatprep.mubr.bf16.mxu1 %v4750_v0 }
 0x30e   :  { %v1942_v15 = vmul.f32 %v4540_v4, %v240_v44  ;;  %v1973_v41 = vadd.f32 %v5992_v22, %v1941_v60 }
 0x310   :  { %v1974_v29 = vadd.f32 %v6004_v59, %v1942_v15 }
 0x312   :  { %v6079_v10 = vpack.c.bf16 %v1974_v29, %v1973_v41 }
 0x313   :  { %v4542_v46 = vpop.eup %4541 }
 0x314   :  { %2380 = vmatmul.mubr.bf16.gmra.mrb[120].mxu1 %v6079_v10  ;;  %v1943_v22 = vmul.f32 %v4542_v46, %v241_v36 }
 0x315   :  { %v4544_v54 = vpop.eup %4543  ;;  %2389 = vmatprep.mubr.bf16.mxu1 %v4750_v0 }
 0x316   :  { %v1944_v63 = vmul.f32 %v4544_v54, %v242_v11  ;;  %v1975_v30 = vadd.f32 %v4181_v58, %v1943_v22  ;;  %v4471_v58 = vld [vmem:[#allocation6 + $0xd8] sm:$0xff]  }
 0x318   :  { %v1976_v59 = vadd.f32 %v4183_v37, %v1944_v63 }
 0x31a   :  { %v6084_v35 = vpack.c.bf16 %v1976_v59, %v1975_v30 }
 0x31c   :  { %2390 = vmatmul.mubr.bf16.gmra.mrb[124].mxu1 %v6084_v35 }
 0x31d   :  { %2432 = vmatprep.mubr.bf16.mxu1 %v4750_v0 }
 0x324   :  { %2433 = vmatmul.mubr.bf16.vlgmr.msra.gmra.mrb[128].mxu1 %v5554_v39  ;;  %v4472_v39 = vld [vmem:[#allocation6 + $0x98] sm:$0xff]  }
 0x325   :  { %2442 = vmatprep.mubr.bf16.mxu1 %v4750_v0  ;;  %4010 = vmatpush3.bf16.msra.mxu1 %v4466_v49 }
 0x326   :  { %4011 = vmatprep.subr.bf16.mxu1 %v4467_v19 }
 0x329   :  { %4012 = vmatpush3.bf16.msra.mxu1 %v4468_v5 }
 0x32a   :  { %4013 = vmatprep.subr.bf16.mxu1 %v4469_v42 }
 0x32c   :  { %2443 = vmatmul.mubr.bf16.gmra.mrb[132].mxu1 %v5594_v62  ;;  %v4473_v62 = vld [vmem:[#allocation6 + $0xe0] sm:$0xff]  }
 0x32d   :  { %2452 = vmatprep.mubr.bf16.mxu1 %v4750_v0  ;;  %4014 = vmatpush3.bf16.msra.mxu1 %v4470_v31 }
 0x32e   :  { %4015 = vmatprep.subr.bf16.mxu1 %v4471_v58 }
 0x331   :  { %4016 = vmatpush3.bf16.msra.mxu1 %v4472_v39 }
 0x332   :  { %4017 = vmatprep.subr.bf16.mxu1 %v4473_v62 }
 0x334   :  { %2453 = vmatmul.mubr.bf16.gmra.mrb[136].mxu1 %v5634_v50  ;;  %v4475_v50 = vld [vmem:[#allocation6 + $0xe8] sm:$0xff]  }
 0x335   :  { %2462 = vmatprep.mubr.bf16.mxu1 %v4750_v0  ;;  %4018 = vmatpush3.bf16.msra.mxu1 %v4474_v38 }
 0x336   :  { %4019 = vmatprep.subr.bf16.mxu1 %v4475_v50 }
 0x33c   :  { %2463 = vmatmul.mubr.bf16.gmra.mrb[140].mxu1 %v5674_v48  ;;  %v4476_v48 = vld [vmem:[#allocation6 + $0xa8] sm:$0xff]  }
 0x33d   :  { %2472 = vmatprep.mubr.bf16.mxu1 %v4750_v0  ;;  %4020 = vmatpush3.bf16.msra.mxu1 %v4476_v48 }
 0x344   :  { %2473 = vmatmul.mubr.bf16.gmra.mrb[144].mxu1 %v5714_v28  ;;  %v4477_v28 = vld [vmem:[#allocation6 + $0xf0] sm:$0xff]  }
 0x345   :  { %2482 = vmatprep.mubr.bf16.mxu1 %v4750_v0  ;;  %4021 = vmatprep.subr.bf16.mxu1 %v4477_v28 }
 0x34c   :  { %2483 = vmatmul.mubr.bf16.gmra.mrb[148].mxu1 %v5754_v45  ;;  %v4478_v45 = vld [vmem:[#allocation6 + $0xb0] sm:$0xff]  }
 0x34d   :  { %2492 = vmatprep.mubr.bf16.mxu1 %v4750_v0  ;;  %4022 = vmatpush3.bf16.msra.mxu1 %v4478_v45 }
 0x354   :  { %2493 = vmatmul.mubr.bf16.gmra.mrb[152].mxu1 %v5794_v18  ;;  %v6111_v18 = vld [vmem:[%s6538_s7] sm:$0xf] }
 0x355   :  { %2502 = vmatprep.mubr.bf16.mxu1 %v4750_v0 }
 0x35c   :  { %2503 = vmatmul.mubr.bf16.gmra.mrb[156].mxu1 %v5834_v43  ;;  %v6116_v43 = vrot.slane %v6111_v18, %v5126_v53 }
 0x35d   :  { %2512 = vmatprep.mubr.bf16.mxu1 %v4750_v0 }
 0x364   :  { %2513 = vmatmul.mubr.bf16.gmra.mrb[160].mxu1 %v5874_v40  ;;  %v6120_v40 = vrot.slane %v6111_v18, %v5132_v55 }
 0x365   :  { %2522 = vmatprep.mubr.bf16.mxu1 %v4750_v0 }
 0x36c   :  { %2523 = vmatmul.mubr.bf16.gmra.mrb[164].mxu1 %v5914_v3  ;;  %v4479_v3 = vld [vmem:[#allocation6 + $0xf8] sm:$0xff]  }
 0x36d   :  { %2532 = vmatprep.mubr.bf16.mxu1 %v4750_v0  ;;  %4023 = vmatprep.subr.bf16.mxu1 %v4479_v3 }
 0x36e   :  { %4024 = vmatpush3.bf16.msra.mxu1 %v4480_v16 }
 0x374   :  { %2533 = vmatmul.mubr.bf16.gmra.mrb[168].mxu1 %v5954_v47 }
 0x375   :  { %2542 = vmatprep.mubr.bf16.mxu1 %v4750_v0 }
 0x377   :  { %v2241_v2 = vpop.f32.mrb[64].mxu1 }
 0x378   :  { %v2242_v37 = vadd.f32 %v2241_v2, %v6116_v43  ;;  %v2243_v51 = vpop.f32.mrb[65].mxu1 }
 0x379   :  { %v2244_v33 = vadd.f32 %v2243_v51, %v6120_v40  ;;  %v2245_v47 = vpop.f32.mrb[66].mxu1 }
 0x37a   :  { %v2246_v53 = vadd.f32 %v2245_v47, %v6116_v43  ;;  %v2247_v8 = vpop.f32.mrb[67].mxu1  ;;  %v2593_v55 = vmax.f32 %v2242_v37, 0.0 }
 0x37b   :  { %v2248_v57 = vadd.f32 %v2247_v8, %v6120_v40  ;;  %v2594_v32 = vmax.f32 %v2244_v33, 0.0 }
 0x37c   :  { %v2597_v9 = vmax.f32 %v2246_v53, 0.0  ;;  %2543 = vmatmul.mubr.bf16.gmra.mrb[172].mxu1 %v5994_v14 }
 0x37d   :  { %v2598_v34 = vmax.f32 %v2248_v57, 0.0  ;;  %2552 = vmatprep.mubr.bf16.mxu1 %v4750_v0 }
 0x37e   :  { %v2721_v12 = vpack.c.bf16 %v2597_v9, %v2593_v55 }
 0x37f   :  { %v2722_v17 = vpack.c.bf16 %v2598_v34, %v2594_v32  ;;  %v2251_v20 = vpop.f32.mrb[68].mxu1 }
 0x380   :  { %v2252_v21 = vadd.f32 %v2251_v20, %v6116_v43  ;;  %v2253_v6 = vpop.f32.mrb[69].mxu1 }
 0x381   :  { %v2254_v23 = vadd.f32 %v2253_v6, %v6120_v40  ;;  %v2255_v7 = vpop.f32.mrb[70].mxu1  ;;  %3080 = vmatprep.mubr.bf16.mxu0 %v2722_v17 }
 0x382   :  { %v2256_v24 = vadd.f32 %v2255_v7, %v6116_v43  ;;  %v2257_v26 = vpop.f32.mrb[71].mxu1  ;;  %3081 = vmatmul.mubr.bf16.vlgmr.msra.gmra.mrb[128].mxu0 %v2721_v12  ;;  %v2601_v44 = vmax.f32 %v2252_v21, 0.0 }
 0x383   :  { %v2258_v14 = vadd.f32 %v2257_v26, %v6120_v40  ;;  %v2602_v4 = vmax.f32 %v2254_v23, 0.0 }
 0x384   :  { %v2605_v60 = vmax.f32 %v2256_v24, 0.0  ;;  %2553 = vmatmul.mubr.bf16.gmra.mrb[176].mxu1 %v6032_v1 }
 0x385   :  { %v2606_v15 = vmax.f32 %v2258_v14, 0.0  ;;  %2562 = vmatprep.mubr.bf16.mxu1 %v4750_v0 }
 0x386   :  { %v2725_v41 = vpack.c.bf16 %v2605_v60, %v2601_v44 }
 0x387   :  { %v2726_v13 = vpack.c.bf16 %v2606_v15, %v2602_v4  ;;  %v2261_v29 = vpop.f32.mrb[72].mxu1 }
 0x388   :  { %v2262_v61 = vadd.f32 %v2261_v29, %v6116_v43  ;;  %v2263_v36 = vpop.f32.mrb[73].mxu1 }
 0x389   :  { %v2264_v46 = vadd.f32 %v2263_v36, %v6120_v40  ;;  %v2265_v11 = vpop.f32.mrb[74].mxu1  ;;  %3088 = vmatprep.mubr.bf16.mxu0 %v2726_v13 }
 0x38a   :  { %v2266_v22 = vadd.f32 %v2265_v11, %v6116_v43  ;;  %v2267_v54 = vpop.f32.mrb[75].mxu1  ;;  %3089 = vmatmul.mubr.bf16.gmra.mrb[132].mxu0 %v2725_v41  ;;  %v2609_v63 = vmax.f32 %v2262_v61, 0.0 }
 0x38b   :  { %v2268_v1 = vadd.f32 %v2267_v54, %v6120_v40  ;;  %v2610_v59 = vmax.f32 %v2264_v46, 0.0 }
 0x38c   :  { %v2613_v30 = vmax.f32 %v2266_v22, 0.0  ;;  %2563 = vmatmul.mubr.bf16.gmra.mrb[180].mxu1 %v6065_v56 }
 0x38d   :  { %v2614_v49 = vmax.f32 %v2268_v1, 0.0  ;;  %2572 = vmatprep.mubr.bf16.mxu1 %v4750_v0 }
 0x38e   :  { %v2729_v19 = vpack.c.bf16 %v2613_v30, %v2609_v63 }
 0x38f   :  { %v2730_v5 = vpack.c.bf16 %v2614_v49, %v2610_v59  ;;  %v2271_v42 = vpop.f32.mrb[76].mxu1 }
 0x390   :  { %v2272_v31 = vadd.f32 %v2271_v42, %v6116_v43  ;;  %v2273_v58 = vpop.f32.mrb[77].mxu1 }
 0x391   :  { %v2274_v39 = vadd.f32 %v2273_v58, %v6120_v40  ;;  %v2275_v62 = vpop.f32.mrb[78].mxu1  ;;  %3096 = vmatprep.mubr.bf16.mxu0 %v2730_v5 }
 0x392   :  { %v2276_v38 = vadd.f32 %v2275_v62, %v6116_v43  ;;  %v2277_v50 = vpop.f32.mrb[79].mxu1  ;;  %3097 = vmatmul.mubr.bf16.gmra.mrb[136].mxu0 %v2729_v19  ;;  %v2617_v48 = vmax.f32 %v2272_v31, 0.0 }
 0x393   :  { %v2278_v56 = vadd.f32 %v2277_v50, %v6120_v40  ;;  %v2618_v45 = vmax.f32 %v2274_v39, 0.0 }
 0x394   :  { %v2621_v28 = vmax.f32 %v2276_v38, 0.0  ;;  %2573 = vmatmul.mubr.bf16.gmra.mrb[184].mxu1 %v6079_v10 }
 0x395   :  { %v2622_v3 = vmax.f32 %v2278_v56, 0.0  ;;  %2582 = vmatprep.mubr.bf16.mxu1 %v4750_v0 }
 0x396   :  { %v2733_v2 = vpack.c.bf16 %v2621_v28, %v2617_v48 }
 0x397   :  { %v2734_v16 = vpack.c.bf16 %v2622_v3, %v2618_v45  ;;  %v2281_v37 = vpop.f32.mrb[80].mxu1 }
 0x398   :  { %v2282_v51 = vadd.f32 %v2281_v37, %v6116_v43  ;;  %v2283_v33 = vpop.f32.mrb[81].mxu1 }
 0x399   :  { %v2284_v47 = vadd.f32 %v2283_v33, %v6120_v40  ;;  %v2285_v53 = vpop.f32.mrb[82].mxu1  ;;  %3104 = vmatprep.mubr.bf16.mxu0 %v2734_v16 }
 0x39a   :  { %v2286_v8 = vadd.f32 %v2285_v53, %v6116_v43  ;;  %v2287_v57 = vpop.f32.mrb[83].mxu1  ;;  %3105 = vmatmul.mubr.bf16.gmra.mrb[140].mxu0 %v2733_v2  ;;  %v2625_v55 = vmax.f32 %v2282_v51, 0.0 }
 0x39b   :  { %v2288_v10 = vadd.f32 %v2287_v57, %v6120_v40  ;;  %v2626_v0 = vmax.f32 %v2284_v47, 0.0 }
 0x39c   :  { %v2629_v9 = vmax.f32 %v2286_v8, 0.0  ;;  %2583 = vmatmul.mubr.bf16.gmra.mrb[188].mxu1 %v6084_v35 }
 0x39d   :  { %v2630_v32 = vmax.f32 %v2288_v10, 0.0 }
 0x39e   :  { %v2737_v34 = vpack.c.bf16 %v2629_v9, %v2625_v55 }
 0x39f   :  { %v2738_v12 = vpack.c.bf16 %v2630_v32, %v2626_v0  ;;  %v2291_v17 = vpop.f32.mrb[84].mxu1 }
 0x3a0   :  { %v2292_v20 = vadd.f32 %v2291_v17, %v6116_v43  ;;  %v2293_v21 = vpop.f32.mrb[85].mxu1 }
 0x3a1   :  { %v2294_v6 = vadd.f32 %v2293_v21, %v6120_v40  ;;  %v2295_v23 = vpop.f32.mrb[86].mxu1  ;;  %3112 = vmatprep.mubr.bf16.mxu0 %v2738_v12 }
 0x3a2   :  { %v2296_v7 = vadd.f32 %v2295_v23, %v6116_v43  ;;  %v2297_v24 = vpop.f32.mrb[87].mxu1  ;;  %3113 = vmatmul.mubr.bf16.gmra.mrb[144].mxu0 %v2737_v34  ;;  %v2633_v14 = vmax.f32 %v2292_v20, 0.0 }
 0x3a3   :  { %v2298_v26 = vadd.f32 %v2297_v24, %v6120_v40  ;;  %v2634_v44 = vmax.f32 %v2294_v6, 0.0 }
 0x3a4   :  { %v2637_v35 = vmax.f32 %v2296_v7, 0.0 }
 0x3a5   :  { %v2638_v60 = vmax.f32 %v2298_v26, 0.0 }
 0x3a6   :  { %v2741_v4 = vpack.c.bf16 %v2637_v35, %v2633_v14 }
 0x3a7   :  { %v2742_v15 = vpack.c.bf16 %v2638_v60, %v2634_v44  ;;  %v2301_v41 = vpop.f32.mrb[88].mxu1 }
 0x3a8   :  { %v2302_v13 = vadd.f32 %v2301_v41, %v6116_v43  ;;  %v2303_v29 = vpop.f32.mrb[89].mxu1 }
 0x3a9   :  { %v2304_v61 = vadd.f32 %v2303_v29, %v6120_v40  ;;  %v2305_v36 = vpop.f32.mrb[90].mxu1  ;;  %3120 = vmatprep.mubr.bf16.mxu0 %v2742_v15 }
 0x3aa   :  { %v2306_v46 = vadd.f32 %v2305_v36, %v6116_v43  ;;  %v2307_v11 = vpop.f32.mrb[91].mxu1  ;;  %3121 = vmatmul.mubr.bf16.gmra.mrb[148].mxu0 %v2741_v4  ;;  %v2641_v54 = vmax.f32 %v2302_v13, 0.0 }
 0x3ab   :  { %v2308_v22 = vadd.f32 %v2307_v11, %v6120_v40  ;;  %v2642_v63 = vmax.f32 %v2304_v61, 0.0 }
 0x3ac   :  { %v2645_v1 = vmax.f32 %v2306_v46, 0.0 }
 0x3ad   :  { %v2646_v30 = vmax.f32 %v2308_v22, 0.0 }
 0x3ae   :  { %v2745_v59 = vpack.c.bf16 %v2645_v1, %v2641_v54 }
 0x3af   :  { %v2746_v49 = vpack.c.bf16 %v2646_v30, %v2642_v63  ;;  %v2311_v19 = vpop.f32.mrb[92].mxu1 }
 0x3b0   :  { %v2312_v5 = vadd.f32 %v2311_v19, %v6116_v43  ;;  %v2313_v42 = vpop.f32.mrb[93].mxu1 }
 0x3b1   :  { %v2314_v31 = vadd.f32 %v2313_v42, %v6120_v40  ;;  %v2315_v58 = vpop.f32.mrb[94].mxu1  ;;  %3128 = vmatprep.mubr.bf16.mxu0 %v2746_v49 }
 0x3b2   :  { %v2316_v39 = vadd.f32 %v2315_v58, %v6116_v43  ;;  %v2317_v62 = vpop.f32.mrb[95].mxu1  ;;  %3129 = vmatmul.mubr.bf16.gmra.mrb[152].mxu0 %v2745_v59  ;;  %v2649_v50 = vmax.f32 %v2312_v5, 0.0 }
 0x3b3   :  { %v2318_v38 = vadd.f32 %v2317_v62, %v6120_v40  ;;  %v2650_v48 = vmax.f32 %v2314_v31, 0.0 }
 0x3b4   :  { %v2653_v56 = vmax.f32 %v2316_v39, 0.0 }
 0x3b5   :  { %v2654_v28 = vmax.f32 %v2318_v38, 0.0 }
 0x3b6   :  { %v2749_v45 = vpack.c.bf16 %v2653_v56, %v2649_v50 }
 0x3b7   :  { %v2750_v3 = vpack.c.bf16 %v2654_v28, %v2650_v48  ;;  %v2321_v2 = vpop.f32.mrb[96].mxu1 }
 0x3b8   :  { %v2322_v16 = vadd.f32 %v2321_v2, %v6116_v43  ;;  %v2323_v37 = vpop.f32.mrb[97].mxu1 }
 0x3b9   :  { %v2324_v51 = vadd.f32 %v2323_v37, %v6120_v40  ;;  %v2325_v33 = vpop.f32.mrb[98].mxu1  ;;  %3136 = vmatprep.mubr.bf16.mxu0 %v2750_v3 }
 0x3ba   :  { %v2326_v47 = vadd.f32 %v2325_v33, %v6116_v43  ;;  %v2327_v53 = vpop.f32.mrb[99].mxu1  ;;  %3137 = vmatmul.mubr.bf16.gmra.mrb[156].mxu0 %v2749_v45  ;;  %v2657_v57 = vmax.f32 %v2322_v16, 0.0 }
 0x3bb   :  { %v2328_v8 = vadd.f32 %v2327_v53, %v6120_v40  ;;  %v2658_v55 = vmax.f32 %v2324_v51, 0.0 }
 0x3bc   :  { %v2661_v10 = vmax.f32 %v2326_v47, 0.0 }
 0x3bd   :  { %v2662_v9 = vmax.f32 %v2328_v8, 0.0 }
 0x3be   :  { %v2753_v0 = vpack.c.bf16 %v2661_v10, %v2657_v57 }
 0x3bf   :  { %v2754_v32 = vpack.c.bf16 %v2662_v9, %v2658_v55  ;;  %v2331_v34 = vpop.f32.mrb[100].mxu1 }
 0x3c0   :  { %v2332_v12 = vadd.f32 %v2331_v34, %v6116_v43  ;;  %v2333_v17 = vpop.f32.mrb[101].mxu1 }
 0x3c1   :  { %v2334_v20 = vadd.f32 %v2333_v17, %v6120_v40  ;;  %v2335_v21 = vpop.f32.mrb[102].mxu1  ;;  %3144 = vmatprep.mubr.bf16.mxu0 %v2754_v32 }
 0x3c2   :  { %v2336_v6 = vadd.f32 %v2335_v21, %v6116_v43  ;;  %v2337_v23 = vpop.f32.mrb[103].mxu1  ;;  %3145 = vmatmul.mubr.bf16.gmra.mrb[160].mxu0 %v2753_v0  ;;  %v2665_v24 = vmax.f32 %v2332_v12, 0.0 }
 0x3c3   :  { %v2338_v7 = vadd.f32 %v2337_v23, %v6120_v40  ;;  %v2666_v14 = vmax.f32 %v2334_v20, 0.0 }
 0x3c4   :  { %v2669_v26 = vmax.f32 %v2336_v6, 0.0 }
 0x3c5   :  { %v2670_v35 = vmax.f32 %v2338_v7, 0.0 }
 0x3c6   :  { %v2757_v44 = vpack.c.bf16 %v2669_v26, %v2665_v24 }
 0x3c7   :  { %v2758_v60 = vpack.c.bf16 %v2670_v35, %v2666_v14  ;;  %v2341_v4 = vpop.f32.mrb[104].mxu1 }
 0x3c8   :  { %v2342_v15 = vadd.f32 %v2341_v4, %v6116_v43  ;;  %v2343_v41 = vpop.f32.mrb[105].mxu1 }
 0x3c9   :  { %v2344_v13 = vadd.f32 %v2343_v41, %v6120_v40  ;;  %v2345_v29 = vpop.f32.mrb[106].mxu1  ;;  %3152 = vmatprep.mubr.bf16.mxu0 %v2758_v60 }
 0x3ca   :  { %v2346_v61 = vadd.f32 %v2345_v29, %v6116_v43  ;;  %v2347_v36 = vpop.f32.mrb[107].mxu1  ;;  %3153 = vmatmul.mubr.bf16.gmra.mrb[164].mxu0 %v2757_v44  ;;  %v2673_v11 = vmax.f32 %v2342_v15, 0.0 }
 0x3cb   :  { %v2348_v46 = vadd.f32 %v2347_v36, %v6120_v40  ;;  %v2674_v54 = vmax.f32 %v2344_v13, 0.0 }
 0x3cc   :  { %v2677_v22 = vmax.f32 %v2346_v61, 0.0 }
 0x3cd   :  { %v2678_v1 = vmax.f32 %v2348_v46, 0.0 }
 0x3ce   :  { %v2761_v63 = vpack.c.bf16 %v2677_v22, %v2673_v11 }
 0x3cf   :  { %v2762_v30 = vpack.c.bf16 %v2678_v1, %v2674_v54  ;;  %v2351_v59 = vpop.f32.mrb[108].mxu1 }
 0x3d0   :  { %v2352_v49 = vadd.f32 %v2351_v59, %v6116_v43  ;;  %v2353_v19 = vpop.f32.mrb[109].mxu1 }
 0x3d1   :  { %v2354_v5 = vadd.f32 %v2353_v19, %v6120_v40  ;;  %v2355_v42 = vpop.f32.mrb[110].mxu1  ;;  %3160 = vmatprep.mubr.bf16.mxu0 %v2762_v30 }
 0x3d2   :  { %v2356_v31 = vadd.f32 %v2355_v42, %v6116_v43  ;;  %v2357_v58 = vpop.f32.mrb[111].mxu1  ;;  %3161 = vmatmul.mubr.bf16.gmra.mrb[168].mxu0 %v2761_v63  ;;  %v2681_v62 = vmax.f32 %v2352_v49, 0.0 }
 0x3d3   :  { %v2358_v39 = vadd.f32 %v2357_v58, %v6120_v40  ;;  %v2682_v50 = vmax.f32 %v2354_v5, 0.0 }
 0x3d4   :  { %v2685_v38 = vmax.f32 %v2356_v31, 0.0 }
 0x3d5   :  { %v2686_v56 = vmax.f32 %v2358_v39, 0.0 }
 0x3d6   :  { %v2765_v48 = vpack.c.bf16 %v2685_v38, %v2681_v62  ;;  %v6199_v62 = vrot.slane %v6111_v18, %v287_v25 }
 0x3d7   :  { %v2766_v28 = vpack.c.bf16 %v2686_v56, %v2682_v50  ;;  %v2361_v45 = vpop.f32.mrb[112].mxu1  ;;  %v6204_v56 = vrot.slane %v6111_v18, %v291_v27 }
 0x3d8   :  { %v2362_v3 = vadd.f32 %v2361_v45, %v6116_v43  ;;  %v2363_v2 = vpop.f32.mrb[113].mxu1 }
 0x3d9   :  { %v2364_v16 = vadd.f32 %v2363_v2, %v6120_v40  ;;  %v2365_v37 = vpop.f32.mrb[114].mxu1  ;;  %3168 = vmatprep.mubr.bf16.mxu0 %v2766_v28 }
 0x3da   :  { %v2366_v51 = vadd.f32 %v2365_v37, %v6116_v43  ;;  %v2367_v33 = vpop.f32.mrb[115].mxu1  ;;  %3169 = vmatmul.mubr.bf16.gmra.mrb[172].mxu0 %v2765_v48  ;;  %v2689_v53 = vmax.f32 %v2362_v3, 0.0 }
 0x3db   :  { %v2368_v47 = vadd.f32 %v2367_v33, %v6120_v40  ;;  %v2690_v57 = vmax.f32 %v2364_v16, 0.0 }
 0x3dc   :  { %v2693_v8 = vmax.f32 %v2366_v51, 0.0 }
 0x3dd   :  { %v2694_v10 = vmax.f32 %v2368_v47, 0.0 }
 0x3de   :  { %v2769_v55 = vpack.c.bf16 %v2693_v8, %v2689_v53 }
 0x3df   :  { %v2770_v9 = vpack.c.bf16 %v2694_v10, %v2690_v57  ;;  %v2371_v0 = vpop.f32.mrb[116].mxu1 }
 0x3e0   :  { %v2372_v32 = vadd.f32 %v2371_v0, %v6116_v43  ;;  %v2373_v34 = vpop.f32.mrb[117].mxu1 }
 0x3e1   :  { %v2374_v12 = vadd.f32 %v2373_v34, %v6120_v40  ;;  %v2375_v17 = vpop.f32.mrb[118].mxu1  ;;  %3176 = vmatprep.mubr.bf16.mxu0 %v2770_v9 }
 0x3e2   :  { %v2376_v20 = vadd.f32 %v2375_v17, %v6116_v43  ;;  %v2377_v21 = vpop.f32.mrb[119].mxu1  ;;  %3177 = vmatmul.mubr.bf16.gmra.mrb[176].mxu0 %v2769_v55  ;;  %v2697_v23 = vmax.f32 %v2372_v32, 0.0 }
 0x3e3   :  { %v2378_v6 = vadd.f32 %v2377_v21, %v6120_v40  ;;  %v2698_v24 = vmax.f32 %v2374_v12, 0.0 }
 0x3e4   :  { %v2701_v7 = vmax.f32 %v2376_v20, 0.0 }
 0x3e5   :  { %v2702_v26 = vmax.f32 %v2378_v6, 0.0 }
 0x3e6   :  { %v2773_v14 = vpack.c.bf16 %v2701_v7, %v2697_v23 }
 0x3e7   :  { %v2774_v35 = vpack.c.bf16 %v2702_v26, %v2698_v24  ;;  %v2381_v44 = vpop.f32.mrb[120].mxu1 }
 0x3e8   :  { %v2382_v60 = vadd.f32 %v2381_v44, %v6116_v43  ;;  %v2383_v4 = vpop.f32.mrb[121].mxu1 }
 0x3e9   :  { %v2384_v15 = vadd.f32 %v2383_v4, %v6120_v40  ;;  %v2385_v41 = vpop.f32.mrb[122].mxu1  ;;  %3184 = vmatprep.mubr.bf16.mxu0 %v2774_v35 }
 0x3ea   :  { %v2386_v13 = vadd.f32 %v2385_v41, %v6116_v43  ;;  %v2387_v29 = vpop.f32.mrb[123].mxu1  ;;  %3185 = vmatmul.mubr.bf16.gmra.mrb[180].mxu0 %v2773_v14  ;;  %v2705_v36 = vmax.f32 %v2382_v60, 0.0 }
 0x3eb   :  { %v2388_v61 = vadd.f32 %v2387_v29, %v6120_v40  ;;  %v2706_v11 = vmax.f32 %v2384_v15, 0.0 }
 0x3ec   :  { %v2709_v46 = vmax.f32 %v2386_v13, 0.0 }
 0x3ed   :  { %v2710_v22 = vmax.f32 %v2388_v61, 0.0 }
 0x3ee   :  { %v2777_v54 = vpack.c.bf16 %v2709_v46, %v2705_v36 }
 0x3ef   :  { %v2778_v1 = vpack.c.bf16 %v2710_v22, %v2706_v11  ;;  %v2391_v63 = vpop.f32.mrb[124].mxu1 }
 0x3f0   :  { %v2392_v30 = vadd.f32 %v2391_v63, %v6116_v43  ;;  %v2393_v59 = vpop.f32.mrb[125].mxu1 }
 0x3f1   :  { %v2394_v49 = vadd.f32 %v2393_v59, %v6120_v40  ;;  %v2395_v19 = vpop.f32.mrb[126].mxu1  ;;  %3192 = vmatprep.mubr.bf16.mxu0 %v2778_v1 }
 0x3f2   :  { %v2396_v5 = vadd.f32 %v2395_v19, %v6116_v43  ;;  %v2397_v42 = vpop.f32.mrb[127].mxu1  ;;  %3193 = vmatmul.mubr.bf16.gmra.mrb[184].mxu0 %v2777_v54  ;;  %v2713_v58 = vmax.f32 %v2392_v30, 0.0 }
 0x3f3   :  { %v2398_v31 = vadd.f32 %v2397_v42, %v6120_v40  ;;  %v2714_v38 = vmax.f32 %v2394_v49, 0.0 }
 0x3f4   :  { %v2717_v39 = vmax.f32 %v2396_v5, 0.0 }
 0x3f5   :  { %v2718_v50 = vmax.f32 %v2398_v31, 0.0 }
 0x3f6   :  { %v2781_v48 = vpack.c.bf16 %v2717_v39, %v2713_v58 }
 0x3f7   :  { %v2782_v43 = vpack.c.bf16 %v2718_v50, %v2714_v38  ;;  %v2434_v28 = vpop.f32.mrb[128].mxu1 }
 0x3f8   :  { %v2435_v45 = vadd.f32 %v2434_v28, %v6199_v62  ;;  %v2436_v40 = vpop.f32.mrb[129].mxu1 }
 0x3f9   :  { %v2437_v3 = vadd.f32 %v2436_v40, %v6204_v56  ;;  %v2438_v2 = vpop.f32.mrb[130].mxu1  ;;  %3200 = vmatprep.mubr.bf16.mxu0 %v2782_v43 }
 0x3fa   :  { %v2439_v25 = vadd.f32 %v2438_v2, %v6199_v62  ;;  %v2440_v16 = vpop.f32.mrb[131].mxu1  ;;  %3201 = vmatmul.mubr.bf16.gmra.mrb[188].mxu0 %v2781_v48  ;;  %v2595_v52 = vmax.f32 %v2435_v45, 0.0 }
 0x3fb   :  { %v2441_v37 = vadd.f32 %v2440_v16, %v6204_v56  ;;  %v2596_v27 = vmax.f32 %v2437_v3, 0.0 }
 0x3fc   :  { %v2599_v51 = vmax.f32 %v2439_v25, 0.0 }
 0x3fd   :  { %v2600_v18 = vmax.f32 %v2441_v37, 0.0 }
 0x3fe   :  { %v2723_v33 = vpack.c.bf16 %v2599_v51, %v2595_v52 }
 0x3ff   :  { %v2724_v47 = vpack.c.bf16 %v2600_v18, %v2596_v27  ;;  %v2444_v53 = vpop.f32.mrb[132].mxu1 }
 0x400   :  { %v2445_v8 = vadd.f32 %v2444_v53, %v6199_v62  ;;  %v2446_v57 = vpop.f32.mrb[133].mxu1 }
 0x401   :  { %v2447_v10 = vadd.f32 %v2446_v57, %v6204_v56  ;;  %v2448_v55 = vpop.f32.mrb[134].mxu1  ;;  %3241 = vmatprep.mubr.bf16.mxu1 %v2724_v47 }
 0x402   :  { %v2449_v9 = vadd.f32 %v2448_v55, %v6199_v62  ;;  %v2450_v0 = vpop.f32.mrb[135].mxu1  ;;  %3242 = vmatmul.mubr.bf16.vlgmr.msra.gmra.mrb[192].mxu1 %v2723_v33  ;;  %v2603_v34 = vmax.f32 %v2445_v8, 0.0 }
 0x403   :  { %v2451_v32 = vadd.f32 %v2450_v0, %v6204_v56  ;;  %v2604_v17 = vmax.f32 %v2447_v10, 0.0 }
 0x404   :  { %v2607_v12 = vmax.f32 %v2449_v9, 0.0 }
 0x405   :  { %v2608_v20 = vmax.f32 %v2451_v32, 0.0 }
 0x406   :  { %v2727_v21 = vpack.c.bf16 %v2607_v12, %v2603_v34 }
 0x407   :  { %v2728_v6 = vpack.c.bf16 %v2608_v20, %v2604_v17  ;;  %v2454_v23 = vpop.f32.mrb[136].mxu1 }
 0x408   :  { %v2455_v7 = vadd.f32 %v2454_v23, %v6199_v62  ;;  %v2456_v24 = vpop.f32.mrb[137].mxu1 }
 0x409   :  { %v2457_v26 = vadd.f32 %v2456_v24, %v6204_v56  ;;  %v2458_v14 = vpop.f32.mrb[138].mxu1  ;;  %3249 = vmatprep.mubr.bf16.mxu1 %v2728_v6 }
 0x40a   :  { %v2459_v35 = vadd.f32 %v2458_v14, %v6199_v62  ;;  %v2460_v44 = vpop.f32.mrb[139].mxu1  ;;  %3250 = vmatmul.mubr.bf16.gmra.mrb[196].mxu1 %v2727_v21  ;;  %v2611_v4 = vmax.f32 %v2455_v7, 0.0 }
 0x40b   :  { %v2461_v60 = vadd.f32 %v2460_v44, %v6204_v56  ;;  %v2612_v41 = vmax.f32 %v2457_v26, 0.0 }
 0x40c   :  { %v2615_v15 = vmax.f32 %v2459_v35, 0.0 }
 0x40d   :  { %v2616_v13 = vmax.f32 %v2461_v60, 0.0 }
 0x40e   :  { %v2731_v29 = vpack.c.bf16 %v2615_v15, %v2611_v4 }
 0x40f   :  { %v2732_v61 = vpack.c.bf16 %v2616_v13, %v2612_v41  ;;  %v2464_v36 = vpop.f32.mrb[140].mxu1 }
 0x410   :  { %v2465_v46 = vadd.f32 %v2464_v36, %v6199_v62  ;;  %v2466_v11 = vpop.f32.mrb[141].mxu1 }
 0x411   :  { %v2467_v22 = vadd.f32 %v2466_v11, %v6204_v56  ;;  %v2468_v54 = vpop.f32.mrb[142].mxu1  ;;  %3257 = vmatprep.mubr.bf16.mxu1 %v2732_v61 }
 0x412   :  { %v2469_v1 = vadd.f32 %v2468_v54, %v6199_v62  ;;  %v2470_v63 = vpop.f32.mrb[143].mxu1  ;;  %3258 = vmatmul.mubr.bf16.gmra.mrb[200].mxu1 %v2731_v29  ;;  %v2619_v59 = vmax.f32 %v2465_v46, 0.0 }
 0x413   :  { %v2471_v30 = vadd.f32 %v2470_v63, %v6204_v56  ;;  %v2620_v19 = vmax.f32 %v2467_v22, 0.0 }
 0x414   :  { %v2623_v49 = vmax.f32 %v2469_v1, 0.0 }
 0x415   :  { %v2624_v5 = vmax.f32 %v2471_v30, 0.0 }
 0x416   :  { %v2735_v42 = vpack.c.bf16 %v2623_v49, %v2619_v59 }
 0x417   :  { %v2736_v31 = vpack.c.bf16 %v2624_v5, %v2620_v19  ;;  %v2474_v58 = vpop.f32.mrb[144].mxu1 }
 0x418   :  { %v2475_v39 = vadd.f32 %v2474_v58, %v6199_v62  ;;  %v2476_v38 = vpop.f32.mrb[145].mxu1 }
 0x419   :  { %v2477_v50 = vadd.f32 %v2476_v38, %v6204_v56  ;;  %v2478_v48 = vpop.f32.mrb[146].mxu1  ;;  %3265 = vmatprep.mubr.bf16.mxu1 %v2736_v31 }
 0x41a   :  { %v2479_v43 = vadd.f32 %v2478_v48, %v6199_v62  ;;  %v2480_v28 = vpop.f32.mrb[147].mxu1  ;;  %3266 = vmatmul.mubr.bf16.gmra.mrb[204].mxu1 %v2735_v42  ;;  %v2627_v40 = vmax.f32 %v2475_v39, 0.0 }
 0x41b   :  { %v2481_v45 = vadd.f32 %v2480_v28, %v6204_v56  ;;  %v2628_v2 = vmax.f32 %v2477_v50, 0.0 }
 0x41c   :  { %v2631_v3 = vmax.f32 %v2479_v43, 0.0 }
 0x41d   :  { %v2632_v25 = vmax.f32 %v2481_v45, 0.0 }
 0x41e   :  { %v2739_v16 = vpack.c.bf16 %v2631_v3, %v2627_v40 }
 0x41f   :  { %v2740_v37 = vpack.c.bf16 %v2632_v25, %v2628_v2  ;;  %v2484_v52 = vpop.f32.mrb[148].mxu1 }
 0x420   :  { %v2485_v51 = vadd.f32 %v2484_v52, %v6199_v62  ;;  %v2486_v27 = vpop.f32.mrb[149].mxu1 }
 0x421   :  { %v2487_v18 = vadd.f32 %v2486_v27, %v6204_v56  ;;  %v2488_v33 = vpop.f32.mrb[150].mxu1  ;;  %3273 = vmatprep.mubr.bf16.mxu1 %v2740_v37 }
 0x422   :  { %v2489_v47 = vadd.f32 %v2488_v33, %v6199_v62  ;;  %v2490_v53 = vpop.f32.mrb[151].mxu1  ;;  %3274 = vmatmul.mubr.bf16.gmra.mrb[208].mxu1 %v2739_v16  ;;  %v2635_v57 = vmax.f32 %v2485_v51, 0.0 }
 0x423   :  { %v2491_v8 = vadd.f32 %v2490_v53, %v6204_v56  ;;  %v2636_v55 = vmax.f32 %v2487_v18, 0.0 }
 0x424   :  { %v2639_v10 = vmax.f32 %v2489_v47, 0.0 }
 0x425   :  { %v2640_v9 = vmax.f32 %v2491_v8, 0.0 }
 0x426   :  { %v2743_v0 = vpack.c.bf16 %v2639_v10, %v2635_v57 }
 0x427   :  { %v2744_v32 = vpack.c.bf16 %v2640_v9, %v2636_v55  ;;  %v2494_v34 = vpop.f32.mrb[152].mxu1 }
 0x428   :  { %v2495_v12 = vadd.f32 %v2494_v34, %v6199_v62  ;;  %v2496_v17 = vpop.f32.mrb[153].mxu1 }
 0x429   :  { %v2497_v20 = vadd.f32 %v2496_v17, %v6204_v56  ;;  %v2498_v21 = vpop.f32.mrb[154].mxu1  ;;  %3281 = vmatprep.mubr.bf16.mxu1 %v2744_v32 }
 0x42a   :  { %v2499_v6 = vadd.f32 %v2498_v21, %v6199_v62  ;;  %v2500_v23 = vpop.f32.mrb[155].mxu1  ;;  %3282 = vmatmul.mubr.bf16.gmra.mrb[212].mxu1 %v2743_v0  ;;  %v2643_v24 = vmax.f32 %v2495_v12, 0.0 }
 0x42b   :  { %v2501_v7 = vadd.f32 %v2500_v23, %v6204_v56  ;;  %v2644_v14 = vmax.f32 %v2497_v20, 0.0 }
 0x42c   :  { %v2647_v26 = vmax.f32 %v2499_v6, 0.0 }
 0x42d   :  { %v2648_v35 = vmax.f32 %v2501_v7, 0.0 }
 0x42e   :  { %v2747_v44 = vpack.c.bf16 %v2647_v26, %v2643_v24 }
 0x42f   :  { %v2748_v60 = vpack.c.bf16 %v2648_v35, %v2644_v14  ;;  %v2504_v4 = vpop.f32.mrb[156].mxu1 }
 0x430   :  { %v2505_v15 = vadd.f32 %v2504_v4, %v6199_v62  ;;  %v2506_v41 = vpop.f32.mrb[157].mxu1 }
 0x431   :  { %v2507_v13 = vadd.f32 %v2506_v41, %v6204_v56  ;;  %v2508_v29 = vpop.f32.mrb[158].mxu1  ;;  %3289 = vmatprep.mubr.bf16.mxu1 %v2748_v60 }
 0x432   :  { %v2509_v61 = vadd.f32 %v2508_v29, %v6199_v62  ;;  %v2510_v36 = vpop.f32.mrb[159].mxu1  ;;  %3290 = vmatmul.mubr.bf16.gmra.mrb[216].mxu1 %v2747_v44  ;;  %v2651_v11 = vmax.f32 %v2505_v15, 0.0 }
 0x433   :  { %v2511_v46 = vadd.f32 %v2510_v36, %v6204_v56  ;;  %v2652_v54 = vmax.f32 %v2507_v13, 0.0 }
 0x434   :  { %v2655_v22 = vmax.f32 %v2509_v61, 0.0 }
 0x435   :  { %v2656_v1 = vmax.f32 %v2511_v46, 0.0 }
 0x436   :  { %v2751_v63 = vpack.c.bf16 %v2655_v22, %v2651_v11 }
 0x437   :  { %v2752_v30 = vpack.c.bf16 %v2656_v1, %v2652_v54  ;;  %v2514_v59 = vpop.f32.mrb[160].mxu1 }
 0x438   :  { %v2515_v49 = vadd.f32 %v2514_v59, %v6199_v62  ;;  %v2516_v19 = vpop.f32.mrb[161].mxu1 }
 0x439   :  { %v2517_v5 = vadd.f32 %v2516_v19, %v6204_v56  ;;  %v2518_v42 = vpop.f32.mrb[162].mxu1  ;;  %3297 = vmatprep.mubr.bf16.mxu1 %v2752_v30 }
 0x43a   :  { %v2519_v31 = vadd.f32 %v2518_v42, %v6199_v62  ;;  %v2520_v58 = vpop.f32.mrb[163].mxu1  ;;  %3298 = vmatmul.mubr.bf16.gmra.mrb[220].mxu1 %v2751_v63  ;;  %v2659_v38 = vmax.f32 %v2515_v49, 0.0 }
 0x43b   :  { %v2521_v39 = vadd.f32 %v2520_v58, %v6204_v56  ;;  %v2660_v48 = vmax.f32 %v2517_v5, 0.0 }
 0x43c   :  { %v2663_v50 = vmax.f32 %v2519_v31, 0.0 }
 0x43d   :  { %v2664_v43 = vmax.f32 %v2521_v39, 0.0 }
 0x43e   :  { %v2755_v28 = vpack.c.bf16 %v2663_v50, %v2659_v38 }
 0x43f   :  { %v2756_v45 = vpack.c.bf16 %v2664_v43, %v2660_v48  ;;  %v2524_v40 = vpop.f32.mrb[164].mxu1 }
 0x440   :  { %v2525_v3 = vadd.f32 %v2524_v40, %v6199_v62  ;;  %v2526_v2 = vpop.f32.mrb[165].mxu1 }
 0x441   :  { %v2527_v25 = vadd.f32 %v2526_v2, %v6204_v56  ;;  %v2528_v16 = vpop.f32.mrb[166].mxu1  ;;  %3305 = vmatprep.mubr.bf16.mxu1 %v2756_v45 }
 0x442   :  { %v2529_v37 = vadd.f32 %v2528_v16, %v6199_v62  ;;  %v2530_v52 = vpop.f32.mrb[167].mxu1  ;;  %3306 = vmatmul.mubr.bf16.gmra.mrb[224].mxu1 %v2755_v28  ;;  %v2667_v27 = vmax.f32 %v2525_v3, 0.0 }
 0x443   :  { %v2531_v51 = vadd.f32 %v2530_v52, %v6204_v56  ;;  %v2668_v33 = vmax.f32 %v2527_v25, 0.0 }
 0x444   :  { %v2671_v18 = vmax.f32 %v2529_v37, 0.0 }
 0x445   :  { %v2672_v47 = vmax.f32 %v2531_v51, 0.0 }
 0x446   :  { %v2759_v53 = vpack.c.bf16 %v2671_v18, %v2667_v27 }
 0x447   :  { %v2760_v8 = vpack.c.bf16 %v2672_v47, %v2668_v33  ;;  %v2534_v57 = vpop.f32.mrb[168].mxu1 }
 0x448   :  { %v2535_v10 = vadd.f32 %v2534_v57, %v6199_v62  ;;  %v2536_v55 = vpop.f32.mrb[169].mxu1 }
 0x449   :  { %v2537_v9 = vadd.f32 %v2536_v55, %v6204_v56  ;;  %v2538_v0 = vpop.f32.mrb[170].mxu1  ;;  %3313 = vmatprep.mubr.bf16.mxu1 %v2760_v8 }
 0x44a   :  { %v2539_v32 = vadd.f32 %v2538_v0, %v6199_v62  ;;  %v2540_v34 = vpop.f32.mrb[171].mxu1  ;;  %3314 = vmatmul.mubr.bf16.gmra.mrb[228].mxu1 %v2759_v53  ;;  %v2675_v17 = vmax.f32 %v2535_v10, 0.0 }
 0x44b   :  { %v2541_v12 = vadd.f32 %v2540_v34, %v6204_v56  ;;  %v2676_v21 = vmax.f32 %v2537_v9, 0.0 }
 0x44c   :  { %v2679_v20 = vmax.f32 %v2539_v32, 0.0 }
 0x44d   :  { %v2680_v6 = vmax.f32 %v2541_v12, 0.0 }
 0x44e   :  { %v2763_v23 = vpack.c.bf16 %v2679_v20, %v2675_v17 }
 0x44f   :  { %v2764_v7 = vpack.c.bf16 %v2680_v6, %v2676_v21  ;;  %v2544_v24 = vpop.f32.mrb[172].mxu1 }
 0x450   :  { %v2545_v26 = vadd.f32 %v2544_v24, %v6199_v62  ;;  %v2546_v14 = vpop.f32.mrb[173].mxu1 }
 0x451   :  { %v2547_v35 = vadd.f32 %v2546_v14, %v6204_v56  ;;  %v2548_v44 = vpop.f32.mrb[174].mxu1  ;;  %3321 = vmatprep.mubr.bf16.mxu1 %v2764_v7 }
 0x452   :  { %v2549_v60 = vadd.f32 %v2548_v44, %v6199_v62  ;;  %v2550_v4 = vpop.f32.mrb[175].mxu1  ;;  %3322 = vmatmul.mubr.bf16.gmra.mrb[232].mxu1 %v2763_v23  ;;  %v2683_v41 = vmax.f32 %v2545_v26, 0.0 }
 0x453   :  { %v2551_v15 = vadd.f32 %v2550_v4, %v6204_v56  ;;  %v2684_v29 = vmax.f32 %v2547_v35, 0.0 }
 0x454   :  { %v2687_v13 = vmax.f32 %v2549_v60, 0.0 }
 0x455   :  { %v2688_v61 = vmax.f32 %v2551_v15, 0.0  ;;  %v3913_v36 = vpop.f32.mrb[128].mxu0 }
 0x456   :  { %v2767_v46 = vpack.c.bf16 %v2687_v13, %v2683_v41  ;;  %v3914_v11 = vpop.f32.mrb[129].mxu0 }
 0x457   :  { %v2768_v22 = vpack.c.bf16 %v2688_v61, %v2684_v29  ;;  %v6254_v54 = vadd.f32 %v3914_v11, %v3913_v36  ;;  %v2554_v1 = vpop.f32.mrb[176].mxu1  ;;  %v3916_v63 = vpop.f32.mrb[130].mxu0 }
 0x458   :  { %v2555_v30 = vadd.f32 %v2554_v1, %v6199_v62  ;;  %v2556_v59 = vpop.f32.mrb[177].mxu1  ;;  %v3917_v49 = vpop.f32.mrb[131].mxu0 }
 0x459   :  { %v2557_v19 = vadd.f32 %v2556_v59, %v6204_v56  ;;  %v6258_v5 = vadd.f32 %v3917_v49, %v3916_v63  ;;  %v2558_v42 = vpop.f32.mrb[178].mxu1  ;;  %3329 = vmatprep.mubr.bf16.mxu1 %v2768_v22 }
 0x45a   :  { %v2559_v31 = vadd.f32 %v2558_v42, %v6199_v62  ;;  %v2560_v58 = vpop.f32.mrb[179].mxu1  ;;  %3330 = vmatmul.mubr.bf16.gmra.mrb[236].mxu1 %v2767_v46  ;;  %v2691_v38 = vmax.f32 %v2555_v30, 0.0 }
 0x45b   :  { %v2561_v39 = vadd.f32 %v2560_v58, %v6204_v56  ;;  %v2692_v48 = vmax.f32 %v2557_v19, 0.0 }
 0x45c   :  { %v2695_v50 = vmax.f32 %v2559_v31, 0.0 }
 0x45d   :  { %v2696_v43 = vmax.f32 %v2561_v39, 0.0  ;;  %v3919_v28 = vpop.f32.mrb[132].mxu0 }
 0x45e   :  { %v2771_v45 = vpack.c.bf16 %v2695_v50, %v2691_v38  ;;  %v3920_v40 = vpop.f32.mrb[133].mxu0 }
 0x45f   :  { %v2772_v3 = vpack.c.bf16 %v2696_v43, %v2692_v48  ;;  %v6262_v2 = vadd.f32 %v3920_v40, %v3919_v28  ;;  %v2564_v25 = vpop.f32.mrb[180].mxu1  ;;  %v3922_v16 = vpop.f32.mrb[134].mxu0 }
 0x460   :  { %v2565_v37 = vadd.f32 %v2564_v25, %v6199_v62  ;;  %v2566_v52 = vpop.f32.mrb[181].mxu1  ;;  %v3923_v51 = vpop.f32.mrb[135].mxu0 }
 0x461   :  { %v2567_v27 = vadd.f32 %v2566_v52, %v6204_v56  ;;  %v6266_v18 = vadd.f32 %v3923_v51, %v3922_v16  ;;  %v2568_v33 = vpop.f32.mrb[182].mxu1  ;;  %3337 = vmatprep.mubr.bf16.mxu1 %v2772_v3 }
 0x462   :  { %v2569_v47 = vadd.f32 %v2568_v33, %v6199_v62  ;;  %v2570_v53 = vpop.f32.mrb[183].mxu1  ;;  %3338 = vmatmul.mubr.bf16.gmra.mrb[240].mxu1 %v2771_v45  ;;  %v2699_v57 = vmax.f32 %v2565_v37, 0.0 }
 0x463   :  { %v2571_v8 = vadd.f32 %v2570_v53, %v6204_v56  ;;  %v2700_v55 = vmax.f32 %v2567_v27, 0.0 }
 0x464   :  { %v2703_v10 = vmax.f32 %v2569_v47, 0.0 }
 0x465   :  { %v2704_v9 = vmax.f32 %v2571_v8, 0.0  ;;  %v3925_v0 = vpop.f32.mrb[136].mxu0 }
 0x466   :  { %v2775_v32 = vpack.c.bf16 %v2703_v10, %v2699_v57  ;;  %v3926_v34 = vpop.f32.mrb[137].mxu0 }
 0x467   :  { %v2776_v12 = vpack.c.bf16 %v2704_v9, %v2700_v55  ;;  %v6270_v17 = vadd.f32 %v3926_v34, %v3925_v0  ;;  %v2574_v20 = vpop.f32.mrb[184].mxu1  ;;  %v3928_v21 = vpop.f32.mrb[138].mxu0 }
 0x468   :  { %v2575_v6 = vadd.f32 %v2574_v20, %v6199_v62  ;;  %v2576_v23 = vpop.f32.mrb[185].mxu1  ;;  %v3929_v7 = vpop.f32.mrb[139].mxu0 }
 0x469   :  { %v2577_v24 = vadd.f32 %v2576_v23, %v6204_v56  ;;  %v6274_v26 = vadd.f32 %v3929_v7, %v3928_v21  ;;  %v2578_v14 = vpop.f32.mrb[186].mxu1  ;;  %3345 = vmatprep.mubr.bf16.mxu1 %v2776_v12 }
 0x46a   :  { %v2579_v35 = vadd.f32 %v2578_v14, %v6199_v62  ;;  %v2580_v44 = vpop.f32.mrb[187].mxu1  ;;  %3346 = vmatmul.mubr.bf16.gmra.mrb[244].mxu1 %v2775_v32  ;;  %v2707_v4 = vmax.f32 %v2575_v6, 0.0 }
 0x46b   :  { %v2581_v60 = vadd.f32 %v2580_v44, %v6204_v56  ;;  %v2708_v41 = vmax.f32 %v2577_v24, 0.0 }
 0x46c   :  { %v2711_v15 = vmax.f32 %v2579_v35, 0.0 }
 0x46d   :  { %v2712_v13 = vmax.f32 %v2581_v60, 0.0  ;;  %v3931_v29 = vpop.f32.mrb[140].mxu0 }
 0x46e   :  { %v2779_v61 = vpack.c.bf16 %v2711_v15, %v2707_v4  ;;  %v3932_v36 = vpop.f32.mrb[141].mxu0 }
 0x46f   :  { %v2780_v46 = vpack.c.bf16 %v2712_v13, %v2708_v41  ;;  %v6278_v11 = vadd.f32 %v3932_v36, %v3931_v29  ;;  %v2584_v22 = vpop.f32.mrb[188].mxu1  ;;  %v3934_v1 = vpop.f32.mrb[142].mxu0 }
 0x470   :  { %v2585_v63 = vadd.f32 %v2584_v22, %v6199_v62  ;;  %v2586_v30 = vpop.f32.mrb[189].mxu1  ;;  %v3935_v59 = vpop.f32.mrb[143].mxu0 }
 0x471   :  { %v2587_v49 = vadd.f32 %v2586_v30, %v6204_v56  ;;  %v6282_v19 = vadd.f32 %v3935_v59, %v3934_v1  ;;  %v2588_v42 = vpop.f32.mrb[190].mxu1  ;;  %3353 = vmatprep.mubr.bf16.mxu1 %v2780_v46 }
 0x472   :  { %v2589_v31 = vadd.f32 %v2588_v42, %v6199_v62  ;;  %v2590_v58 = vpop.f32.mrb[191].mxu1  ;;  %3354 = vmatmul.mubr.bf16.gmra.mrb[248].mxu1 %v2779_v61  ;;  %v2715_v38 = vmax.f32 %v2585_v63, 0.0 }
 0x473   :  { %v2591_v39 = vadd.f32 %v2590_v58, %v6204_v56  ;;  %v2716_v48 = vmax.f32 %v2587_v49, 0.0 }
 0x474   :  { %v2719_v50 = vmax.f32 %v2589_v31, 0.0 }
 0x475   :  { %v2720_v43 = vmax.f32 %v2591_v39, 0.0  ;;  %v3937_v28 = vpop.f32.mrb[144].mxu0 }
 0x476   :  { %v2783_v45 = vpack.c.bf16 %v2719_v50, %v2715_v38  ;;  %v3938_v40 = vpop.f32.mrb[145].mxu0 }
 0x477   :  { %v2784_v3 = vpack.c.bf16 %v2720_v43, %v2716_v48  ;;  %v6286_v25 = vadd.f32 %v3938_v40, %v3937_v28  ;;  %v3940_v16 = vpop.f32.mrb[146].mxu0 }
 0x478   :  { %v3941_v37 = vpop.f32.mrb[147].mxu0 }
 0x479   :  { %v6288_v52 = vadd.f32 %v3941_v37, %v3940_v16  ;;  %3361 = vmatprep.mubr.bf16.mxu1 %v2784_v3 }
 0x47a   :  { %3362 = vmatmul.mubr.bf16.gmra.mrb[252].mxu1 %v2783_v45 }
 0x47d   :  { %v3943_v62 = vpop.f32.mrb[148].mxu0 }
 0x47e   :  { %v3944_v51 = vpop.f32.mrb[149].mxu0 }
 0x47f   :  { %v6290_v27 = vadd.f32 %v3944_v51, %v3943_v62  ;;  %v3946_v56 = vpop.f32.mrb[150].mxu0 }
 0x480   :  { %v3947_v33 = vpop.f32.mrb[151].mxu0 }
 0x481   :  { %v6292_v47 = vadd.f32 %v3947_v33, %v3946_v56 }
 0x485   :  { %v3949_v53 = vpop.f32.mrb[152].mxu0 }
 0x486   :  { %v3950_v8 = vpop.f32.mrb[153].mxu0 }
 0x487   :  { %v6294_v57 = vadd.f32 %v3950_v8, %v3949_v53  ;;  %v3952_v10 = vpop.f32.mrb[154].mxu0 }
 0x488   :  { %v3953_v55 = vpop.f32.mrb[155].mxu0 }
 0x489   :  { %v6296_v9 = vadd.f32 %v3953_v55, %v3952_v10 }
 0x48d   :  { %v3955_v0 = vpop.f32.mrb[156].mxu0 }
 0x48e   :  { %v3956_v32 = vpop.f32.mrb[157].mxu0 }
 0x48f   :  { %v6298_v34 = vadd.f32 %v3956_v32, %v3955_v0  ;;  %v3958_v12 = vpop.f32.mrb[158].mxu0 }
 0x490   :  { %v3959_v20 = vpop.f32.mrb[159].mxu0 }
 0x491   :  { %v6300_v21 = vadd.f32 %v3959_v20, %v3958_v12 }
 0x495   :  { %v3961_v6 = vpop.f32.mrb[160].mxu0 }
 0x496   :  { %v3962_v23 = vpop.f32.mrb[161].mxu0 }
 0x497   :  { %v6302_v7 = vadd.f32 %v3962_v23, %v3961_v6  ;;  %v3964_v24 = vpop.f32.mrb[162].mxu0  ;;  %v6337_v6 = vld [vmem:[%s6540_s9] ss:$0 sm:$0xff] }
 0x498   :  { %v3965_v14 = vpop.f32.mrb[163].mxu0 }
 0x499   :  { %v6304_v35 = vadd.f32 %v3965_v14, %v3964_v24  ;;  %v3083_v14 = vadd.f32 %v6254_v54, %v6337_v6 }
 0x49d   :  { %v3967_v44 = vpop.f32.mrb[164].mxu0 }
 0x49e   :  { %v3968_v60 = vpop.f32.mrb[165].mxu0 }
 0x49f   :  { %v6306_v4 = vadd.f32 %v3968_v60, %v3967_v44  ;;  %v3970_v15 = vpop.f32.mrb[166].mxu0 }
 0x4a0   :  { %v3971_v41 = vpop.f32.mrb[167].mxu0 }
 0x4a1   :  { %v6308_v13 = vadd.f32 %v3971_v41, %v3970_v15  ;;  %v3086_v41 = vadd.f32 %v6258_v5, %v6337_v6 }
 0x4a5   :  { %v3973_v29 = vpop.f32.mrb[168].mxu0 }
 0x4a6   :  { %v3974_v61 = vpop.f32.mrb[169].mxu0 }
 0x4a7   :  { %v6310_v36 = vadd.f32 %v3974_v61, %v3973_v29  ;;  %v3976_v46 = vpop.f32.mrb[170].mxu0 }
 0x4a8   :  { %v3977_v22 = vpop.f32.mrb[171].mxu0 }
 0x4a9   :  { %v6312_v1 = vadd.f32 %v3977_v22, %v3976_v46 }
 0x4ad   :  { %v3979_v63 = vpop.f32.mrb[172].mxu0 }
 0x4ae   :  { %v3980_v30 = vpop.f32.mrb[173].mxu0 }
 0x4af   :  { %v6314_v59 = vadd.f32 %v3980_v30, %v3979_v63  ;;  %v3982_v49 = vpop.f32.mrb[174].mxu0 }
 0x4b0   :  { %v3983_v42 = vpop.f32.mrb[175].mxu0 }
 0x4b1   :  { %v6316_v31 = vadd.f32 %v3983_v42, %v3982_v49  ;;  %v3091_v42 = vadd.f32 %v6262_v2, %v6337_v6 }
 0x4b5   :  { %v3985_v58 = vpop.f32.mrb[176].mxu0 }
 0x4b6   :  { %v3986_v39 = vpop.f32.mrb[177].mxu0 }
 0x4b7   :  { %v6318_v38 = vadd.f32 %v3986_v39, %v3985_v58  ;;  %v3988_v50 = vpop.f32.mrb[178].mxu0 }
 0x4b8   :  { %v3989_v48 = vpop.f32.mrb[179].mxu0 }
 0x4b9   :  { %v6320_v43 = vadd.f32 %v3989_v48, %v3988_v50  ;;  %v3094_v50 = vadd.f32 %v6266_v18, %v6337_v6  ;;  %v3102_v18 = vadd.f32 %v6274_v26, %v6337_v6 }
 0x4bd   :  { %v3991_v28 = vpop.f32.mrb[180].mxu0 }
 0x4be   :  { %v3992_v45 = vpop.f32.mrb[181].mxu0 }
 0x4bf   :  { %v6322_v40 = vadd.f32 %v3992_v45, %v3991_v28  ;;  %v3994_v3 = vpop.f32.mrb[182].mxu0 }
 0x4c0   :  { %v3995_v16 = vpop.f32.mrb[183].mxu0 }
 0x4c1   :  { %v6324_v37 = vadd.f32 %v3995_v16, %v3994_v3 }
 0x4c5   :  { %v3997_v62 = vpop.f32.mrb[184].mxu0 }
 0x4c6   :  { %v3998_v51 = vpop.f32.mrb[185].mxu0 }
 0x4c7   :  { %v6326_v56 = vadd.f32 %v3998_v51, %v3997_v62  ;;  %v4000_v33 = vpop.f32.mrb[186].mxu0 }
 0x4c8   :  { %v4001_v53 = vpop.f32.mrb[187].mxu0 }
 0x4c9   :  { %v6328_v8 = vadd.f32 %v4001_v53, %v4000_v33  ;;  %v3099_v33 = vadd.f32 %v6270_v17, %v6337_v6 }
 0x4cd   :  { %v4003_v10 = vpop.f32.mrb[188].mxu0 }
 0x4ce   :  { %v4004_v55 = vpop.f32.mrb[189].mxu0 }
 0x4cf   :  { %v6330_v0 = vadd.f32 %v4004_v55, %v4003_v10  ;;  %v4006_v32 = vpop.f32.mrb[190].mxu0 }
 0x4d0   :  { %v4007_v12 = vpop.f32.mrb[191].mxu0 }
 0x4d1   :  { %v6332_v20 = vadd.f32 %v4007_v12, %v4006_v32 }
 0x4d5   :  { %v4025_v23 = vpop.f32.mrb[192].mxu1 }
 0x4d6   :  { %v4026_v24 = vpop.f32.mrb[193].mxu1 }
 0x4d7   :  { %v4027_v44 = vadd.f32 %v4026_v24, %v4025_v23  ;;  %v4028_v60 = vpop.f32.mrb[194].mxu1 }
 0x4d8   :  { %v4029_v15 = vpop.f32.mrb[195].mxu1 }
 0x4d9   :  { %v3244_v29 = vadd.f32 %v4027_v44, %v3083_v14  ;;  %v4030_v61 = vadd.f32 %v4029_v15, %v4028_v60 }
 0x4db   :  { %v3865_v46 = vmul.f32 -1.442695, %v3244_v29  ;;  %v3247_v22 = vadd.f32 %v4030_v61, %v3086_v41  ;;  %v3107_v29 = vadd.f32 %v6278_v11, %v6337_v6 }
 0x4dd   :  { %4545 = vpow2.f32 %v3865_v46  ;;  %v3866_v63 = vmul.f32 -1.442695, %v3247_v22  ;;  %v4031_v30 = vpop.f32.mrb[196].mxu1 }
 0x4de   :  { %v4032_v49 = vpop.f32.mrb[197].mxu1 }
 0x4df   :  { %4547 = vpow2.f32 %v3866_v63  ;;  %v4033_v58 = vadd.f32 %v4032_v49, %v4031_v30  ;;  %v4034_v54 = vpop.f32.mrb[198].mxu1  ;;  %v3110_v30 = vadd.f32 %v6282_v19, %v6337_v6  ;;  %v3115_v19 = vadd.f32 %v6286_v25, %v6337_v6 }
 0x4e0   :  { %v4035_v39 = vpop.f32.mrb[199].mxu1 }
 0x4e1   :  { %v3252_v48 = vadd.f32 %v4033_v58, %v3091_v42  ;;  %v4036_v5 = vadd.f32 %v4035_v39, %v4034_v54 }
 0x4e3   :  { %v3867_v28 = vmul.f32 -1.442695, %v3252_v48  ;;  %v3255_v45 = vadd.f32 %v4036_v5, %v3094_v50 }
 0x4e5   :  { %4549 = vpow2.f32 %v3867_v28  ;;  %v3868_v3 = vmul.f32 -1.442695, %v3255_v45  ;;  %v4037_v16 = vpop.f32.mrb[200].mxu1 }
 0x4e6   :  { %v4038_v62 = vpop.f32.mrb[201].mxu1 }
 0x4e7   :  { %v4546_v51 = vpop.eup %4545  ;;  %4551 = vpow2.f32 %v3868_v3  ;;  %v4039_v2 = vadd.f32 %v4038_v62, %v4037_v16  ;;  %v4040_v53 = vpop.f32.mrb[202].mxu1 }
 0x4e8   :  { %v3466_v10 = vadd.f32 1.0, %v4546_v51  ;;  %v4041_v55 = vpop.f32.mrb[203].mxu1 }
 0x4e9   :  { %v4548_v32 = vpop.eup %4547  ;;  %v3260_v12 = vadd.f32 %v4039_v2, %v3099_v33  ;;  %v4042_v23 = vadd.f32 %v4041_v55, %v4040_v53  ;;  %v3118_v2 = vadd.f32 %v6288_v52, %v6337_v6  ;;  %v3123_v52 = vadd.f32 %v6290_v27, %v6337_v6 }
 0x4ea   :  { %4553 = vrcp.f32 %v3466_v10  ;;  %v3467_v24 = vadd.f32 1.0, %v4548_v32 }
 0x4eb   :  { %v3869_v14 = vmul.f32 -1.442695, %v3260_v12  ;;  %v3263_v44 = vadd.f32 %v4042_v23, %v3102_v18 }
 0x4ec   :  { %4555 = vrcp.f32 %v3467_v24 }
 0x4ed   :  { %4557 = vpow2.f32 %v3869_v14  ;;  %v3870_v60 = vmul.f32 -1.442695, %v3263_v44  ;;  %v4043_v15 = vpop.f32.mrb[204].mxu1 }
 0x4ee   :  { %v4044_v17 = vpop.f32.mrb[205].mxu1 }
 0x4ef   :  { %v4550_v41 = vpop.eup %4549  ;;  %4559 = vpow2.f32 %v3870_v60  ;;  %v4045_v61 = vadd.f32 %v4044_v17, %v4043_v15  ;;  %v4046_v46 = vpop.f32.mrb[206].mxu1 }
 0x4f0   :  { %v3468_v22 = vadd.f32 1.0, %v4550_v41  ;;  %v4047_v26 = vpop.f32.mrb[207].mxu1 }
 0x4f1   :  { %v4552_v63 = vpop.eup %4551  ;;  %v3268_v49 = vadd.f32 %v4045_v61, %v3107_v29  ;;  %v4048_v42 = vadd.f32 %v4047_v26, %v4046_v46  ;;  %v3126_v61 = vadd.f32 %v6292_v47, %v6337_v6  ;;  %v3131_v47 = vadd.f32 %v6294_v57, %v6337_v6 }
 0x4f2   :  { %4561 = vrcp.f32 %v3468_v22  ;;  %v3469_v58 = vadd.f32 1.0, %v4552_v63 }
 0x4f3   :  { %v3871_v54 = vmul.f32 -1.442695, %v3268_v49  ;;  %v3271_v39 = vadd.f32 %v4048_v42, %v3110_v30 }
 0x4f4   :  { %v4554_v50 = vpop.eup %4553  ;;  %4563 = vrcp.f32 %v3469_v58 }
 0x4f5   :  { %3562 = vst.msk [vmem:[%s6541_s10] sm:$0xff] %vm128_vm0, %v4554_v50  ;;  %4565 = vpow2.f32 %v3871_v54  ;;  %v3872_v11 = vmul.f32 -1.442695, %v3271_v39  ;;  %v4049_v48 = vpop.f32.mrb[208].mxu1 }
 0x4f6   :  { %v4556_v5 = vpop.eup %4555  ;;  %v4050_v28 = vpop.f32.mrb[209].mxu1 }
 0x4f7   :  { %v4558_v45 = vpop.eup %4557  ;;  %3563 = vst.msk [vmem:[%s6541_s10 + $0x8] sm:$0xff] %vm128_vm0, %v4556_v5  ;;  %4567 = vpow2.f32 %v3872_v11  ;;  %v4051_v3 = vadd.f32 %v4050_v28, %v4049_v48  ;;  %v4052_v16 = vpop.f32.mrb[210].mxu1 }
 0x4f8   :  { %v3470_v62 = vadd.f32 1.0, %v4558_v45  ;;  %v4053_v51 = vpop.f32.mrb[211].mxu1  ;;  %v3134_v45 = vadd.f32 %v6296_v9, %v6337_v6  ;;  %v3139_v9 = vadd.f32 %v6298_v34, %v6337_v6 }
 0x4f9   :  { %v4560_v33 = vpop.eup %4559  ;;  %v3276_v53 = vadd.f32 %v4051_v3, %v3115_v19  ;;  %v4054_v10 = vadd.f32 %v4053_v51, %v4052_v16 }
 0x4fa   :  { %4569 = vrcp.f32 %v3470_v62  ;;  %v3471_v55 = vadd.f32 1.0, %v4560_v33 }
 0x4fb   :  { %v3873_v32 = vmul.f32 -1.442695, %v3276_v53  ;;  %v3279_v25 = vadd.f32 %v4054_v10, %v3118_v2 }
 0x4fc   :  { %v4562_v18 = vpop.eup %4561  ;;  %4571 = vrcp.f32 %v3471_v55 }
 0x4fd   :  { %3564 = vst.msk [vmem:[%s6541_s10 + $0x10] sm:$0xff] %vm128_vm0, %v4562_v18  ;;  %4573 = vpow2.f32 %v3873_v32  ;;  %v3874_v12 = vmul.f32 -1.442695, %v3279_v25  ;;  %v4055_v23 = vpop.f32.mrb[212].mxu1 }
 0x4fe   :  { %v4564_v24 = vpop.eup %4563  ;;  %v4056_v14 = vpop.f32.mrb[213].mxu1 }
 0x4ff   :  { %v4566_v44 = vpop.eup %4565  ;;  %3565 = vst.msk [vmem:[%s6541_s10 + $0x18] sm:$0xff] %vm128_vm0, %v4564_v24  ;;  %4575 = vpow2.f32 %v3874_v12  ;;  %v4057_v60 = vadd.f32 %v4056_v14, %v4055_v23  ;;  %v4058_v15 = vpop.f32.mrb[214].mxu1  ;;  %v3142_v24 = vadd.f32 %v6300_v21, %v6337_v6  ;;  %v3147_v21 = vadd.f32 %v6302_v7, %v6337_v6 }
 0x500   :  { %v3472_v17 = vadd.f32 1.0, %v4566_v44  ;;  %v4059_v41 = vpop.f32.mrb[215].mxu1 }
 0x501   :  { %v4568_v29 = vpop.eup %4567  ;;  %v3284_v46 = vadd.f32 %v4057_v60, %v3123_v52  ;;  %v4060_v22 = vadd.f32 %v4059_v41, %v4058_v15 }
 0x502   :  { %4577 = vrcp.f32 %v3472_v17  ;;  %v3473_v26 = vadd.f32 1.0, %v4568_v29 }
 0x503   :  { %v3875_v63 = vmul.f32 -1.442695, %v3284_v46  ;;  %v3287_v27 = vadd.f32 %v4060_v22, %v3126_v61 }
 0x504   :  { %v4570_v30 = vpop.eup %4569  ;;  %4579 = vrcp.f32 %v3473_v26 }
 0x505   :  { %3566 = vst.msk [vmem:[%s6541_s10 + $0x20] sm:$0xff] %vm128_vm0, %v4570_v30  ;;  %4581 = vpow2.f32 %v3875_v63  ;;  %v3876_v49 = vmul.f32 -1.442695, %v3287_v27  ;;  %v4061_v42 = vpop.f32.mrb[216].mxu1 }
 0x506   :  { %v4572_v58 = vpop.eup %4571  ;;  %v4062_v54 = vpop.f32.mrb[217].mxu1 }
 0x507   :  { %v4574_v39 = vpop.eup %4573  ;;  %3567 = vst.msk [vmem:[%s6541_s10 + $0x28] sm:$0xff] %vm128_vm0, %v4572_v58  ;;  %4583 = vpow2.f32 %v3876_v49  ;;  %v4063_v50 = vadd.f32 %v4062_v54, %v4061_v42  ;;  %v4064_v11 = vpop.f32.mrb[218].mxu1  ;;  %v3150_v49 = vadd.f32 %v6304_v35, %v6337_v6  ;;  %v3155_v35 = vadd.f32 %v6306_v4, %v6337_v6 }
 0x508   :  { %v3474_v48 = vadd.f32 1.0, %v4574_v39  ;;  %v4065_v5 = vpop.f32.mrb[219].mxu1 }
 0x509   :  { %v4576_v28 = vpop.eup %4575  ;;  %v3292_v19 = vadd.f32 %v4063_v50, %v3131_v47  ;;  %v4066_v3 = vadd.f32 %v4065_v5, %v4064_v11 }
 0x50a   :  { %4585 = vrcp.f32 %v3474_v48  ;;  %v3475_v16 = vadd.f32 1.0, %v4576_v28 }
 0x50b   :  { %v3877_v62 = vmul.f32 -1.442695, %v3292_v19  ;;  %v3295_v57 = vadd.f32 %v4066_v3, %v3134_v45 }
 0x50c   :  { %v4578_v51 = vpop.eup %4577  ;;  %4587 = vrcp.f32 %v3475_v16 }
 0x50d   :  { %3568 = vst.msk [vmem:[%s6541_s10 + $0x30] sm:$0xff] %vm128_vm0, %v4578_v51  ;;  %4589 = vpow2.f32 %v3877_v62  ;;  %v3878_v33 = vmul.f32 -1.442695, %v3295_v57  ;;  %v4067_v2 = vpop.f32.mrb[220].mxu1  ;;  %v3158_v57 = vadd.f32 %v6308_v13, %v6337_v6  ;;  %v3163_v13 = vadd.f32 %v6310_v36, %v6337_v6 }
 0x50e   :  { %v4580_v53 = vpop.eup %4579  ;;  %v4068_v10 = vpop.f32.mrb[221].mxu1 }
 0x50f   :  { %v4582_v55 = vpop.eup %4581  ;;  %3569 = vst.msk [vmem:[%s6541_s10 + $0x38] sm:$0xff] %vm128_vm0, %v4580_v53  ;;  %4591 = vpow2.f32 %v3878_v33  ;;  %v4069_v32 = vadd.f32 %v4068_v10, %v4067_v2  ;;  %v4070_v25 = vpop.f32.mrb[222].mxu1 }
 0x510   :  { %v3476_v18 = vadd.f32 1.0, %v4582_v55  ;;  %v4071_v12 = vpop.f32.mrb[223].mxu1 }
 0x511   :  { %v4584_v23 = vpop.eup %4583  ;;  %v3300_v14 = vadd.f32 %v4069_v32, %v3139_v9  ;;  %v4072_v44 = vadd.f32 %v4071_v12, %v4070_v25 }
 0x512   :  { %4593 = vrcp.f32 %v3476_v18  ;;  %v3477_v52 = vadd.f32 1.0, %v4584_v23 }
 0x513   :  { %v3879_v60 = vmul.f32 -1.442695, %v3300_v14  ;;  %v3303_v34 = vadd.f32 %v4072_v44, %v3142_v24 }
 0x514   :  { %v4586_v15 = vpop.eup %4585  ;;  %4595 = vrcp.f32 %v3477_v52  ;;  %v3166_v52 = vadd.f32 %v6312_v1, %v6337_v6  ;;  %v3171_v1 = vadd.f32 %v6314_v59, %v6337_v6 }
 0x515   :  { %3570 = vst.msk [vmem:[%s6541_s10 + $0x40] sm:$0xff] %vm128_vm0, %v4586_v15  ;;  %4597 = vpow2.f32 %v3879_v60  ;;  %v3880_v17 = vmul.f32 -1.442695, %v3303_v34  ;;  %v4073_v41 = vpop.f32.mrb[224].mxu1 }
 0x516   :  { %v4588_v29 = vpop.eup %4587  ;;  %v4074_v61 = vpop.f32.mrb[225].mxu1 }
 0x517   :  { %v4590_v46 = vpop.eup %4589  ;;  %3571 = vst.msk [vmem:[%s6541_s10 + $0x48] sm:$0xff] %vm128_vm0, %v4588_v29  ;;  %4599 = vpow2.f32 %v3880_v17  ;;  %v4075_v22 = vadd.f32 %v4074_v61, %v4073_v41  ;;  %v4076_v26 = vpop.f32.mrb[226].mxu1 }
 0x518   :  { %v3478_v63 = vadd.f32 1.0, %v4590_v46  ;;  %v4077_v27 = vpop.f32.mrb[227].mxu1 }
 0x519   :  { %v4592_v30 = vpop.eup %4591  ;;  %v3308_v42 = vadd.f32 %v4075_v22, %v3147_v21  ;;  %v4078_v58 = vadd.f32 %v4077_v27, %v4076_v26 }
 0x51a   :  { %4601 = vrcp.f32 %v3478_v63  ;;  %v3479_v54 = vadd.f32 1.0, %v4592_v30 }
 0x51b   :  { %v3881_v39 = vmul.f32 -1.442695, %v3308_v42  ;;  %v3311_v7 = vadd.f32 %v4078_v58, %v3150_v49  ;;  %v3174_v42 = vadd.f32 %v6316_v31, %v6337_v6  ;;  %v3179_v31 = vadd.f32 %v6318_v38, %v6337_v6 }
 0x51c   :  { %v4594_v47 = vpop.eup %4593  ;;  %4603 = vrcp.f32 %v3479_v54 }
 0x51d   :  { %3572 = vst.msk [vmem:[%s6541_s10 + $0x50] sm:$0xff] %vm128_vm0, %v4594_v47  ;;  %4605 = vpow2.f32 %v3881_v39  ;;  %v3882_v50 = vmul.f32 -1.442695, %v3311_v7  ;;  %v4079_v11 = vpop.f32.mrb[228].mxu1 }
 0x51e   :  { %v4596_v48 = vpop.eup %4595  ;;  %v4080_v5 = vpop.f32.mrb[229].mxu1 }
 0x51f   :  { %v4598_v28 = vpop.eup %4597  ;;  %3573 = vst.msk [vmem:[%s6541_s10 + $0x58] sm:$0xff] %vm128_vm0, %v4596_v48  ;;  %4607 = vpow2.f32 %v3882_v50  ;;  %v4081_v45 = vadd.f32 %v4080_v5, %v4079_v11  ;;  %v4082_v19 = vpop.f32.mrb[230].mxu1 }
 0x520   :  { %v3480_v3 = vadd.f32 1.0, %v4598_v28  ;;  %v4083_v16 = vpop.f32.mrb[231].mxu1 }
 0x521   :  { %v4600_v62 = vpop.eup %4599  ;;  %v3316_v51 = vadd.f32 %v4081_v45, %v3155_v35  ;;  %v4084_v33 = vadd.f32 %v4083_v16, %v4082_v19 }
 0x522   :  { %4609 = vrcp.f32 %v3480_v3  ;;  %v3481_v2 = vadd.f32 1.0, %v4600_v62  ;;  %v3182_v62 = vadd.f32 %v6320_v43, %v6337_v6  ;;  %v3187_v43 = vadd.f32 %v6322_v40, %v6337_v6 }
 0x523   :  { %v3883_v53 = vmul.f32 -1.442695, %v3316_v51  ;;  %v3319_v4 = vadd.f32 %v4084_v33, %v3158_v57 }
 0x524   :  { %v4602_v10 = vpop.eup %4601  ;;  %4611 = vrcp.f32 %v3481_v2 }
 0x525   :  { %3574 = vst.msk [vmem:[%s6541_s10 + $0x60] sm:$0xff] %vm128_vm0, %v4602_v10  ;;  %4613 = vpow2.f32 %v3883_v53  ;;  %v3884_v55 = vmul.f32 -1.442695, %v3319_v4  ;;  %v4085_v9 = vpop.f32.mrb[232].mxu1 }
 0x526   :  { %v4604_v32 = vpop.eup %4603  ;;  %v4086_v25 = vpop.f32.mrb[233].mxu1 }
 0x527   :  { %v4606_v18 = vpop.eup %4605  ;;  %3575 = vst.msk [vmem:[%s6541_s10 + $0x68] sm:$0xff] %vm128_vm0, %v4604_v32  ;;  %4615 = vpow2.f32 %v3884_v55  ;;  %v4087_v12 = vadd.f32 %v4086_v25, %v4085_v9  ;;  %v4088_v23 = vpop.f32.mrb[234].mxu1 }
 0x528   :  { %v3482_v24 = vadd.f32 1.0, %v4606_v18  ;;  %v4089_v14 = vpop.f32.mrb[235].mxu1 }
 0x529   :  { %v4608_v44 = vpop.eup %4607  ;;  %v3324_v60 = vadd.f32 %v4087_v12, %v3163_v13  ;;  %v4090_v34 = vadd.f32 %v4089_v14, %v4088_v23 }
 0x52a   :  { %4617 = vrcp.f32 %v3482_v24  ;;  %v3483_v15 = vadd.f32 1.0, %v4608_v44  ;;  %v3190_v24 = vadd.f32 %v6324_v37, %v6337_v6  ;;  %v3195_v37 = vadd.f32 %v6326_v56, %v6337_v6 }
 0x52b   :  { %v3885_v17 = vmul.f32 -1.442695, %v3324_v60  ;;  %v3327_v36 = vadd.f32 %v4090_v34, %v3166_v52 }
 0x52c   :  { %v4610_v41 = vpop.eup %4609  ;;  %4619 = vrcp.f32 %v3483_v15 }
 0x52d   :  { %3576 = vst.msk [vmem:[%s6541_s10 + $0x70] sm:$0xff] %vm128_vm0, %v4610_v41  ;;  %4621 = vpow2.f32 %v3885_v17  ;;  %v3886_v29 = vmul.f32 -1.442695, %v3327_v36  ;;  %v4091_v61 = vpop.f32.mrb[236].mxu1 }
 0x52e   :  { %v4612_v46 = vpop.eup %4611  ;;  %v4092_v21 = vpop.f32.mrb[237].mxu1 }
 0x52f   :  { %v4614_v22 = vpop.eup %4613  ;;  %3577 = vst.msk [vmem:[%s6541_s10 + $0x78] sm:$0xff] %vm128_vm0, %v4612_v46  ;;  %4623 = vpow2.f32 %v3886_v29  ;;  %v4093_v26 = vadd.f32 %v4092_v21, %v4091_v61  ;;  %v4094_v63 = vpop.f32.mrb[238].mxu1 }
 0x530   :  { %v3484_v27 = vadd.f32 1.0, %v4614_v22  ;;  %v4095_v30 = vpop.f32.mrb[239].mxu1 }
 0x531   :  { %v4616_v49 = vpop.eup %4615  ;;  %v3332_v58 = vadd.f32 %v4093_v26, %v3171_v1  ;;  %v4096_v54 = vadd.f32 %v4095_v30, %v4094_v63  ;;  %v3198_v26 = vadd.f32 %v6328_v8, %v6337_v6  ;;  %v3203_v8 = vadd.f32 %v6330_v0, %v6337_v6 }
 0x532   :  { %4625 = vrcp.f32 %v3484_v27  ;;  %v3485_v39 = vadd.f32 1.0, %v4616_v49 }
 0x533   :  { %v3887_v7 = vmul.f32 -1.442695, %v3332_v58  ;;  %v3335_v59 = vadd.f32 %v4096_v54, %v3174_v42 }
 0x534   :  { %v4618_v47 = vpop.eup %4617  ;;  %4627 = vrcp.f32 %v3485_v39 }
 0x535   :  { %3578 = vst.msk [vmem:[%s6541_s10 + $0x80] sm:$0xff] %vm128_vm0, %v4618_v47  ;;  %4629 = vpow2.f32 %v3887_v7  ;;  %v3888_v50 = vmul.f32 -1.442695, %v3335_v59  ;;  %v4097_v11 = vpop.f32.mrb[240].mxu1 }
 0x536   :  { %v4620_v48 = vpop.eup %4619  ;;  %v4098_v5 = vpop.f32.mrb[241].mxu1 }
 0x537   :  { %v4622_v28 = vpop.eup %4621  ;;  %3579 = vst.msk [vmem:[%s6541_s10 + $0x88] sm:$0xff] %vm128_vm0, %v4620_v48  ;;  %4631 = vpow2.f32 %v3888_v50  ;;  %v4099_v35 = vadd.f32 %v4098_v5, %v4097_v11  ;;  %v4100_v45 = vpop.f32.mrb[242].mxu1 }
 0x538   :  { %v3486_v19 = vadd.f32 1.0, %v4622_v28  ;;  %v4101_v3 = vpop.f32.mrb[243].mxu1  ;;  %v3206_v28 = vadd.f32 %v6332_v20, %v6337_v6 }
 0x539   :  { %v4624_v16 = vpop.eup %4623  ;;  %v3340_v57 = vadd.f32 %v4099_v35, %v3179_v31  ;;  %v4102_v51 = vadd.f32 %v4101_v3, %v4100_v45 }
 0x53a   :  { %4633 = vrcp.f32 %v3486_v19  ;;  %v3487_v33 = vadd.f32 1.0, %v4624_v16 }
 0x53b   :  { %v3889_v2 = vmul.f32 -1.442695, %v3340_v57  ;;  %v3343_v38 = vadd.f32 %v4102_v51, %v3182_v62 }
 0x53c   :  { %v4626_v53 = vpop.eup %4625  ;;  %4635 = vrcp.f32 %v3487_v33 }
 0x53d   :  { %3580 = vst.msk [vmem:[%s6541_s10 + $0x90] sm:$0xff] %vm128_vm0, %v4626_v53  ;;  %4637 = vpow2.f32 %v3889_v2  ;;  %v3890_v4 = vmul.f32 -1.442695, %v3343_v38  ;;  %v4103_v10 = vpop.f32.mrb[244].mxu1 }
 0x53e   :  { %v4628_v55 = vpop.eup %4627  ;;  %v4104_v9 = vpop.f32.mrb[245].mxu1 }
 0x53f   :  { %v4630_v32 = vpop.eup %4629  ;;  %3581 = vst.msk [vmem:[%s6541_s10 + $0x98] sm:$0xff] %vm128_vm0, %v4628_v55  ;;  %4639 = vpow2.f32 %v3890_v4  ;;  %v4105_v25 = vadd.f32 %v4104_v9, %v4103_v10  ;;  %v4106_v18 = vpop.f32.mrb[246].mxu1 }
 0x540   :  { %v3488_v13 = vadd.f32 1.0, %v4630_v32  ;;  %v4107_v12 = vpop.f32.mrb[247].mxu1 }
 0x541   :  { %v4632_v23 = vpop.eup %4631  ;;  %v3348_v14 = vadd.f32 %v4105_v25, %v3187_v43  ;;  %v4108_v44 = vadd.f32 %v4107_v12, %v4106_v18 }
 0x542   :  { %4641 = vrcp.f32 %v3488_v13  ;;  %v3489_v52 = vadd.f32 1.0, %v4632_v23 }
 0x543   :  { %v3891_v60 = vmul.f32 -1.442695, %v3348_v14  ;;  %v3351_v40 = vadd.f32 %v4108_v44, %v3190_v24 }
 0x544   :  { %v4634_v34 = vpop.eup %4633  ;;  %4643 = vrcp.f32 %v3489_v52 }
 0x545   :  { %3582 = vst.msk [vmem:[%s6541_s10 + $0xa0] sm:$0xff] %vm128_vm0, %v4634_v34  ;;  %4645 = vpow2.f32 %v3891_v60  ;;  %v3892_v15 = vmul.f32 -1.442695, %v3351_v40  ;;  %v4109_v17 = vpop.f32.mrb[248].mxu1 }
 0x546   :  { %v4636_v36 = vpop.eup %4635  ;;  %v4110_v41 = vpop.f32.mrb[249].mxu1 }
 0x547   :  { %v4638_v29 = vpop.eup %4637  ;;  %3583 = vst.msk [vmem:[%s6541_s10 + $0xa8] sm:$0xff] %vm128_vm0, %v4636_v36  ;;  %4647 = vpow2.f32 %v3892_v15  ;;  %v4111_v61 = vadd.f32 %v4110_v41, %v4109_v17  ;;  %v4112_v46 = vpop.f32.mrb[250].mxu1 }
 0x548   :  { %v3490_v21 = vadd.f32 1.0, %v4638_v29  ;;  %v4113_v22 = vpop.f32.mrb[251].mxu1 }
 0x549   :  { %v4640_v1 = vpop.eup %4639  ;;  %v3356_v63 = vadd.f32 %v4111_v61, %v3195_v37  ;;  %v4114_v27 = vadd.f32 %v4113_v22, %v4112_v46 }
 0x54a   :  { %4649 = vrcp.f32 %v3490_v21  ;;  %v3491_v30 = vadd.f32 1.0, %v4640_v1 }
 0x54b   :  { %v3893_v49 = vmul.f32 -1.442695, %v3356_v63  ;;  %v3359_v56 = vadd.f32 %v4114_v27, %v3198_v26 }
 0x54c   :  { %v4642_v42 = vpop.eup %4641  ;;  %4651 = vrcp.f32 %v3491_v30 }
 0x54d   :  { %3584 = vst.msk [vmem:[%s6541_s10 + $0xb0] sm:$0xff] %vm128_vm0, %v4642_v42  ;;  %4653 = vpow2.f32 %v3893_v49  ;;  %v3894_v58 = vmul.f32 -1.442695, %v3359_v56  ;;  %v4115_v54 = vpop.f32.mrb[252].mxu1 }
 0x54e   :  { %v4644_v39 = vpop.eup %4643  ;;  %v4116_v7 = vpop.f32.mrb[253].mxu1 }
 0x54f   :  { %v4646_v59 = vpop.eup %4645  ;;  %3585 = vst.msk [vmem:[%s6541_s10 + $0xb8] sm:$0xff] %vm128_vm0, %v4644_v39  ;;  %4655 = vpow2.f32 %v3894_v58  ;;  %v4117_v47 = vadd.f32 %v4116_v7, %v4115_v54  ;;  %v4118_v50 = vpop.f32.mrb[254].mxu1 }
 0x550   :  { %v3492_v11 = vadd.f32 1.0, %v4646_v59  ;;  %v4119_v48 = vpop.f32.mrb[255].mxu1 }
 0x551   :  { %v4648_v5 = vpop.eup %4647  ;;  %v3364_v31 = vadd.f32 %v4117_v47, %v3203_v8  ;;  %v4120_v35 = vadd.f32 %v4119_v48, %v4118_v50 }
 0x552   :  { %4657 = vrcp.f32 %v3492_v11  ;;  %v3493_v45 = vadd.f32 1.0, %v4648_v5 }
 0x553   :  { %v3895_v19 = vmul.f32 -1.442695, %v3364_v31  ;;  %v3367_v0 = vadd.f32 %v4120_v35, %v3206_v28 }
 0x554   :  { %v4650_v3 = vpop.eup %4649  ;;  %4659 = vrcp.f32 %v3493_v45 }
 0x555   :  { %3586 = vst.msk [vmem:[%s6541_s10 + $0xc0] sm:$0xff] %vm128_vm0, %v4650_v3  ;;  %4661 = vpow2.f32 %v3895_v19  ;;  %v3896_v16 = vmul.f32 -1.442695, %v3367_v0 }
 0x556   :  { %v4652_v62 = vpop.eup %4651 }
 0x557   :  { %v4654_v57 = vpop.eup %4653  ;;  %3587 = vst.msk [vmem:[%s6541_s10 + $0xc8] sm:$0xff] %vm128_vm0, %v4652_v62  ;;  %4663 = vpow2.f32 %v3896_v16 }
 0x558   :  { %v3494_v20 = vadd.f32 1.0, %v4654_v57 }
 0x559   :  { %v4656_v6 = vpop.eup %4655 }
 0x55a   :  { %4665 = vrcp.f32 %v3494_v20  ;;  %v3495_v51 = vadd.f32 1.0, %v4656_v6 }
 0x55c   :  { %v4658_v33 = vpop.eup %4657  ;;  %4667 = vrcp.f32 %v3495_v51 }
 0x55d   :  { %3588 = vst.msk [vmem:[%s6541_s10 + $0xd0] sm:$0xff] %vm128_vm0, %v4658_v33 }
 0x55e   :  { %v4660_v2 = vpop.eup %4659 }
 0x55f   :  { %v4662_v38 = vpop.eup %4661  ;;  %3589 = vst.msk [vmem:[%s6541_s10 + $0xd8] sm:$0xff] %vm128_vm0, %v4660_v2 }
 0x560   :  { %v3496_v53 = vadd.f32 1.0, %v4662_v38 }
 0x561   :  { %v4664_v4 = vpop.eup %4663 }
 0x562   :  { %4669 = vrcp.f32 %v3496_v53  ;;  %v3497_v10 = vadd.f32 1.0, %v4664_v4 }
 0x564   :  { %v4666_v55 = vpop.eup %4665  ;;  %4671 = vrcp.f32 %v3497_v10 }
 0x565   :  { %3590 = vst.msk [vmem:[%s6541_s10 + $0xe0] sm:$0xff] %vm128_vm0, %v4666_v55 }
 0x566   :  { %v4668_v9 = vpop.eup %4667 }
 0x567   :  { %3591 = vst.msk [vmem:[%s6541_s10 + $0xe8] sm:$0xff] %vm128_vm0, %v4668_v9 }
 0x56c   :  { %v4670_v32 = vpop.eup %4669 }
 0x56d   :  { %3592 = vst.msk [vmem:[%s6541_s10 + $0xf0] sm:$0xff] %vm128_vm0, %v4670_v32 }
 0x56e   :  { %v4672_v43 = vpop.eup %4671 }
 0x56f   :  { %3593 = vst.msk [vmem:[%s6541_s10 + $0xf8] sm:$0xff] %vm128_vm0, %v4672_v43 }
 0x570   :  { %3670 = vsyncpa [#allocation3], 1 }
 0x571   :  { %3671 = vsyncpa [#allocation5], 1 }

</bundles_post_ra>
